<compile_context>
chip_gen: v6e
topology: v6e:2x2x1
jax: 0.10.0
libtpu: 0.0.40
codegen_flags: <defaults>
</compile_context>

<pallas_src>
from functools import partial

import jax
import jax.numpy as jnp
from jax.experimental import pallas as pl
from jax.experimental.pallas import tpu as pltpu


def _round_up(n, m):
    return (n + m - 1) // m * m


_VMEM_LIMIT_CACHE = None


def _vmem_limit():
    """~75% of physical VMEM (96 MiB on v5e/v6e, 48 MiB on v7x)."""
    global _VMEM_LIMIT_CACHE
    if _VMEM_LIMIT_CACHE is None:
        lim = 48 * 1024 * 1024
        try:
            cap = getattr(pltpu.get_tpu_info(), "vmem_capacity_bytes", None)
            if cap:
                lim = min(int(cap) * 3 // 4, 96 * 1024 * 1024)
        except Exception:
            pass
        _VMEM_LIMIT_CACHE = lim
    return _VMEM_LIMIT_CACHE


# ----------------------------------------------------------------------------
# Pallas kernel 1: tiled matmul + folded-BN affine (+ residual/concat) (+ ReLU)
# ----------------------------------------------------------------------------

def _matmul_affine_kernel(*refs, relu, has_res):
    if has_res:
        x_ref, w_ref, scale_ref, shift_ref, res_ref, o_ref = refs
    else:
        x_ref, w_ref, scale_ref, shift_ref, o_ref = refs
        res_ref = None
    acc = jnp.dot(x_ref[...], w_ref[...], preferred_element_type=jnp.float32)
    out = acc * scale_ref[...] + shift_ref[...]
    if has_res:
        out = out + res_ref[...].astype(jnp.float32)
    if relu:
        out = jnp.maximum(out, 0.0)
    o_ref[...] = out.astype(o_ref.dtype)


def pallas_matmul_affine(x, w, scale, shift, residual=None, relu=False,
                         out_dtype=jnp.bfloat16):
    """out = act((x @ w) * scale + shift [+ residual]), tiled over (M, N).

    `w` is a pre-padded bf16 (K, Np) matrix (Np % 128 == 0); the padded output
    columns stay in the activation and feed the next layer (no slicing)."""
    M, K = x.shape
    Kw, Np = w.shape
    assert Kw == K and Np % 128 == 0

    Mp = _round_up(M, 8)
    if Mp != M:
        x = jnp.pad(x, ((0, Mp - M), (0, 0)))
        if residual is not None:
            residual = jnp.pad(residual, ((0, Mp - M), (0, 0)))

    tn = 256 if Np % 256 == 0 else 128
    tm = Mp
    if Mp % 16 == 0:
        # Full-M x tile (weights DMA'd once), capped at ~4 MiB of bf16.
        while tm % 16 == 0 and tm > 256 and tm * K * 2 > (4 << 20):
            tm //= 2
        # v7x megacore: keep >=2 grid blocks when there is enough work.
        if (Np // tn) * (Mp // tm) < 2 and tm % 16 == 0 and tm >= 32:
            tm //= 2
    nm, nn = Mp // tm, Np // tn

    xb = x.astype(jnp.bfloat16)
    args = [xb, w, scale, shift]
    in_specs = [
        pl.BlockSpec((tm, K), lambda i, j: (i, 0)),
        pl.BlockSpec((K, tn), lambda i, j: (0, j)),
        pl.BlockSpec((1, tn), lambda i, j: (0, j)),
        pl.BlockSpec((1, tn), lambda i, j: (0, j)),
    ]
    has_res = residual is not None
    if has_res:
        assert residual.shape == (Mp, Np)
        args.append(residual.astype(jnp.bfloat16))
        in_specs.append(pl.BlockSpec((tm, tn), lambda i, j: (i, j)))

    flops = 2 * Mp * K * Np
    bytes_accessed = (Mp * K + K * Np) * 2 + Mp * Np * 2 * (2 if has_res else 1)

    out = pl.pallas_call(
        partial(_matmul_affine_kernel, relu=relu, has_res=has_res),
        out_shape=jax.ShapeDtypeStruct((Mp, Np), out_dtype),
        grid=(nm, nn),
        in_specs=in_specs,
        out_specs=pl.BlockSpec((tm, tn), lambda i, j: (i, j)),
        compiler_params=pltpu.CompilerParams(
            dimension_semantics=("parallel", "parallel"),
            vmem_limit_bytes=_vmem_limit()),
        cost_estimate=pl.CostEstimate(flops=flops, transcendentals=0,
                                      bytes_accessed=int(bytes_accessed)),
    )(*args)
    return out if Mp == M else out[:M]


# ----------------------------------------------------------------------------
# Pallas kernel 2: generic 3-D stencil (stem conv / depthwise conv / avg-pool)
# Grid: (N, C/128, Do, Ho/th).  Taps are contiguous in-kernel slices.
# ----------------------------------------------------------------------------

def _stencil_kernel(*refs, offsets, stride, phase_keys, relu, tiled_h):
    n_ph = len(phase_keys)
    phases = refs[:n_ph]
    w_ref, scale_ref, shift_ref, o_ref = refs[n_ph:]
    kidx = {k: i for i, k in enumerate(phase_keys)}
    th, Wo = o_ref.shape[2], o_ref.shape[3]
    do = pl.program_id(2)
    ho = pl.program_id(3) * th if tiled_h else 0

    w_all = w_ref[...].astype(jnp.float32)   # (K, tc) -- hoisted single load
    acc = jnp.zeros(o_ref.shape, jnp.float32)
    # Unrolled tap loop: bf16 tap loads, f32 FMAs, acc kept small (<=16 vregs).
    for k, (kd, kh, kw) in enumerate(offsets):
        pref = phases[kidx[(kd % stride, kh % stride, kw % stride)]]
        fd, fh, fw = kd // stride, kh // stride, kw // stride
        tap = pref[:, pl.ds(do + fd, 1), pl.ds(ho + fh, th), pl.ds(fw, Wo), :]
        acc = acc + tap.astype(jnp.float32) * w_all[k]
    out = acc * scale_ref[...] + shift_ref[...]
    if relu:
        out = jnp.maximum(out, 0.0)
    o_ref[...] = out.astype(o_ref.dtype)


def pallas_stencil_affine(x5, w, scale, shift, *, ksize, stride, pad, relu,
                          cin_one=False, out_dtype=jnp.bfloat16):
    """out[n,o,:,:,c] = act(sum_k x_pad[n, stride*o + k, ...] * w[k,c]) * scale + shift.

    Covers the 3x3x3 stem conv (Cin=1 broadcast), depthwise 3x3x3 convs and
    the (1,3,3) average pool.  Channel dim of w/scale/shift/output is padded
    to a multiple of 128 (lane-dense).  For stride 2 the padded activation is
    split once in XLA into parity phases so every tap is a contiguous slice."""
    N, D, H, W, Cin = x5.shape
    kd_, kh_, kw_ = ksize
    pd_, ph_, pw_ = pad
    Do = (D + 2 * pd_ - kd_) // stride + 1
    Ho = (H + 2 * ph_ - kh_) // stride + 1
    Wo = (W + 2 * pw_ - kw_) // stride + 1
    Cout = w.shape[1]
    assert Cout % 128 == 0
    assert cin_one or Cin == Cout

    xp = jnp.pad(x5, ((0, 0), (pd_, pd_), (ph_, ph_), (pw_, pw_), (0, 0)))
    offsets = tuple((a, b, c) for a in range(kd_) for b in range(kh_)
                    for c in range(kw_))

    if stride == 1:
        phase_keys = ((0, 0, 0),)
        phase_list = [xp]
    else:
        Dp_, Hp_, Wp_ = xp.shape[1:4]
        xp = jnp.pad(xp, ((0, 0), (0, Dp_ % 2), (0, Hp_ % 2), (0, Wp_ % 2),
                          (0, 0)))
        pars_d = sorted({a % 2 for a in range(kd_)})
        pars_h = sorted({b % 2 for b in range(kh_)})
        pars_w = sorted({c % 2 for c in range(kw_)})
        phase_keys = tuple((a, b, c) for a in pars_d for b in pars_h
                           for c in pars_w)
        phase_list = [xp[:, a::2, b::2, c::2, :] for (a, b, c) in phase_keys]

    tc = 128
    n_cblk = Cout // tc
    th = Ho
    while th % 2 == 0 and th * Wo * tc > 16 * 1024:   # acc <= ~16 vregs
        th //= 2
    n_hblk = Ho // th
    ph_shape = phase_list[0].shape

    if cin_one:
        phase_spec = pl.BlockSpec((1,) + ph_shape[1:4] + (1,),
                                  lambda n, c, d, h: (n, 0, 0, 0, 0))
    else:
        phase_spec = pl.BlockSpec((1,) + ph_shape[1:4] + (tc,),
                                  lambda n, c, d, h: (n, 0, 0, 0, c))
    in_specs = [phase_spec] * len(phase_list) + [
        pl.BlockSpec((w.shape[0], tc), lambda n, c, d, h: (0, c)),
        pl.BlockSpec((1, tc), lambda n, c, d, h: (0, c)),
        pl.BlockSpec((1, tc), lambda n, c, d, h: (0, c)),
    ]
    out_spec = pl.BlockSpec((1, 1, th, Wo, tc),
                            lambda n, c, d, h: (n, d, h, 0, c))

    flops = 2 * N * Do * Ho * Wo * Cout * len(offsets)
    in_bytes = sum(int(p.size) * p.dtype.itemsize for p in phase_list)
    bytes_accessed = in_bytes + N * Do * Ho * Wo * Cout * 2 + int(w.size) * 4

    out = pl.pallas_call(
        partial(_stencil_kernel, offsets=offsets, stride=stride,
                phase_keys=phase_keys, relu=relu, tiled_h=(n_hblk > 1)),
        out_shape=jax.ShapeDtypeStruct((N, Do, Ho, Wo, Cout), out_dtype),
        grid=(N, n_cblk, Do, n_hblk),
        in_specs=in_specs,
        out_specs=out_spec,
        compiler_params=pltpu.CompilerParams(
            dimension_semantics=("parallel",) * 4,
            vmem_limit_bytes=_vmem_limit()),
        cost_estimate=pl.CostEstimate(flops=flops, transcendentals=0,
                                      bytes_accessed=int(bytes_accessed)),
    )(*(phase_list + [w, scale, shift]))
    return out


# ----------------------------------------------------------------------------
# Parameter construction (deterministic, synthetic; BN folded for inference)
# ----------------------------------------------------------------------------

class RNG:
    def __init__(self, seed):
        self.key = jax.random.PRNGKey(seed)

    def next(self):
        self.key, sub = jax.random.split(self.key)
        return sub


def _fold_bn(bias, cout):
    gamma = jnp.ones((cout,), jnp.float32)
    beta = jnp.zeros((cout,), jnp.float32)
    mean = jnp.zeros((cout,), jnp.float32)
    var = jnp.ones((cout,), jnp.float32)
    eps = 1e-5
    scale = gamma / jnp.sqrt(var + eps)
    shift = (bias - mean) * scale + beta
    return scale, shift


def make_stencil_bn(rng, ktaps, cout):
    """Stem / depthwise conv: per-tap weights (K, Cpad) + folded BN (padded)."""
    cpad = _round_up(cout, 128)
    w = jax.random.normal(rng.next(), (ktaps, cout), jnp.float32) * 0.05
    b = jax.random.normal(rng.next(), (cout,), jnp.float32) * 0.05
    scale, shift = _fold_bn(b, cout)
    W = jnp.zeros((ktaps, cpad), jnp.float32).at[:, :cout].set(w)
    S = jnp.zeros((1, cpad), jnp.float32).at[0, :cout].set(scale)
    B = jnp.zeros((1, cpad), jnp.float32).at[0, :cout].set(shift)
    return dict(w=W, scale=S, shift=B)


def make_pointwise_bn(rng, cin, cout, groups, *, k_pad, out_width,
                      out_offset=0, out_perm=None):
    """Grouped 1x1x1 conv + BN as a block-diagonal, lane-padded (k_pad,
    out_width) bf16 matrix.  `out_perm` folds a following ChannelShuffle;
    `out_offset` places the real output columns (used to fuse the shortcut
    concat into the matmul epilogue)."""
    cin_g, cout_g = cin // groups, cout // groups
    w = jnp.zeros((cin, cout), jnp.float32)
    for g in range(groups):
        blk = jax.random.normal(rng.next(), (cin_g, cout_g), jnp.float32) * 0.05
        w = w.at[g * cin_g:(g + 1) * cin_g,
                 g * cout_g:(g + 1) * cout_g].set(blk)
    b = jax.random.normal(rng.next(), (cout,), jnp.float32) * 0.05
    scale, shift = _fold_bn(b, cout)
    if out_perm is not None:
        w = w[:, out_perm]
        scale = scale[out_perm]
        shift = shift[out_perm]
    W = jnp.zeros((k_pad, out_width), jnp.float32)
    W = W.at[:cin, out_offset:out_offset + cout].set(w)
    S = jnp.zeros((1, out_width), jnp.float32).at[0, out_offset:out_offset + cout].set(scale)
    B = jnp.zeros((1, out_width), jnp.float32).at[0, out_offset:out_offset + cout].set(shift)
    return dict(w=W.astype(jnp.bfloat16), scale=S, shift=B)


def make_fc(rng, cin, cout, *, k_pad):
    np_ = _round_up(cout, 128)
    w = jax.random.normal(rng.next(), (cin, cout), jnp.float32) * 0.05
    b = jax.random.normal(rng.next(), (cout,), jnp.float32) * 0.05
    W = jnp.zeros((k_pad, np_), jnp.float32).at[:cin, :cout].set(w)
    S = jnp.zeros((1, np_), jnp.float32).at[0, :cout].set(1.0)
    B = jnp.zeros((1, np_), jnp.float32).at[0, :cout].set(b)
    return dict(w=W.astype(jnp.bfloat16), scale=S, shift=B, n_out=cout)


def init_shufflenet(seed, num_blocks, num_classes=2, groups=3,
                    fc_feature_dim=512):
    rng = RNG(seed)
    out_channels = {1: [24, 144, 288, 567], 2: [24, 200, 400, 800],
                    3: [24, 240, 480, 960], 4: [24, 272, 544, 1088],
                    8: [24, 384, 768, 1536]}[groups]
    params = {"groups": groups}
    params["conv1"] = make_stencil_bn(rng, 27, out_channels[0])  # 3x3x3, 1->24
    in_ch = out_channels[0]
    stages = []
    for nb, oc in zip(num_blocks, out_channels[1:]):
        strides = [2] + [1] * (nb - 1)
        blocks = []
        for st in strides:
            use_cat = (st != 1) or (in_ch != oc)
            mid = oc // 4
            expand_out = (oc - in_ch) if use_cat else oc
            out_off = in_ch if use_cat else 0
            # ChannelShuffle(groups) on the bottleneck output is a fixed
            # permutation j -> (j % groups) * (mid//groups) + j // groups;
            # fold it into the bottleneck weight columns.
            cpg = mid // groups
            shuffle_perm = jnp.arange(mid).reshape(groups, cpg).T.reshape(-1)
            blocks.append(dict(
                stride=st, use_cat=use_cat,
                bottleneck=make_pointwise_bn(
                    rng, in_ch, mid, groups,
                    k_pad=_round_up(in_ch, 128),
                    out_width=_round_up(mid, 128),
                    out_offset=0, out_perm=shuffle_perm),
                depthwise=make_stencil_bn(rng, 27, mid),
                expand=make_pointwise_bn(
                    rng, mid, expand_out, groups,
                    k_pad=_round_up(mid, 128),
                    out_width=_round_up(oc, 128),
                    out_offset=out_off),
            ))
            in_ch = oc
        stages.append(blocks)
    params["stages"] = stages
    params["fc1"] = make_fc(rng, out_channels[3], 512,
                            k_pad=_round_up(out_channels[3], 128))
    params["fc2"] = make_fc(rng, 512, num_classes, k_pad=512)
    params["fc3"] = make_fc(rng, fc_feature_dim, num_classes,
                            k_pad=fc_feature_dim)
    return params


# ----------------------------------------------------------------------------
# Forward pass
# ----------------------------------------------------------------------------

def avgpool_shortcut(x5):
    # AvgPool3d(kernel=(1,3,3), stride=(2,2,2), padding=(0,1,1)); divisor is
    # always 9 (count_include_pad).  Padded channels are zero and stay zero.
    C = x5.shape[-1]
    w = jnp.full((9, C), 1.0 / 9.0, jnp.float32)
    scale = jnp.ones((1, C), jnp.float32)
    shift = jnp.zeros((1, C), jnp.float32)
    return pallas_stencil_affine(x5, w, scale, shift, ksize=(1, 3, 3),
                                 stride=2, pad=(0, 1, 1), relu=False)


def shufflenet_unit(x5, p):
    stride = p["stride"]
    N, D, H, W, Cp_in = x5.shape
    x2d = x5.reshape(N * D * H * W, Cp_in)

    # bottleneck grouped pointwise conv + BN + ReLU (channel shuffle folded
    # into the weight columns at init -> no shuffle op at run time).
    pb = p["bottleneck"]
    b2d = pallas_matmul_affine(x2d, pb["w"], pb["scale"], pb["shift"],
                               relu=True)
    b5 = b2d.reshape(N, D, H, W, b2d.shape[1])

    # depthwise 3x3x3 conv + BN
    pdw = p["depthwise"]
    d5 = pallas_stencil_affine(b5, pdw["w"], pdw["scale"], pdw["shift"],
                               ksize=(3, 3, 3), stride=stride, pad=(1, 1, 1),
                               relu=False)
    No, Do, Ho, Wo, Cp_mid = d5.shape
    d2d = d5.reshape(No * Do * Ho * Wo, Cp_mid)

    pe = p["expand"]
    out_width = pe["w"].shape[1]
    if p["use_cat"]:
        # concat fused into the matmul: the expand weight's real columns sit
        # at [in_ch:oc]; the avg-pooled shortcut (real at [0:in_ch], zero
        # elsewhere) is added as the residual; ReLU applied to the sum.
        s5 = avgpool_shortcut(x5)
        s2d = s5.reshape(No * Do * Ho * Wo, s5.shape[-1])
        if s2d.shape[1] < out_width:
            s2d = jnp.pad(s2d, ((0, 0), (0, out_width - s2d.shape[1])))
        out2d = pallas_matmul_affine(d2d, pe["w"], pe["scale"], pe["shift"],
                                     residual=s2d, relu=True)
    else:
        # identity shortcut: residual add + ReLU fused into the epilogue.
        out2d = pallas_matmul_affine(d2d, pe["w"], pe["scale"], pe["shift"],
                                     residual=x2d, relu=True)
    return out2d.reshape(No, Do, Ho, Wo, out_width)


def shufflenet_forward(params, x, gcn_feature, add_gcn_middle_feature,
                       feature_fusion_method):
    # x arrives in PyTorch NCDHW (N, 1, D, H, W) -> channels-last (Cin = 1).
    x5 = jnp.transpose(x, (0, 2, 3, 4, 1)).astype(jnp.float32)
    p1 = params["conv1"]
    x5 = pallas_stencil_affine(x5, p1["w"], p1["scale"], p1["shift"],
                               ksize=(3, 3, 3), stride=1, pad=(1, 1, 1),
                               relu=True, cin_one=True)
    for stage in params["stages"]:
        for blk in stage:
            x5 = shufflenet_unit(x5, blk)

    # AdaptiveAvgPool3d(1): tiny (N, C) reduction; plain jnp.mean.
    N, D, H, W, C = x5.shape
    pooled = jnp.mean(x5.astype(jnp.float32).reshape(N, D * H * W, C), axis=1)

    fc1 = params["fc1"]
    feature = pallas_matmul_affine(pooled, fc1["w"], fc1["scale"],
                                   fc1["shift"],
                                   out_dtype=jnp.float32)[:, :fc1["n_out"]]

    if add_gcn_middle_feature:
        if feature_fusion_method == "cat":
            catX = jnp.concatenate([feature, gcn_feature], axis=1)
        elif feature_fusion_method == "add":
            catX = jnp.concatenate(
                [feature + gcn_feature[:, :512], gcn_feature[:, 512:]], axis=1)
        elif feature_fusion_method == "avg":
            catX = jnp.concatenate(
                [(feature + gcn_feature[:, :512]) / 2.0, gcn_feature[:, 512:]],
                axis=1)
        fc3 = params["fc3"]
        logits = pallas_matmul_affine(catX, fc3["w"], fc3["scale"],
                                      fc3["shift"],
                                      out_dtype=jnp.float32)[:, :fc3["n_out"]]
    else:
        fc2 = params["fc2"]
        logits = pallas_matmul_affine(feature, fc2["w"], fc2["scale"],
                                      fc2["shift"],
                                      out_dtype=jnp.float32)[:, :fc2["n_out"]]
    return logits, feature


# ----------------------------------------------------------------------------
# Main
# ----------------------------------------------------------------------------

if __name__ == "__main__":
    num_blocks = [2, 1, 1]   # small synthetic config; exercises cat + add paths
    groups = 3
    num_classes = 2
    params = init_shufflenet(seed=42, num_blocks=num_blocks,
                             num_classes=num_classes, groups=groups,
                             fc_feature_dim=512)

    key = jax.random.PRNGKey(0)
    kx, kg = jax.random.split(key)
    x = jax.random.normal(kx, (2, 1, 8, 16, 16), jnp.float32)   # (N, 1, D, H, W)
    gcn_feature = jax.random.normal(kg, (2, 512), jnp.float32)

    logits, feature = shufflenet_forward(params, x, gcn_feature,
                                         add_gcn_middle_feature=False,
                                         feature_fusion_method="add")
    jax.block_until_ready((logits, feature))
    assert logits.shape == (2, num_classes) and feature.shape == (2, 512)
    assert bool(jnp.all(jnp.isfinite(logits)))
    assert bool(jnp.all(jnp.isfinite(feature)))
    print("KERNEL_OK")
</pallas_src>

<mosaic_0001>
module attributes {stable_mosaic.version = 11 : i64} {
  func.func @_stencil_kernel(%arg0: i32, %arg1: i32, %arg2: i32, %arg3: i32, %arg4: memref<1x10x18x18x1xf32, #tpu.memory_space<vmem>>, %arg5: memref<27x128xf32, #tpu.memory_space<vmem>>, %arg6: memref<1x128xf32, #tpu.memory_space<vmem>>, %arg7: memref<1x128xf32, #tpu.memory_space<vmem>>, %arg8: memref<1x1x8x16x128xbf16, #tpu.memory_space<vmem>>) attributes {dimension_semantics = [#tpu.dimension_semantics<parallel>, #tpu.dimension_semantics<parallel>, #tpu.dimension_semantics<parallel>, #tpu.dimension_semantics<parallel>], iteration_bounds = array<i64: 2, 1, 8, 2>, scalar_prefetch = 0 : i64, scratch_operands = 0 : i64, tpu.core_type = #tpu.core_type<tc>, window_params = [{transform_indices = @transform_0, window_bounds = array<i64: 1, 10, 18, 18, 1>}, {transform_indices = @transform_1, window_bounds = array<i64: 27, 128>}, {transform_indices = @transform_2, window_bounds = array<i64: 1, 128>}, {transform_indices = @transform_3, window_bounds = array<i64: 1, 128>}, {transform_indices = @transform_4, window_bounds = array<i64: 1, 1, 8, 16, 128>}]} {
    %c8_i32 = arith.constant 8 : i32
    %0 = arith.muli %arg3, %c8_i32 : i32
    %c0 = arith.constant 0 : index
    %c0_0 = arith.constant 0 : index
    %1 = vector.load %arg5[%c0, %c0_0] : memref<27x128xf32, #tpu.memory_space<vmem>>, vector<27x128xf32>
    %cst = arith.constant 0.000000e+00 : f32
    %2 = vector.broadcast %cst : f32 to vector<1x1x8x16x128xf32>
    %c0_i32 = arith.constant 0 : i32
    %3 = arith.addi %arg2, %c0_i32 : i32
    %c0_i32_1 = arith.constant 0 : i32
    %4 = arith.addi %0, %c0_i32_1 : i32
    %c0_2 = arith.constant 0 : index
    %5 = arith.index_cast %3 : i32 to index
    %6 = arith.index_cast %4 : i32 to index
    %c0_3 = arith.constant 0 : index
    %c0_4 = arith.constant 0 : index
    %7 = vector.load %arg4[%c0_2, %5, %6, %c0_3, %c0_4] : memref<1x10x18x18x1xf32, #tpu.memory_space<vmem>>, vector<1x1x8x16x1xf32>
    %8 = vector.extract_strided_slice %1 {offsets = [0, 0], sizes = [1, 128], strides = [1, 1]} : vector<27x128xf32> to vector<1x128xf32>
    %9 = vector.shape_cast %8 : vector<1x128xf32> to vector<128xf32>
    %10 = vector.shape_cast %9 : vector<128xf32> to vector<1x1x1x1x128xf32>
    %11 = vector.broadcast %7 : vector<1x1x8x16x1xf32> to vector<1x1x8x16x128xf32>
    %12 = vector.broadcast %10 : vector<1x1x1x1x128xf32> to vector<1x1x8x16x128xf32>
    %13 = arith.mulf %11, %12 : vector<1x1x8x16x128xf32>
    %14 = arith.addf %2, %13 : vector<1x1x8x16x128xf32>
    %c0_i32_5 = arith.constant 0 : i32
    %15 = arith.addi %arg2, %c0_i32_5 : i32
    %c0_i32_6 = arith.constant 0 : i32
    %16 = arith.addi %0, %c0_i32_6 : i32
    %c0_7 = arith.constant 0 : index
    %17 = arith.index_cast %15 : i32 to index
    %18 = arith.index_cast %16 : i32 to index
    %c1 = arith.constant 1 : index
    %c0_8 = arith.constant 0 : index
    %19 = vector.load %arg4[%c0_7, %17, %18, %c1, %c0_8] : memref<1x10x18x18x1xf32, #tpu.memory_space<vmem>>, vector<1x1x8x16x1xf32>
    %20 = vector.extract_strided_slice %1 {offsets = [1, 0], sizes = [1, 128], strides = [1, 1]} : vector<27x128xf32> to vector<1x128xf32>
    %21 = vector.shape_cast %20 : vector<1x128xf32> to vector<128xf32>
    %22 = vector.shape_cast %21 : vector<128xf32> to vector<1x1x1x1x128xf32>
    %23 = vector.broadcast %19 : vector<1x1x8x16x1xf32> to vector<1x1x8x16x128xf32>
    %24 = vector.broadcast %22 : vector<1x1x1x1x128xf32> to vector<1x1x8x16x128xf32>
    %25 = arith.mulf %23, %24 : vector<1x1x8x16x128xf32>
    %26 = arith.addf %14, %25 : vector<1x1x8x16x128xf32>
    %c0_i32_9 = arith.constant 0 : i32
    %27 = arith.addi %arg2, %c0_i32_9 : i32
    %c0_i32_10 = arith.constant 0 : i32
    %28 = arith.addi %0, %c0_i32_10 : i32
    %c0_11 = arith.constant 0 : index
    %29 = arith.index_cast %27 : i32 to index
    %30 = arith.index_cast %28 : i32 to index
    %c2 = arith.constant 2 : index
    %c0_12 = arith.constant 0 : index
    %31 = vector.load %arg4[%c0_11, %29, %30, %c2, %c0_12] : memref<1x10x18x18x1xf32, #tpu.memory_space<vmem>>, vector<1x1x8x16x1xf32>
    %32 = vector.extract_strided_slice %1 {offsets = [2, 0], sizes = [1, 128], strides = [1, 1]} : vector<27x128xf32> to vector<1x128xf32>
    %33 = vector.shape_cast %32 : vector<1x128xf32> to vector<128xf32>
    %34 = vector.shape_cast %33 : vector<128xf32> to vector<1x1x1x1x128xf32>
    %35 = vector.broadcast %31 : vector<1x1x8x16x1xf32> to vector<1x1x8x16x128xf32>
    %36 = vector.broadcast %34 : vector<1x1x1x1x128xf32> to vector<1x1x8x16x128xf32>
    %37 = arith.mulf %35, %36 : vector<1x1x8x16x128xf32>
    %38 = arith.addf %26, %37 : vector<1x1x8x16x128xf32>
    %c0_i32_13 = arith.constant 0 : i32
    %39 = arith.addi %arg2, %c0_i32_13 : i32
    %c1_i32 = arith.constant 1 : i32
    %40 = arith.addi %0, %c1_i32 : i32
    %c0_14 = arith.constant 0 : index
    %41 = arith.index_cast %39 : i32 to index
    %42 = arith.index_cast %40 : i32 to index
    %c0_15 = arith.constant 0 : index
    %c0_16 = arith.constant 0 : index
    %43 = vector.load %arg4[%c0_14, %41, %42, %c0_15, %c0_16] : memref<1x10x18x18x1xf32, #tpu.memory_space<vmem>>, vector<1x1x8x16x1xf32>
    %44 = vector.extract_strided_slice %1 {offsets = [3, 0], sizes = [1, 128], strides = [1, 1]} : vector<27x128xf32> to vector<1x128xf32>
    %45 = vector.shape_cast %44 : vector<1x128xf32> to vector<128xf32>
    %46 = vector.shape_cast %45 : vector<128xf32> to vector<1x1x1x1x128xf32>
    %47 = vector.broadcast %43 : vector<1x1x8x16x1xf32> to vector<1x1x8x16x128xf32>
    %48 = vector.broadcast %46 : vector<1x1x1x1x128xf32> to vector<1x1x8x16x128xf32>
    %49 = arith.mulf %47, %48 : vector<1x1x8x16x128xf32>
    %50 = arith.addf %38, %49 : vector<1x1x8x16x128xf32>
    %c0_i32_17 = arith.constant 0 : i32
    %51 = arith.addi %arg2, %c0_i32_17 : i32
    %c1_i32_18 = arith.constant 1 : i32
    %52 = arith.addi %0, %c1_i32_18 : i32
    %c0_19 = arith.constant 0 : index
    %53 = arith.index_cast %51 : i32 to index
    %54 = arith.index_cast %52 : i32 to index
    %c1_20 = arith.constant 1 : index
    %c0_21 = arith.constant 0 : index
    %55 = vector.load %arg4[%c0_19, %53, %54, %c1_20, %c0_21] : memref<1x10x18x18x1xf32, #tpu.memory_space<vmem>>, vector<1x1x8x16x1xf32>
    %56 = vector.extract_strided_slice %1 {offsets = [4, 0], sizes = [1, 128], strides = [1, 1]} : vector<27x128xf32> to vector<1x128xf32>
    %57 = vector.shape_cast %56 : vector<1x128xf32> to vector<128xf32>
    %58 = vector.shape_cast %57 : vector<128xf32> to vector<1x1x1x1x128xf32>
    %59 = vector.broadcast %55 : vector<1x1x8x16x1xf32> to vector<1x1x8x16x128xf32>
    %60 = vector.broadcast %58 : vector<1x1x1x1x128xf32> to vector<1x1x8x16x128xf32>
    %61 = arith.mulf %59, %60 : vector<1x1x8x16x128xf32>
    %62 = arith.addf %50, %61 : vector<1x1x8x16x128xf32>
    %c0_i32_22 = arith.constant 0 : i32
    %63 = arith.addi %arg2, %c0_i32_22 : i32
    %c1_i32_23 = arith.constant 1 : i32
    %64 = arith.addi %0, %c1_i32_23 : i32
    %c0_24 = arith.constant 0 : index
    %65 = arith.index_cast %63 : i32 to index
    %66 = arith.index_cast %64 : i32 to index
    %c2_25 = arith.constant 2 : index
    %c0_26 = arith.constant 0 : index
    %67 = vector.load %arg4[%c0_24, %65, %66, %c2_25, %c0_26] : memref<1x10x18x18x1xf32, #tpu.memory_space<vmem>>, vector<1x1x8x16x1xf32>
    %68 = vector.extract_strided_slice %1 {offsets = [5, 0], sizes = [1, 128], strides = [1, 1]} : vector<27x128xf32> to vector<1x128xf32>
    %69 = vector.shape_cast %68 : vector<1x128xf32> to vector<128xf32>
    %70 = vector.shape_cast %69 : vector<128xf32> to vector<1x1x1x1x128xf32>
    %71 = vector.broadcast %67 : vector<1x1x8x16x1xf32> to vector<1x1x8x16x128xf32>
    %72 = vector.broadcast %70 : vector<1x1x1x1x128xf32> to vector<1x1x8x16x128xf32>
    %73 = arith.mulf %71, %72 : vector<1x1x8x16x128xf32>
    %74 = arith.addf %62, %73 : vector<1x1x8x16x128xf32>
    %c0_i32_27 = arith.constant 0 : i32
    %75 = arith.addi %arg2, %c0_i32_27 : i32
    %c2_i32 = arith.constant 2 : i32
    %76 = arith.addi %0, %c2_i32 : i32
    %c0_28 = arith.constant 0 : index
    %77 = arith.index_cast %75 : i32 to index
    %78 = arith.index_cast %76 : i32 to index
    %c0_29 = arith.constant 0 : index
    %c0_30 = arith.constant 0 : index
    %79 = vector.load %arg4[%c0_28, %77, %78, %c0_29, %c0_30] : memref<1x10x18x18x1xf32, #tpu.memory_space<vmem>>, vector<1x1x8x16x1xf32>
    %80 = vector.extract_strided_slice %1 {offsets = [6, 0], sizes = [1, 128], strides = [1, 1]} : vector<27x128xf32> to vector<1x128xf32>
    %81 = vector.shape_cast %80 : vector<1x128xf32> to vector<128xf32>
    %82 = vector.shape_cast %81 : vector<128xf32> to vector<1x1x1x1x128xf32>
    %83 = vector.broadcast %79 : vector<1x1x8x16x1xf32> to vector<1x1x8x16x128xf32>
    %84 = vector.broadcast %82 : vector<1x1x1x1x128xf32> to vector<1x1x8x16x128xf32>
    %85 = arith.mulf %83, %84 : vector<1x1x8x16x128xf32>
    %86 = arith.addf %74, %85 : vector<1x1x8x16x128xf32>
    %c0_i32_31 = arith.constant 0 : i32
    %87 = arith.addi %arg2, %c0_i32_31 : i32
    %c2_i32_32 = arith.constant 2 : i32
    %88 = arith.addi %0, %c2_i32_32 : i32
    %c0_33 = arith.constant 0 : index
    %89 = arith.index_cast %87 : i32 to index
    %90 = arith.index_cast %88 : i32 to index
    %c1_34 = arith.constant 1 : index
    %c0_35 = arith.constant 0 : index
    %91 = vector.load %arg4[%c0_33, %89, %90, %c1_34, %c0_35] : memref<1x10x18x18x1xf32, #tpu.memory_space<vmem>>, vector<1x1x8x16x1xf32>
    %92 = vector.extract_strided_slice %1 {offsets = [7, 0], sizes = [1, 128], strides = [1, 1]} : vector<27x128xf32> to vector<1x128xf32>
    %93 = vector.shape_cast %92 : vector<1x128xf32> to vector<128xf32>
    %94 = vector.shape_cast %93 : vector<128xf32> to vector<1x1x1x1x128xf32>
    %95 = vector.broadcast %91 : vector<1x1x8x16x1xf32> to vector<1x1x8x16x128xf32>
    %96 = vector.broadcast %94 : vector<1x1x1x1x128xf32> to vector<1x1x8x16x128xf32>
    %97 = arith.mulf %95, %96 : vector<1x1x8x16x128xf32>
    %98 = arith.addf %86, %97 : vector<1x1x8x16x128xf32>
    %c0_i32_36 = arith.constant 0 : i32
    %99 = arith.addi %arg2, %c0_i32_36 : i32
    %c2_i32_37 = arith.constant 2 : i32
    %100 = arith.addi %0, %c2_i32_37 : i32
    %c0_38 = arith.constant 0 : index
    %101 = arith.index_cast %99 : i32 to index
    %102 = arith.index_cast %100 : i32 to index
    %c2_39 = arith.constant 2 : index
    %c0_40 = arith.constant 0 : index
    %103 = vector.load %arg4[%c0_38, %101, %102, %c2_39, %c0_40] : memref<1x10x18x18x1xf32, #tpu.memory_space<vmem>>, vector<1x1x8x16x1xf32>
    %104 = vector.extract_strided_slice %1 {offsets = [8, 0], sizes = [1, 128], strides = [1, 1]} : vector<27x128xf32> to vector<1x128xf32>
    %105 = vector.shape_cast %104 : vector<1x128xf32> to vector<128xf32>
    %106 = vector.shape_cast %105 : vector<128xf32> to vector<1x1x1x1x128xf32>
    %107 = vector.broadcast %103 : vector<1x1x8x16x1xf32> to vector<1x1x8x16x128xf32>
    %108 = vector.broadcast %106 : vector<1x1x1x1x128xf32> to vector<1x1x8x16x128xf32>
    %109 = arith.mulf %107, %108 : vector<1x1x8x16x128xf32>
    %110 = arith.addf %98, %109 : vector<1x1x8x16x128xf32>
    %c1_i32_41 = arith.constant 1 : i32
    %111 = arith.addi %arg2, %c1_i32_41 : i32
    %c0_i32_42 = arith.constant 0 : i32
    %112 = arith.addi %0, %c0_i32_42 : i32
    %c0_43 = arith.constant 0 : index
    %113 = arith.index_cast %111 : i32 to index
    %114 = arith.index_cast %112 : i32 to index
    %c0_44 = arith.constant 0 : index
    %c0_45 = arith.constant 0 : index
    %115 = vector.load %arg4[%c0_43, %113, %114, %c0_44, %c0_45] : memref<1x10x18x18x1xf32, #tpu.memory_space<vmem>>, vector<1x1x8x16x1xf32>
    %116 = vector.extract_strided_slice %1 {offsets = [9, 0], sizes = [1, 128], strides = [1, 1]} : vector<27x128xf32> to vector<1x128xf32>
    %117 = vector.shape_cast %116 : vector<1x128xf32> to vector<128xf32>
    %118 = vector.shape_cast %117 : vector<128xf32> to vector<1x1x1x1x128xf32>
    %119 = vector.broadcast %115 : vector<1x1x8x16x1xf32> to vector<1x1x8x16x128xf32>
    %120 = vector.broadcast %118 : vector<1x1x1x1x128xf32> to vector<1x1x8x16x128xf32>
    %121 = arith.mulf %119, %120 : vector<1x1x8x16x128xf32>
    %122 = arith.addf %110, %121 : vector<1x1x8x16x128xf32>
    %c1_i32_46 = arith.constant 1 : i32
    %123 = arith.addi %arg2, %c1_i32_46 : i32
    %c0_i32_47 = arith.constant 0 : i32
    %124 = arith.addi %0, %c0_i32_47 : i32
    %c0_48 = arith.constant 0 : index
    %125 = arith.index_cast %123 : i32 to index
    %126 = arith.index_cast %124 : i32 to index
    %c1_49 = arith.constant 1 : index
    %c0_50 = arith.constant 0 : index
    %127 = vector.load %arg4[%c0_48, %125, %126, %c1_49, %c0_50] : memref<1x10x18x18x1xf32, #tpu.memory_space<vmem>>, vector<1x1x8x16x1xf32>
    %128 = vector.extract_strided_slice %1 {offsets = [10, 0], sizes = [1, 128], strides = [1, 1]} : vector<27x128xf32> to vector<1x128xf32>
    %129 = vector.shape_cast %128 : vector<1x128xf32> to vector<128xf32>
    %130 = vector.shape_cast %129 : vector<128xf32> to vector<1x1x1x1x128xf32>
    %131 = vector.broadcast %127 : vector<1x1x8x16x1xf32> to vector<1x1x8x16x128xf32>
    %132 = vector.broadcast %130 : vector<1x1x1x1x128xf32> to vector<1x1x8x16x128xf32>
    %133 = arith.mulf %131, %132 : vector<1x1x8x16x128xf32>
    %134 = arith.addf %122, %133 : vector<1x1x8x16x128xf32>
    %c1_i32_51 = arith.constant 1 : i32
    %135 = arith.addi %arg2, %c1_i32_51 : i32
    %c0_i32_52 = arith.constant 0 : i32
    %136 = arith.addi %0, %c0_i32_52 : i32
    %c0_53 = arith.constant 0 : index
    %137 = arith.index_cast %135 : i32 to index
    %138 = arith.index_cast %136 : i32 to index
    %c2_54 = arith.constant 2 : index
    %c0_55 = arith.constant 0 : index
    %139 = vector.load %arg4[%c0_53, %137, %138, %c2_54, %c0_55] : memref<1x10x18x18x1xf32, #tpu.memory_space<vmem>>, vector<1x1x8x16x1xf32>
    %140 = vector.extract_strided_slice %1 {offsets = [11, 0], sizes = [1, 128], strides = [1, 1]} : vector<27x128xf32> to vector<1x128xf32>
    %141 = vector.shape_cast %140 : vector<1x128xf32> to vector<128xf32>
    %142 = vector.shape_cast %141 : vector<128xf32> to vector<1x1x1x1x128xf32>
    %143 = vector.broadcast %139 : vector<1x1x8x16x1xf32> to vector<1x1x8x16x128xf32>
    %144 = vector.broadcast %142 : vector<1x1x1x1x128xf32> to vector<1x1x8x16x128xf32>
    %145 = arith.mulf %143, %144 : vector<1x1x8x16x128xf32>
    %146 = arith.addf %134, %145 : vector<1x1x8x16x128xf32>
    %c1_i32_56 = arith.constant 1 : i32
    %147 = arith.addi %arg2, %c1_i32_56 : i32
    %c1_i32_57 = arith.constant 1 : i32
    %148 = arith.addi %0, %c1_i32_57 : i32
    %c0_58 = arith.constant 0 : index
    %149 = arith.index_cast %147 : i32 to index
    %150 = arith.index_cast %148 : i32 to index
    %c0_59 = arith.constant 0 : index
    %c0_60 = arith.constant 0 : index
    %151 = vector.load %arg4[%c0_58, %149, %150, %c0_59, %c0_60] : memref<1x10x18x18x1xf32, #tpu.memory_space<vmem>>, vector<1x1x8x16x1xf32>
    %152 = vector.extract_strided_slice %1 {offsets = [12, 0], sizes = [1, 128], strides = [1, 1]} : vector<27x128xf32> to vector<1x128xf32>
    %153 = vector.shape_cast %152 : vector<1x128xf32> to vector<128xf32>
    %154 = vector.shape_cast %153 : vector<128xf32> to vector<1x1x1x1x128xf32>
    %155 = vector.broadcast %151 : vector<1x1x8x16x1xf32> to vector<1x1x8x16x128xf32>
    %156 = vector.broadcast %154 : vector<1x1x1x1x128xf32> to vector<1x1x8x16x128xf32>
    %157 = arith.mulf %155, %156 : vector<1x1x8x16x128xf32>
    %158 = arith.addf %146, %157 : vector<1x1x8x16x128xf32>
    %c1_i32_61 = arith.constant 1 : i32
    %159 = arith.addi %arg2, %c1_i32_61 : i32
    %c1_i32_62 = arith.constant 1 : i32
    %160 = arith.addi %0, %c1_i32_62 : i32
    %c0_63 = arith.constant 0 : index
    %161 = arith.index_cast %159 : i32 to index
    %162 = arith.index_cast %160 : i32 to index
    %c1_64 = arith.constant 1 : index
    %c0_65 = arith.constant 0 : index
    %163 = vector.load %arg4[%c0_63, %161, %162, %c1_64, %c0_65] : memref<1x10x18x18x1xf32, #tpu.memory_space<vmem>>, vector<1x1x8x16x1xf32>
    %164 = vector.extract_strided_slice %1 {offsets = [13, 0], sizes = [1, 128], strides = [1, 1]} : vector<27x128xf32> to vector<1x128xf32>
    %165 = vector.shape_cast %164 : vector<1x128xf32> to vector<128xf32>
    %166 = vector.shape_cast %165 : vector<128xf32> to vector<1x1x1x1x128xf32>
    %167 = vector.broadcast %163 : vector<1x1x8x16x1xf32> to vector<1x1x8x16x128xf32>
    %168 = vector.broadcast %166 : vector<1x1x1x1x128xf32> to vector<1x1x8x16x128xf32>
    %169 = arith.mulf %167, %168 : vector<1x1x8x16x128xf32>
    %170 = arith.addf %158, %169 : vector<1x1x8x16x128xf32>
    %c1_i32_66 = arith.constant 1 : i32
    %171 = arith.addi %arg2, %c1_i32_66 : i32
    %c1_i32_67 = arith.constant 1 : i32
    %172 = arith.addi %0, %c1_i32_67 : i32
    %c0_68 = arith.constant 0 : index
    %173 = arith.index_cast %171 : i32 to index
    %174 = arith.index_cast %172 : i32 to index
    %c2_69 = arith.constant 2 : index
    %c0_70 = arith.constant 0 : index
    %175 = vector.load %arg4[%c0_68, %173, %174, %c2_69, %c0_70] : memref<1x10x18x18x1xf32, #tpu.memory_space<vmem>>, vector<1x1x8x16x1xf32>
    %176 = vector.extract_strided_slice %1 {offsets = [14, 0], sizes = [1, 128], strides = [1, 1]} : vector<27x128xf32> to vector<1x128xf32>
    %177 = vector.shape_cast %176 : vector<1x128xf32> to vector<128xf32>
    %178 = vector.shape_cast %177 : vector<128xf32> to vector<1x1x1x1x128xf32>
    %179 = vector.broadcast %175 : vector<1x1x8x16x1xf32> to vector<1x1x8x16x128xf32>
    %180 = vector.broadcast %178 : vector<1x1x1x1x128xf32> to vector<1x1x8x16x128xf32>
    %181 = arith.mulf %179, %180 : vector<1x1x8x16x128xf32>
    %182 = arith.addf %170, %181 : vector<1x1x8x16x128xf32>
    %c1_i32_71 = arith.constant 1 : i32
    %183 = arith.addi %arg2, %c1_i32_71 : i32
    %c2_i32_72 = arith.constant 2 : i32
    %184 = arith.addi %0, %c2_i32_72 : i32
    %c0_73 = arith.constant 0 : index
    %185 = arith.index_cast %183 : i32 to index
    %186 = arith.index_cast %184 : i32 to index
    %c0_74 = arith.constant 0 : index
    %c0_75 = arith.constant 0 : index
    %187 = vector.load %arg4[%c0_73, %185, %186, %c0_74, %c0_75] : memref<1x10x18x18x1xf32, #tpu.memory_space<vmem>>, vector<1x1x8x16x1xf32>
    %188 = vector.extract_strided_slice %1 {offsets = [15, 0], sizes = [1, 128], strides = [1, 1]} : vector<27x128xf32> to vector<1x128xf32>
    %189 = vector.shape_cast %188 : vector<1x128xf32> to vector<128xf32>
    %190 = vector.shape_cast %189 : vector<128xf32> to vector<1x1x1x1x128xf32>
    %191 = vector.broadcast %187 : vector<1x1x8x16x1xf32> to vector<1x1x8x16x128xf32>
    %192 = vector.broadcast %190 : vector<1x1x1x1x128xf32> to vector<1x1x8x16x128xf32>
    %193 = arith.mulf %191, %192 : vector<1x1x8x16x128xf32>
    %194 = arith.addf %182, %193 : vector<1x1x8x16x128xf32>
    %c1_i32_76 = arith.constant 1 : i32
    %195 = arith.addi %arg2, %c1_i32_76 : i32
    %c2_i32_77 = arith.constant 2 : i32
    %196 = arith.addi %0, %c2_i32_77 : i32
    %c0_78 = arith.constant 0 : index
    %197 = arith.index_cast %195 : i32 to index
    %198 = arith.index_cast %196 : i32 to index
    %c1_79 = arith.constant 1 : index
    %c0_80 = arith.constant 0 : index
    %199 = vector.load %arg4[%c0_78, %197, %198, %c1_79, %c0_80] : memref<1x10x18x18x1xf32, #tpu.memory_space<vmem>>, vector<1x1x8x16x1xf32>
    %200 = vector.extract_strided_slice %1 {offsets = [16, 0], sizes = [1, 128], strides = [1, 1]} : vector<27x128xf32> to vector<1x128xf32>
    %201 = vector.shape_cast %200 : vector<1x128xf32> to vector<128xf32>
    %202 = vector.shape_cast %201 : vector<128xf32> to vector<1x1x1x1x128xf32>
    %203 = vector.broadcast %199 : vector<1x1x8x16x1xf32> to vector<1x1x8x16x128xf32>
    %204 = vector.broadcast %202 : vector<1x1x1x1x128xf32> to vector<1x1x8x16x128xf32>
    %205 = arith.mulf %203, %204 : vector<1x1x8x16x128xf32>
    %206 = arith.addf %194, %205 : vector<1x1x8x16x128xf32>
    %c1_i32_81 = arith.constant 1 : i32
    %207 = arith.addi %arg2, %c1_i32_81 : i32
    %c2_i32_82 = arith.constant 2 : i32
    %208 = arith.addi %0, %c2_i32_82 : i32
    %c0_83 = arith.constant 0 : index
    %209 = arith.index_cast %207 : i32 to index
    %210 = arith.index_cast %208 : i32 to index
    %c2_84 = arith.constant 2 : index
    %c0_85 = arith.constant 0 : index
    %211 = vector.load %arg4[%c0_83, %209, %210, %c2_84, %c0_85] : memref<1x10x18x18x1xf32, #tpu.memory_space<vmem>>, vector<1x1x8x16x1xf32>
    %212 = vector.extract_strided_slice %1 {offsets = [17, 0], sizes = [1, 128], strides = [1, 1]} : vector<27x128xf32> to vector<1x128xf32>
    %213 = vector.shape_cast %212 : vector<1x128xf32> to vector<128xf32>
    %214 = vector.shape_cast %213 : vector<128xf32> to vector<1x1x1x1x128xf32>
    %215 = vector.broadcast %211 : vector<1x1x8x16x1xf32> to vector<1x1x8x16x128xf32>
    %216 = vector.broadcast %214 : vector<1x1x1x1x128xf32> to vector<1x1x8x16x128xf32>
    %217 = arith.mulf %215, %216 : vector<1x1x8x16x128xf32>
    %218 = arith.addf %206, %217 : vector<1x1x8x16x128xf32>
    %c2_i32_86 = arith.constant 2 : i32
    %219 = arith.addi %arg2, %c2_i32_86 : i32
    %c0_i32_87 = arith.constant 0 : i32
    %220 = arith.addi %0, %c0_i32_87 : i32
    %c0_88 = arith.constant 0 : index
    %221 = arith.index_cast %219 : i32 to index
    %222 = arith.index_cast %220 : i32 to index
    %c0_89 = arith.constant 0 : index
    %c0_90 = arith.constant 0 : index
    %223 = vector.load %arg4[%c0_88, %221, %222, %c0_89, %c0_90] : memref<1x10x18x18x1xf32, #tpu.memory_space<vmem>>, vector<1x1x8x16x1xf32>
    %224 = vector.extract_strided_slice %1 {offsets = [18, 0], sizes = [1, 128], strides = [1, 1]} : vector<27x128xf32> to vector<1x128xf32>
    %225 = vector.shape_cast %224 : vector<1x128xf32> to vector<128xf32>
    %226 = vector.shape_cast %225 : vector<128xf32> to vector<1x1x1x1x128xf32>
    %227 = vector.broadcast %223 : vector<1x1x8x16x1xf32> to vector<1x1x8x16x128xf32>
    %228 = vector.broadcast %226 : vector<1x1x1x1x128xf32> to vector<1x1x8x16x128xf32>
    %229 = arith.mulf %227, %228 : vector<1x1x8x16x128xf32>
    %230 = arith.addf %218, %229 : vector<1x1x8x16x128xf32>
    %c2_i32_91 = arith.constant 2 : i32
    %231 = arith.addi %arg2, %c2_i32_91 : i32
    %c0_i32_92 = arith.constant 0 : i32
    %232 = arith.addi %0, %c0_i32_92 : i32
    %c0_93 = arith.constant 0 : index
    %233 = arith.index_cast %231 : i32 to index
    %234 = arith.index_cast %232 : i32 to index
    %c1_94 = arith.constant 1 : index
    %c0_95 = arith.constant 0 : index
    %235 = vector.load %arg4[%c0_93, %233, %234, %c1_94, %c0_95] : memref<1x10x18x18x1xf32, #tpu.memory_space<vmem>>, vector<1x1x8x16x1xf32>
    %236 = vector.extract_strided_slice %1 {offsets = [19, 0], sizes = [1, 128], strides = [1, 1]} : vector<27x128xf32> to vector<1x128xf32>
    %237 = vector.shape_cast %236 : vector<1x128xf32> to vector<128xf32>
    %238 = vector.shape_cast %237 : vector<128xf32> to vector<1x1x1x1x128xf32>
    %239 = vector.broadcast %235 : vector<1x1x8x16x1xf32> to vector<1x1x8x16x128xf32>
    %240 = vector.broadcast %238 : vector<1x1x1x1x128xf32> to vector<1x1x8x16x128xf32>
    %241 = arith.mulf %239, %240 : vector<1x1x8x16x128xf32>
    %242 = arith.addf %230, %241 : vector<1x1x8x16x128xf32>
    %c2_i32_96 = arith.constant 2 : i32
    %243 = arith.addi %arg2, %c2_i32_96 : i32
    %c0_i32_97 = arith.constant 0 : i32
    %244 = arith.addi %0, %c0_i32_97 : i32
    %c0_98 = arith.constant 0 : index
    %245 = arith.index_cast %243 : i32 to index
    %246 = arith.index_cast %244 : i32 to index
    %c2_99 = arith.constant 2 : index
    %c0_100 = arith.constant 0 : index
    %247 = vector.load %arg4[%c0_98, %245, %246, %c2_99, %c0_100] : memref<1x10x18x18x1xf32, #tpu.memory_space<vmem>>, vector<1x1x8x16x1xf32>
    %248 = vector.extract_strided_slice %1 {offsets = [20, 0], sizes = [1, 128], strides = [1, 1]} : vector<27x128xf32> to vector<1x128xf32>
    %249 = vector.shape_cast %248 : vector<1x128xf32> to vector<128xf32>
    %250 = vector.shape_cast %249 : vector<128xf32> to vector<1x1x1x1x128xf32>
    %251 = vector.broadcast %247 : vector<1x1x8x16x1xf32> to vector<1x1x8x16x128xf32>
    %252 = vector.broadcast %250 : vector<1x1x1x1x128xf32> to vector<1x1x8x16x128xf32>
    %253 = arith.mulf %251, %252 : vector<1x1x8x16x128xf32>
    %254 = arith.addf %242, %253 : vector<1x1x8x16x128xf32>
    %c2_i32_101 = arith.constant 2 : i32
    %255 = arith.addi %arg2, %c2_i32_101 : i32
    %c1_i32_102 = arith.constant 1 : i32
    %256 = arith.addi %0, %c1_i32_102 : i32
    %c0_103 = arith.constant 0 : index
    %257 = arith.index_cast %255 : i32 to index
    %258 = arith.index_cast %256 : i32 to index
    %c0_104 = arith.constant 0 : index
    %c0_105 = arith.constant 0 : index
    %259 = vector.load %arg4[%c0_103, %257, %258, %c0_104, %c0_105] : memref<1x10x18x18x1xf32, #tpu.memory_space<vmem>>, vector<1x1x8x16x1xf32>
    %260 = vector.extract_strided_slice %1 {offsets = [21, 0], sizes = [1, 128], strides = [1, 1]} : vector<27x128xf32> to vector<1x128xf32>
    %261 = vector.shape_cast %260 : vector<1x128xf32> to vector<128xf32>
    %262 = vector.shape_cast %261 : vector<128xf32> to vector<1x1x1x1x128xf32>
    %263 = vector.broadcast %259 : vector<1x1x8x16x1xf32> to vector<1x1x8x16x128xf32>
    %264 = vector.broadcast %262 : vector<1x1x1x1x128xf32> to vector<1x1x8x16x128xf32>
    %265 = arith.mulf %263, %264 : vector<1x1x8x16x128xf32>
    %266 = arith.addf %254, %265 : vector<1x1x8x16x128xf32>
    %c2_i32_106 = arith.constant 2 : i32
    %267 = arith.addi %arg2, %c2_i32_106 : i32
    %c1_i32_107 = arith.constant 1 : i32
    %268 = arith.addi %0, %c1_i32_107 : i32
    %c0_108 = arith.constant 0 : index
    %269 = arith.index_cast %267 : i32 to index
    %270 = arith.index_cast %268 : i32 to index
    %c1_109 = arith.constant 1 : index
    %c0_110 = arith.constant 0 : index
    %271 = vector.load %arg4[%c0_108, %269, %270, %c1_109, %c0_110] : memref<1x10x18x18x1xf32, #tpu.memory_space<vmem>>, vector<1x1x8x16x1xf32>
    %272 = vector.extract_strided_slice %1 {offsets = [22, 0], sizes = [1, 128], strides = [1, 1]} : vector<27x128xf32> to vector<1x128xf32>
    %273 = vector.shape_cast %272 : vector<1x128xf32> to vector<128xf32>
    %274 = vector.shape_cast %273 : vector<128xf32> to vector<1x1x1x1x128xf32>
    %275 = vector.broadcast %271 : vector<1x1x8x16x1xf32> to vector<1x1x8x16x128xf32>
    %276 = vector.broadcast %274 : vector<1x1x1x1x128xf32> to vector<1x1x8x16x128xf32>
    %277 = arith.mulf %275, %276 : vector<1x1x8x16x128xf32>
    %278 = arith.addf %266, %277 : vector<1x1x8x16x128xf32>
    %c2_i32_111 = arith.constant 2 : i32
    %279 = arith.addi %arg2, %c2_i32_111 : i32
    %c1_i32_112 = arith.constant 1 : i32
    %280 = arith.addi %0, %c1_i32_112 : i32
    %c0_113 = arith.constant 0 : index
    %281 = arith.index_cast %279 : i32 to index
    %282 = arith.index_cast %280 : i32 to index
    %c2_114 = arith.constant 2 : index
    %c0_115 = arith.constant 0 : index
    %283 = vector.load %arg4[%c0_113, %281, %282, %c2_114, %c0_115] : memref<1x10x18x18x1xf32, #tpu.memory_space<vmem>>, vector<1x1x8x16x1xf32>
    %284 = vector.extract_strided_slice %1 {offsets = [23, 0], sizes = [1, 128], strides = [1, 1]} : vector<27x128xf32> to vector<1x128xf32>
    %285 = vector.shape_cast %284 : vector<1x128xf32> to vector<128xf32>
    %286 = vector.shape_cast %285 : vector<128xf32> to vector<1x1x1x1x128xf32>
    %287 = vector.broadcast %283 : vector<1x1x8x16x1xf32> to vector<1x1x8x16x128xf32>
    %288 = vector.broadcast %286 : vector<1x1x1x1x128xf32> to vector<1x1x8x16x128xf32>
    %289 = arith.mulf %287, %288 : vector<1x1x8x16x128xf32>
    %290 = arith.addf %278, %289 : vector<1x1x8x16x128xf32>
    %c2_i32_116 = arith.constant 2 : i32
    %291 = arith.addi %arg2, %c2_i32_116 : i32
    %c2_i32_117 = arith.constant 2 : i32
    %292 = arith.addi %0, %c2_i32_117 : i32
    %c0_118 = arith.constant 0 : index
    %293 = arith.index_cast %291 : i32 to index
    %294 = arith.index_cast %292 : i32 to index
    %c0_119 = arith.constant 0 : index
    %c0_120 = arith.constant 0 : index
    %295 = vector.load %arg4[%c0_118, %293, %294, %c0_119, %c0_120] : memref<1x10x18x18x1xf32, #tpu.memory_space<vmem>>, vector<1x1x8x16x1xf32>
    %296 = vector.extract_strided_slice %1 {offsets = [24, 0], sizes = [1, 128], strides = [1, 1]} : vector<27x128xf32> to vector<1x128xf32>
    %297 = vector.shape_cast %296 : vector<1x128xf32> to vector<128xf32>
    %298 = vector.shape_cast %297 : vector<128xf32> to vector<1x1x1x1x128xf32>
    %299 = vector.broadcast %295 : vector<1x1x8x16x1xf32> to vector<1x1x8x16x128xf32>
    %300 = vector.broadcast %298 : vector<1x1x1x1x128xf32> to vector<1x1x8x16x128xf32>
    %301 = arith.mulf %299, %300 : vector<1x1x8x16x128xf32>
    %302 = arith.addf %290, %301 : vector<1x1x8x16x128xf32>
    %c2_i32_121 = arith.constant 2 : i32
    %303 = arith.addi %arg2, %c2_i32_121 : i32
    %c2_i32_122 = arith.constant 2 : i32
    %304 = arith.addi %0, %c2_i32_122 : i32
    %c0_123 = arith.constant 0 : index
    %305 = arith.index_cast %303 : i32 to index
    %306 = arith.index_cast %304 : i32 to index
    %c1_124 = arith.constant 1 : index
    %c0_125 = arith.constant 0 : index
    %307 = vector.load %arg4[%c0_123, %305, %306, %c1_124, %c0_125] : memref<1x10x18x18x1xf32, #tpu.memory_space<vmem>>, vector<1x1x8x16x1xf32>
    %308 = vector.extract_strided_slice %1 {offsets = [25, 0], sizes = [1, 128], strides = [1, 1]} : vector<27x128xf32> to vector<1x128xf32>
    %309 = vector.shape_cast %308 : vector<1x128xf32> to vector<128xf32>
    %310 = vector.shape_cast %309 : vector<128xf32> to vector<1x1x1x1x128xf32>
    %311 = vector.broadcast %307 : vector<1x1x8x16x1xf32> to vector<1x1x8x16x128xf32>
    %312 = vector.broadcast %310 : vector<1x1x1x1x128xf32> to vector<1x1x8x16x128xf32>
    %313 = arith.mulf %311, %312 : vector<1x1x8x16x128xf32>
    %314 = arith.addf %302, %313 : vector<1x1x8x16x128xf32>
    %c2_i32_126 = arith.constant 2 : i32
    %315 = arith.addi %arg2, %c2_i32_126 : i32
    %c2_i32_127 = arith.constant 2 : i32
    %316 = arith.addi %0, %c2_i32_127 : i32
    %c0_128 = arith.constant 0 : index
    %317 = arith.index_cast %315 : i32 to index
    %318 = arith.index_cast %316 : i32 to index
    %c2_129 = arith.constant 2 : index
    %c0_130 = arith.constant 0 : index
    %319 = vector.load %arg4[%c0_128, %317, %318, %c2_129, %c0_130] : memref<1x10x18x18x1xf32, #tpu.memory_space<vmem>>, vector<1x1x8x16x1xf32>
    %320 = vector.extract_strided_slice %1 {offsets = [26, 0], sizes = [1, 128], strides = [1, 1]} : vector<27x128xf32> to vector<1x128xf32>
    %321 = vector.shape_cast %320 : vector<1x128xf32> to vector<128xf32>
    %322 = vector.shape_cast %321 : vector<128xf32> to vector<1x1x1x1x128xf32>
    %323 = vector.broadcast %319 : vector<1x1x8x16x1xf32> to vector<1x1x8x16x128xf32>
    %324 = vector.broadcast %322 : vector<1x1x1x1x128xf32> to vector<1x1x8x16x128xf32>
    %325 = arith.mulf %323, %324 : vector<1x1x8x16x128xf32>
    %326 = arith.addf %314, %325 : vector<1x1x8x16x128xf32>
    %c0_131 = arith.constant 0 : index
    %c0_132 = arith.constant 0 : index
    %327 = vector.load %arg6[%c0_131, %c0_132] : memref<1x128xf32, #tpu.memory_space<vmem>>, vector<1x128xf32>
    %328 = vector.shape_cast %327 : vector<1x128xf32> to vector<1x1x1x1x128xf32>
    %329 = vector.broadcast %328 : vector<1x1x1x1x128xf32> to vector<1x1x8x16x128xf32>
    %330 = arith.mulf %326, %329 : vector<1x1x8x16x128xf32>
    %c0_133 = arith.constant 0 : index
    %c0_134 = arith.constant 0 : index
    %331 = vector.load %arg7[%c0_133, %c0_134] : memref<1x128xf32, #tpu.memory_space<vmem>>, vector<1x128xf32>
    %332 = vector.shape_cast %331 : vector<1x128xf32> to vector<1x1x1x1x128xf32>
    %333 = vector.broadcast %332 : vector<1x1x1x1x128xf32> to vector<1x1x8x16x128xf32>
    %334 = arith.addf %330, %333 : vector<1x1x8x16x128xf32>
    %cst_135 = arith.constant 0.000000e+00 : f32
    %335 = vector.broadcast %cst_135 : f32 to vector<1x1x8x16x128xf32>
    %336 = arith.maximumf %334, %335 : vector<1x1x8x16x128xf32>
    %337 = arith.truncf %336 : vector<1x1x8x16x128xf32> to vector<1x1x8x16x128xbf16>
    %c0_136 = arith.constant 0 : index
    %c0_137 = arith.constant 0 : index
    %c0_138 = arith.constant 0 : index
    %c0_139 = arith.constant 0 : index
    %c0_140 = arith.constant 0 : index
    %338 = vector.load %arg8[%c0_136, %c0_137, %c0_138, %c0_139, %c0_140] : memref<1x1x8x16x128xbf16, #tpu.memory_space<vmem>>, vector<1x1x8x16x128xbf16>
    tpu.vector_store %arg8[%c0_136, %c0_137, %c0_138, %c0_139, %c0_140], %337 {strides = array<i32>} : memref<1x1x8x16x128xbf16, #tpu.memory_space<vmem>>, vector<1x1x8x16x128xbf16>,
    return
  }
  func.func @transform_0(%arg0: i32, %arg1: i32, %arg2: i32, %arg3: i32) -> (i32, i32, i32, i32, i32) {
    %c0_i32 = arith.constant 0 : i32
    %c0_i32_0 = arith.constant 0 : i32
    %c0_i32_1 = arith.constant 0 : i32
    %c0_i32_2 = arith.constant 0 : i32
    %c0_i32_3 = arith.constant 0 : i32
    return %arg0, %c0_i32, %c0_i32_0, %c0_i32_1, %c0_i32_2 : i32, i32, i32, i32, i32
  }
  func.func @transform_1(%arg0: i32, %arg1: i32, %arg2: i32, %arg3: i32) -> (i32, i32) {
    %c0_i32 = arith.constant 0 : i32
    %c0_i32_0 = arith.constant 0 : i32
    return %c0_i32, %arg1 : i32, i32
  }
  func.func @transform_2(%arg0: i32, %arg1: i32, %arg2: i32, %arg3: i32) -> (i32, i32) {
    %c0_i32 = arith.constant 0 : i32
    %c0_i32_0 = arith.constant 0 : i32
    return %c0_i32, %arg1 : i32, i32
  }
  func.func @transform_3(%arg0: i32, %arg1: i32, %arg2: i32, %arg3: i32) -> (i32, i32) {
    %c0_i32 = arith.constant 0 : i32
    %c0_i32_0 = arith.constant 0 : i32
    return %c0_i32, %arg1 : i32, i32
  }
  func.func @transform_4(%arg0: i32, %arg1: i32, %arg2: i32, %arg3: i32) -> (i32, i32, i32, i32, i32) {
    %c0_i32 = arith.constant 0 : i32
    %c0_i32_0 = arith.constant 0 : i32
    return %arg0, %arg2, %arg3, %c0_i32, %arg1 : i32, i32, i32, i32, i32
  }
}

</mosaic_0001>

<bundles_post_ra>
// kernel: tpu_custom_call.1
= control target key start
LH: loop header
LB: loop body
LE: loop exit
PB: predicated region body
PF: predicated region fallthrough
CT: control target
= control target key end

     0   :  { %9 = vsyncpa [#allocation3], 0  ;;  %s7800_s0 = inlined_call_operand.vmem [shape: f32[2,10,18,18,1], index: 0, kind: input, shape index: {}]   ;;  %s7801_s1 = inlined_call_operand.vmem [shape: f32[27,128], index: 1, kind: input, shape index: {}]   ;;  %s7802_s2 = inlined_call_operand.vmem [shape: f32[1,128], index: 2, kind: input, shape index: {}]   ;;  %s7803_s3 = inlined_call_operand.vmem [shape: f32[1,128], index: 3, kind: input, shape index: {}]   ;;  %s7804_s4 = inlined_call_operand.hbm [shape: bf16[2,8,16,16,128], index: 4, kind: output, shape index: {}]  }
   0x1   :  { %11 = vsyncpa [#allocation3 + $0x1], 0  ;;  %s4976_s15 = smov 0   ;;  %s4978_s16 = smov 0  }
   0x2   :  { %s4980_s17 = smov 0   ;;  %s4982_s18 = smov 0  }
   0x3   :  { %s4984_s19 = smov 0   ;;  %s4986_s20 = smov 0  }
   0x4   :  { %s4988_s21 = smov 0   ;;  %s4990_s22 = smov 0  }
   0x5   :  { %s4992_s23 = smov 0   ;;  %s4994_s24 = smov 0  }
   0x6 LB: > { %s4210_s25 = sadd.s32 4294967295, %s4945_s24   ;;  %s32_s26 = sadd.s32 1, %s4933_s21  ;;  %s4945_s24 = sphi %s4994_s24, %s17_s24   ;;  %s4941_s23 = sphi %s4992_s23, %s8550_s23   ;;  %s4937_s22 = sphi %s4990_s22, %s8549_s22   ;;  %s4933_s21 = sphi %s4988_s21, %s8548_s21   ;;  %s4929_s20 = sphi %s4986_s20, %s8547_s20   ;;  %s4925_s19 = sphi %s4984_s19, %s8546_s19   ;;  %s4921_s18 = sphi %s4982_s18, %s8545_s18   ;;  %s4917_s17 = sphi %s4980_s17, %s8544_s17   ;;  %s4913_s16 = sphi %s4978_s16, %s8543_s16   ;;  %s4909_s15 = sphi %s4976_s15, %s8542_s15  }
   0x7   : > { %p33_p0 = scmp.ge.s32.totalorder %s32_s26, 2  ;;  %s35_s27 = sadd.s32 1, %s4937_s22 }
   0x8   : > { %s4211_s28 = sadd.s32 4294967294, %s4945_s24   ;;  %p170_p1 = scmp.ne.s32.totalorder %s4917_s17, %s4913_s16 }
   0x9   : > { %s8552_s26 = smov (%p33_p0, %s32_s26), 0  ;;  %s8554_s27 = smov (!%p33_p0, %s35_s27), %s4937_s22 }
   0xa   : > { %s43_s29 = sadd.s32 1, %s4941_s23  ;;  %p171_p2 = scmp.eq.s32.totalorder %s4210_s25, 31 }
   0xb   : > { %p37_p3 = scmp.ge.s32.totalorder %s8554_s27, 8  ;;  %p176_p4 = scmp.ne.s32.totalorder %s4913_s16, %s4909_s15 }
   0xc   : > { %p5038_p5 = por %p171_p2, %p170_p1  ;;  %p177_p6 = scmp.eq.s32.totalorder %s4211_s28, 31 }
   0xd   : > { %s8556_s27 = smov (%p37_p3, %s8554_s27), 0  ;;  %s8558_s29 = smov (!%p37_p3, %s43_s29), %s4941_s23 }
   0xe   : > { %p5045_p7 = por %p177_p6, %p176_p4  ;;  %p45_p8 = scmp.ge.s32.totalorder %s8558_s29, 2 }
   0xf   : > { %p4217_p9 = scmp.ge.s32.totalorder %s4945_s24, 1  ;;  %s152_s6 = ssub.s32 %s4937_s22, %s8556_s27 }
  0x10   : > { %p222_p10 = scmp.lt.s32.totalorder %s4945_s24, 33  ;;  %s8560_s29 = smov (%p45_p8, %s8558_s29), 0 }
  0x11   : > { %7849 = sst [smem:[#allocation5_spill]] %s8560_s29  ;;  %s154_s7 = ssub.s32 %s4933_s21, %s8552_s26 }
  0x12   : > { %p223_p11 = pnand %p4217_p9, %p222_p10  ;;  %s151_s8 = ssub.s32 %s4941_s23, %s8560_s29 }
  0x13   : > { %s153_s9 = sor.u32 %s152_s6, %s151_s8  ;;  %s160_s11 = sadd.s32 1, %s4917_s17 }
  0x14   : > { %s155_s10 = sor.u32 %s154_s7, %s153_s9  ;;  %226 = sbr.rel (%p223_p11) target bundleno = 1045 (0x415), region = 36 }
  0x15   : > { %p158_p12 = scmp.eq.s32.totalorder %s155_s10, 0 }
  0x17   : > { %s5061_s12 = scalar_select %p158_p12, %s4917_s17, %s160_s11  }
  0x19   : > { %p258_p13 = scmp.lt.s32.totalorder %s4929_s20, 1  ;;  %s4221_s13 = smul.u32 192, %s4921_s18  ;;  %v4947_v0 = vmov 0  }
  0x1a   : > { %4800 = vset.pattern.permute.xlu1 %v4947_v0  ;;  %4799 = vset.pattern.permute.xlu0 %v4947_v0  ;;  %s280_s14 = smul.u32 432, %s4925_s19  ;;  %s255_s10 = sand.u32 1, %s4913_s16  }
  0x1b   : > { %s259_s25 = scalar_select %p258_p13, %s4929_s20, 1 }
  0x1c   : > { %s281_s29 = sadd.s32 %s4221_s13, %s280_s14  ;;  %s4218_s11 = sshll.u32 %s255_s10, 6 }
  0x1d   : > { %s4708_s28 = smul.u32 4320, %s259_s25  ;;  %s7664_s13 = scalar_lea.vmem [#allocation2], %s4218_s11 }
  0x1e   : > { %s4660_s14 = sshll.u32 %s4921_s18, 4  ;;  %s4639_s25 = sshll.u32 %s4925_s19, 5 }
  0x1f   : > { %s262_s8 = scalar_lea.vmem %s7800_s0, %s4708_s28  ;;  %s4028_s18 = sadd.s32 %s4660_s14, %s4639_s25 }
  0x20   : > { %s5070_s9 = scalar_lea.vmem %s262_s8, %s281_s29  ;;  %s4640_s19 = sshll.u32 %s4929_s20, 8 }
  0x21   : > { %v5073_v1 = vld [vmem:[%s5070_s9 + $0x18] sm:$0xff]  ;;  %v283_v2 = vld [vmem:[%s5070_s9] sm:$0xff]  ;;  %v284_v4 = vld [vmem:[%s5070_s9 + $0x8] sm:$0xff]  ;;  %s4030_s28 = sadd.s32 %s4640_s19, %s4028_s18  ;;  %s4033_s6 = sshll.u32 %s7664_s13, 4  ;;  %s7738_s6 = int_to_ptr.vmem [resolvable:$true] %s4033_s6 }
  0x22   : > { %311 = vperm.xlu1 %4800, %v5073_v1   ;;  %301 = vperm.xlu0 %4799, %v283_v2   ;;  %v5078_v3 = vld [vmem:[%s5070_s9 + $0x20] sm:$0xff]  ;;  %v5083_v5 = vld [vmem:[%s5070_s9 + $0x38] sm:$0xff]  ;;  %v5086_v6 = vld [vmem:[%s5070_s9 + $0x30] sm:$0xff]  ;;  %s4641_s20 = sshll.u32 %s4030_s28, 6  ;;  %s7743_s29 = scalar_lea.sflag [#allocation3], %s255_s10 }
  0x23   : > { %v5091_v7 = vld [vmem:[%s5070_s9 + $0x50] sm:$0xff]  ;;  %v5094_v8 = vld [vmem:[%s5070_s9 + $0x48] sm:$0xff]  ;;  %v5102_v10 = vld [vmem:[%s5070_s9 + $0x60] sm:$0xff]  ;;  %s4837_s11 = scalar_lea.vmem %s7738_s6, 1024  ;;  %s4948_s14 = smov [#allocation2]  }
  0x24   : > { %v5099_v9 = vld [vmem:[%s5070_s9 + $0x68] sm:$0xff]  ;;  %v5107_v11 = vld [vmem:[%s5070_s9 + $0x80] sm:$0xff]  ;;  %v5110_v12 = vld [vmem:[%s5070_s9 + $0x78] sm:$0xff]  ;;  %p4838_p0 = scmp.ne.s32.totalorder %s7738_s6, %s4837_s11  ;;  %s4841_s25 = sshll.u32 %s4948_s14, 4  ;;  %s4842_s25 = int_to_ptr.vmem [resolvable:$false] %s4841_s25 }
  0x25   : > { %v5115_v13 = vld [vmem:[%s5070_s9 + $0x98] sm:$0xff]  ;;  %v5118_v14 = vld [vmem:[%s5070_s9 + $0x90] sm:$0xff]  ;;  %v5126_v16 = vld [vmem:[%s5070_s9 + $0xa8] sm:$0xff]  ;;  %s4843_s18 = scalar_lea.vmem %s4842_s25, 2048  ;;  %p4844_p3 = scmp.lt.s32.totalorder %s7738_s6, %s4842_s25 }
  0x26   : > { %316 = vperm.xlu1 %4800, %v5078_v3   ;;  %306 = vperm.xlu0 %4799, %v284_v4   ;;  %v5123_v15 = vld [vmem:[%s5070_s9 + $0xb0] sm:$0xff]  ;;  %v415_v18 = vld [vmem:[%s5070_s9 + $0x1] sm:$0xff]  ;;  %v5136_v20 = vld [vmem:[%s5070_s9 + $0x19] sm:$0xff]  ;;  %p4839_p1 = pnand %p4838_p0, %p5038_p5  ;;  %p4845_p4 = scmp.lt.s32.totalorder %s4843_s18, %s4837_s11 }
  0x27   : > { %v416_v17 = vld [vmem:[%s5070_s9 + $0x9] sm:$0xff]  ;;  %v5133_v19 = vld [vmem:[%s5070_s9 + $0x21] sm:$0xff]  ;;  %v5141_v21 = vld [vmem:[%s5070_s9 + $0x39] sm:$0xff] }
  0x28   : > { %v5144_v22 = vld [vmem:[%s5070_s9 + $0x31] sm:$0xff]  ;;  %v5152_v24 = vld [vmem:[%s5070_s9 + $0x49] sm:$0xff]  ;;  %v5160_v26 = vld [vmem:[%s5070_s9 + $0x61] sm:$0xff]  ;;  %p4840_p2 = pneg %p4839_p1  ;;  %p4846_p6 = por %p4845_p4, %p4844_p3 }
  0x29   : > { %v5149_v23 = vld [vmem:[%s5070_s9 + $0x51] sm:$0xff]  ;;  %v5157_v25 = vld [vmem:[%s5070_s9 + $0x69] sm:$0xff]  ;;  %v5165_v27 = vld [vmem:[%s5070_s9 + $0x81] sm:$0xff] }
  0x2a   : > { %326 = vperm.xlu1 %4800, %v5083_v5   ;;  %321 = vperm.xlu0 %4799, %v5086_v6   ;;  %v5168_v28 = vld [vmem:[%s5070_s9 + $0x79] sm:$0xff]  ;;  %v5176_v30 = vld [vmem:[%s5070_s9 + $0x91] sm:$0xff]  ;;  %v5184_v32 = vld [vmem:[%s5070_s9 + $0xa9] sm:$0xff]  ;;  %p4847_p8 = pnand %p4846_p6, %p4840_p2 }
  0x2b   : > { %v5173_v29 = vld [vmem:[%s5070_s9 + $0x99] sm:$0xff]  ;;  %v5181_v31 = vld [vmem:[%s5070_s9 + $0xb1] sm:$0xff]  ;;  %v547_v34 = vld [vmem:[%s5070_s9 + $0x2] sm:$0xff] }
  0x2c   : > { %v548_v33 = vld [vmem:[%s5070_s9 + $0xa] sm:$0xff]  ;;  %v5191_v35 = vld [vmem:[%s5070_s9 + $0x22] sm:$0xff]  ;;  %v5194_v36 = vld [vmem:[%s5070_s9 + $0x1a] sm:$0xff] }
  0x2d   : > { %v5199_v37 = vld [vmem:[%s5070_s9 + $0x3a] sm:$0xff]  ;;  %v5202_v38 = vld [vmem:[%s5070_s9 + $0x32] sm:$0xff]  ;;  %v5210_v40 = vld [vmem:[%s5070_s9 + $0x4a] sm:$0xff] }
  0x2e   : > { %336 = vperm.xlu1 %4800, %v5091_v7   ;;  %331 = vperm.xlu0 %4799, %v5094_v8   ;;  %v5207_v39 = vld [vmem:[%s5070_s9 + $0x52] sm:$0xff]  ;;  %v5215_v41 = vld [vmem:[%s5070_s9 + $0x6a] sm:$0xff]  ;;  %v5218_v42 = vld [vmem:[%s5070_s9 + $0x62] sm:$0xff] }
  0x2f   : > { %v5223_v43 = vld [vmem:[%s5070_s9 + $0x82] sm:$0xff]  ;;  %v5226_v44 = vld [vmem:[%s5070_s9 + $0x7a] sm:$0xff]  ;;  %v5234_v46 = vld [vmem:[%s5070_s9 + $0x92] sm:$0xff] }
  0x30   : > { %v5231_v45 = vld [vmem:[%s5070_s9 + $0x9a] sm:$0xff]  ;;  %v5239_v47 = vld [vmem:[%s5070_s9 + $0xb2] sm:$0xff]  ;;  %v5242_v48 = vld [vmem:[%s5070_s9 + $0xaa] sm:$0xff] }
  0x31   : > { %v5261_v49 = vld [vmem:[%s5070_s9 + $0xc8] sm:$0xff]  ;;  %v5264_v50 = vld [vmem:[%s5070_s9 + $0xc0] sm:$0xff] }
  0x32   : > { %346 = vperm.xlu1 %4800, %v5099_v9   ;;  %341 = vperm.xlu0 %4799, %v5102_v10   ;;  %v5318_v4 = vld [vmem:[%s5070_s9 + $0xc1] sm:$0xff] }
  0x36   : > { %356 = vperm.xlu1 %4800, %v5107_v11   ;;  %351 = vperm.xlu0 %4799, %v5110_v12  }
  0x3a   : > { %366 = vperm.xlu1 %4800, %v5115_v13   ;;  %361 = vperm.xlu0 %4799, %v5118_v14  }
  0x3e   : > { %376 = vperm.xlu1 %4800, %v5123_v15   ;;  %371 = vperm.xlu0 %4799, %v5126_v16  }
  0x42   : > { %438 = vperm.xlu1 %4800, %v416_v17   ;;  %433 = vperm.xlu0 %4799, %v415_v18  }
  0x46   : > { %448 = vperm.xlu1 %4800, %v5133_v19   ;;  %443 = vperm.xlu0 %4799, %v5136_v20  }
  0x4a   : > { %458 = vperm.xlu1 %4800, %v5141_v21   ;;  %453 = vperm.xlu0 %4799, %v5144_v22  }
  0x4e   : > { %468 = vperm.xlu1 %4800, %v5149_v23   ;;  %463 = vperm.xlu0 %4799, %v5152_v24  }
  0x52   : > { %478 = vperm.xlu1 %4800, %v5157_v25   ;;  %473 = vperm.xlu0 %4799, %v5160_v26  }
  0x56   : > { %488 = vperm.xlu1 %4800, %v5165_v27   ;;  %483 = vperm.xlu0 %4799, %v5168_v28  }
  0x5a   : > { %498 = vperm.xlu1 %4800, %v5173_v29   ;;  %493 = vperm.xlu0 %4799, %v5176_v30  }
  0x5e   : > { %508 = vperm.xlu1 %4800, %v5181_v31   ;;  %503 = vperm.xlu0 %4799, %v5184_v32  }
  0x62   : > { %570 = vperm.xlu1 %4800, %v548_v33   ;;  %565 = vperm.xlu0 %4799, %v547_v34  }
  0x66   : > { %580 = vperm.xlu1 %4800, %v5191_v35   ;;  %575 = vperm.xlu0 %4799, %v5194_v36  }
  0x6a   : > { %590 = vperm.xlu1 %4800, %v5199_v37   ;;  %585 = vperm.xlu0 %4799, %v5202_v38  }
  0x6e   : > { %600 = vperm.xlu1 %4800, %v5207_v39   ;;  %595 = vperm.xlu0 %4799, %v5210_v40  }
  0x72   : > { %610 = vperm.xlu1 %4800, %v5215_v41   ;;  %605 = vperm.xlu0 %4799, %v5218_v42  }
  0x76   : > { %620 = vperm.xlu1 %4800, %v5223_v43   ;;  %615 = vperm.xlu0 %4799, %v5226_v44  }
  0x7a   : > { %630 = vperm.xlu1 %4800, %v5231_v45   ;;  %625 = vperm.xlu0 %4799, %v5234_v46  }
  0x7e   : > { %640 = vperm.xlu1 %4800, %v5239_v47   ;;  %635 = vperm.xlu0 %4799, %v5242_v48  }
  0x82   : > { %706 = vperm.xlu1 %4800, %v5078_v3   ;;  %701 = vperm.xlu0 %4799, %v5073_v1   ;;  %v5315_v3 = vld [vmem:[%s5070_s9 + $0xc9] sm:$0xff] }
  0x86   : > { %716 = vperm.xlu1 %4800, %v5083_v5   ;;  %711 = vperm.xlu0 %4799, %v5086_v6  }
  0x8a   : > { %726 = vperm.xlu1 %4800, %v5091_v7   ;;  %721 = vperm.xlu0 %4799, %v5094_v8  }
  0x8e   : > { %736 = vperm.xlu1 %4800, %v5099_v9   ;;  %731 = vperm.xlu0 %4799, %v5102_v10  }
  0x92   : > { %746 = vperm.xlu1 %4800, %v5107_v11   ;;  %741 = vperm.xlu0 %4799, %v5110_v12  }
  0x96   : > { %756 = vperm.xlu1 %4800, %v5115_v13   ;;  %751 = vperm.xlu0 %4799, %v5118_v14  }
  0x9a   : > { %766 = vperm.xlu1 %4800, %v5123_v15   ;;  %761 = vperm.xlu0 %4799, %v5126_v16  }
  0x9d   : > { %v5266_v51 = vpop.permute.xlu1 %311  ;;  %v5268_v52 = vpop.permute.xlu0 %301 }
  0x9e   : > { %776 = vperm.xlu1 %4800, %v5261_v49   ;;  %771 = vperm.xlu0 %4799, %v5264_v50  }
  0xa1   : > { %v5272_v53 = vpop.permute.xlu1 %316  ;;  %v5274_v54 = vpop.permute.xlu0 %306 }
  0xa2   : > { %838 = vperm.xlu1 %4800, %v5133_v19   ;;  %833 = vperm.xlu0 %4799, %v5136_v20  }
  0xa5   : > { %v5278_v55 = vpop.permute.xlu1 %326  ;;  %v5280_v56 = vpop.permute.xlu0 %321 }
  0xa6   : > { %848 = vperm.xlu1 %4800, %v5141_v21   ;;  %843 = vperm.xlu0 %4799, %v5144_v22  }
  0xa9   : > { %v5284_v57 = vpop.permute.xlu1 %336  ;;  %v5286_v58 = vpop.permute.xlu0 %331 }
  0xaa   : > { %858 = vperm.xlu1 %4800, %v5149_v23   ;;  %853 = vperm.xlu0 %4799, %v5152_v24  }
  0xad   : > { %v5290_v59 = vpop.permute.xlu1 %346  ;;  %v5292_v60 = vpop.permute.xlu0 %341 }
  0xae   : > { %868 = vperm.xlu1 %4800, %v5157_v25   ;;  %863 = vperm.xlu0 %4799, %v5160_v26  }
  0xb1   : > { %v5296_v61 = vpop.permute.xlu1 %356  ;;  %v5298_v62 = vpop.permute.xlu0 %351 }
  0xb2   : > { %878 = vperm.xlu1 %4800, %v5165_v27   ;;  %873 = vperm.xlu0 %4799, %v5168_v28  }
  0xb5   : > { %v5302_v63 = vpop.permute.xlu1 %366  ;;  %v5304_v0 = vpop.permute.xlu0 %361 }
  0xb6   : > { %7850 = vst [vmem:[#allocation6_spill] sm:$0xff] %v5304_v0  ;;  %888 = vperm.xlu1 %4800, %v5173_v29   ;;  %883 = vperm.xlu0 %4799, %v5176_v30  }
  0xb9   : > { %v5308_v1 = vpop.permute.xlu1 %376  ;;  %v5310_v2 = vpop.permute.xlu0 %371 }
  0xba   : > { %7851 = vst [vmem:[#allocation7_spill] sm:$0xff] %v5308_v1  ;;  %7852 = vst [vmem:[#allocation8_spill] sm:$0xff] %v5310_v2  ;;  %898 = vperm.xlu1 %4800, %v5181_v31   ;;  %893 = vperm.xlu0 %4799, %v5184_v32  }
  0xbd   : > { %v5320_v17 = vpop.permute.xlu1 %438  ;;  %v5322_v18 = vpop.permute.xlu0 %433 }
  0xbe   : > { %908 = vperm.xlu1 %4800, %v5315_v3   ;;  %903 = vperm.xlu0 %4799, %v5318_v4  }
  0xc1   : > { %v5326_v19 = vpop.permute.xlu1 %448  ;;  %v5328_v20 = vpop.permute.xlu0 %443 }
  0xc2   : > { %7853 = vst [vmem:[#allocation9_spill] sm:$0xff] %v5328_v20  ;;  %970 = vperm.xlu1 %4800, %v5191_v35   ;;  %965 = vperm.xlu0 %4799, %v5194_v36  }
  0xc5   : > { %v5332_v33 = vpop.permute.xlu1 %458  ;;  %v5334_v34 = vpop.permute.xlu0 %453 }
  0xc6   : > { %7854 = vst [vmem:[#allocation10_spill] sm:$0xff] %v5332_v33  ;;  %7855 = vst [vmem:[#allocation11_spill] sm:$0xff] %v5334_v34  ;;  %980 = vperm.xlu1 %4800, %v5199_v37   ;;  %975 = vperm.xlu0 %4799, %v5202_v38  }
  0xc9   : > { %v5338_v2 = vpop.permute.xlu1 %468  ;;  %v5340_v1 = vpop.permute.xlu0 %463 }
  0xca   : > { %7856 = vst [vmem:[#allocation12_spill] sm:$0xff] %v5338_v2  ;;  %7857 = vst [vmem:[#allocation13_spill] sm:$0xff] %v5340_v1  ;;  %990 = vperm.xlu1 %4800, %v5207_v39   ;;  %985 = vperm.xlu0 %4799, %v5210_v40  }
  0xcd   : > { %v5344_v0 = vpop.permute.xlu1 %478  ;;  %v5346_v35 = vpop.permute.xlu0 %473 }
  0xce   : > { %7858 = vst [vmem:[#allocation14_spill] sm:$0xff] %v5344_v0  ;;  %7859 = vst [vmem:[#allocation15_spill] sm:$0xff] %v5346_v35  ;;  %1000 = vperm.xlu1 %4800, %v5215_v41   ;;  %995 = vperm.xlu0 %4799, %v5218_v42  }
  0xd1   : > { %v5350_v36 = vpop.permute.xlu1 %488  ;;  %v5352_v34 = vpop.permute.xlu0 %483 }
  0xd2   : > { %7860 = vst [vmem:[#allocation16_spill] sm:$0xff] %v5350_v36  ;;  %7861 = vst [vmem:[#allocation17_spill] sm:$0xff] %v5352_v34  ;;  %1010 = vperm.xlu1 %4800, %v5223_v43   ;;  %1005 = vperm.xlu0 %4799, %v5226_v44   ;;  %v5369_v34 = vld [vmem:[%s5070_s9 + $0xca] sm:$0xff]  ;;  %v5372_v36 = vld [vmem:[%s5070_s9 + $0xc2] sm:$0xff] }
  0xd5   : > { %v5356_v1 = vpop.permute.xlu1 %498  ;;  %v5358_v2 = vpop.permute.xlu0 %493 }
  0xd6   : > { %7862 = vst [vmem:[#allocation18_spill] sm:$0xff] %v5356_v1  ;;  %7863 = vst [vmem:[#allocation19_spill] sm:$0xff] %v5358_v2  ;;  %1020 = vperm.xlu1 %4800, %v5231_v45   ;;  %1015 = vperm.xlu0 %4799, %v5234_v46  }
  0xd9   : > { %v5362_v35 = vpop.permute.xlu1 %508  ;;  %v5364_v0 = vpop.permute.xlu0 %503 }
  0xda   : > { %7864 = vst [vmem:[#allocation20_spill] sm:$0xff] %v5362_v35  ;;  %7865 = vst [vmem:[#allocation21_spill] sm:$0xff] %v5364_v0  ;;  %1030 = vperm.xlu1 %4800, %v5239_v47   ;;  %1025 = vperm.xlu0 %4799, %v5242_v48  }
  0xdd   : > { %v5374_v33 = vpop.permute.xlu1 %570  ;;  %v5376_v1 = vpop.permute.xlu0 %565 }
  0xde   : > { %7866 = vst [vmem:[#allocation22_spill] sm:$0xff] %v5374_v33  ;;  %7867 = vst [vmem:[#allocation23_spill] sm:$0xff] %v5376_v1  ;;  %1040 = vperm.xlu1 %4800, %v5369_v34   ;;  %1035 = vperm.xlu0 %4799, %v5372_v36  }
  0xe1   : > { %v5380_v2 = vpop.permute.xlu1 %580  ;;  %v5382_v35 = vpop.permute.xlu0 %575 }
  0xe2   : > { %7868 = vst [vmem:[#allocation24_spill] sm:$0xff] %v5380_v2  ;;  %7869 = vst [vmem:[#allocation25_spill] sm:$0xff] %v5382_v35  ;;  %1106 = vperm.xlu1 %4800, %v5083_v5   ;;  %1101 = vperm.xlu0 %4799, %v5086_v6  }
  0xe5   : > { %v5386_v0 = vpop.permute.xlu1 %590  ;;  %v5388_v20 = vpop.permute.xlu0 %585 }
  0xe6   : > { %7870 = vst [vmem:[#allocation26_spill] sm:$0xff] %v5386_v0  ;;  %7871 = vst [vmem:[#allocation27_spill] sm:$0xff] %v5388_v20  ;;  %1116 = vperm.xlu1 %4800, %v5091_v7   ;;  %1111 = vperm.xlu0 %4799, %v5094_v8  }
  0xe9   : > { %v5392_v1 = vpop.permute.xlu1 %600  ;;  %v5394_v33 = vpop.permute.xlu0 %595 }
  0xea   : > { %7872 = vst [vmem:[#allocation28_spill] sm:$0xff] %v5392_v1  ;;  %7873 = vst [vmem:[#allocation29_spill] sm:$0xff] %v5394_v33  ;;  %1126 = vperm.xlu1 %4800, %v5099_v9   ;;  %1121 = vperm.xlu0 %4799, %v5102_v10   ;;  %v5783_v1 = vld [vmem:[%s5070_s9 + $0x262] sm:$0xff] }
  0xed   : > { %v5398_v35 = vpop.permute.xlu1 %610  ;;  %v5400_v5 = vpop.permute.xlu0 %605 }
  0xee   : > { %7874 = vst [vmem:[#allocation30_spill] sm:$0xff] %v5398_v35  ;;  %7875 = vst [vmem:[#allocation31_spill] sm:$0xff] %v5400_v5  ;;  %1136 = vperm.xlu1 %4800, %v5107_v11   ;;  %1131 = vperm.xlu0 %4799, %v5110_v12   ;;  %v4289_v12 = vld [vmem:[%s5070_s9 + $0xe0] sm:$0xff] }
  0xf1   : > { %v5404_v6 = vpop.permute.xlu1 %620  ;;  %v5406_v7 = vpop.permute.xlu0 %615 }
  0xf2   : > { %7876 = vst [vmem:[#allocation32_spill] sm:$0xff] %v5404_v6  ;;  %7877 = vst [vmem:[#allocation33_spill] sm:$0xff] %v5406_v7  ;;  %1146 = vperm.xlu1 %4800, %v5115_v13   ;;  %1141 = vperm.xlu0 %4799, %v5118_v14   ;;  %v4288_v13 = vld [vmem:[%s5070_s9 + $0xd8] sm:$0xff] }
  0xf5   : > { %v5410_v8 = vpop.permute.xlu1 %630  ;;  %v5412_v9 = vpop.permute.xlu0 %625 }
  0xf6   : > { %7878 = vst [vmem:[#allocation34_spill] sm:$0xff] %v5410_v8  ;;  %7879 = vst [vmem:[#allocation35_spill] sm:$0xff] %v5412_v9  ;;  %1156 = vperm.xlu1 %4800, %v5123_v15   ;;  %1151 = vperm.xlu0 %4799, %v5126_v16  }
  0xf9   : > { %v5416_v10 = vpop.permute.xlu1 %640  ;;  %v5418_v11 = vpop.permute.xlu0 %635 }
  0xfa   : > { %7880 = vst [vmem:[#allocation36_spill] sm:$0xff] %v5416_v10  ;;  %7881 = vst [vmem:[#allocation37_spill] sm:$0xff] %v5418_v11  ;;  %1166 = vperm.xlu1 %4800, %v5261_v49   ;;  %1161 = vperm.xlu0 %4799, %v5264_v50  }
  0xfd   : > { %v5424_v7 = vpop.permute.xlu1 %706  ;;  %v5426_v14 = vpop.permute.xlu0 %701 }
  0xfe   : > { %7882 = vst [vmem:[#allocation38_spill] sm:$0xff] %v5424_v7  ;;  %7883 = vst [vmem:[#allocation39_spill] sm:$0xff] %v5426_v14  ;;  %1176 = vperm.xlu1 %4800, %v4289_v12   ;;  %1171 = vperm.xlu0 %4799, %v4288_v13  }
 0x101   : > { %v5428_v9 = vpop.permute.xlu1 %716  ;;  %v5430_v15 = vpop.permute.xlu0 %711 }
 0x102   : > { %7884 = vst [vmem:[#allocation40_spill] sm:$0xff] %v5428_v9  ;;  %7885 = vst [vmem:[#allocation41_spill] sm:$0xff] %v5430_v15  ;;  %1238 = vperm.xlu1 %4800, %v5141_v21   ;;  %1233 = vperm.xlu0 %4799, %v5144_v22   ;;  %v5711_v9 = vld [vmem:[%s5070_s9 + $0x1d2] sm:$0xff] }
 0x105   : > { %v5434_v16 = vpop.permute.xlu1 %726  ;;  %v5436_v49 = vpop.permute.xlu0 %721 }
 0x106   : > { %7886 = vst [vmem:[#allocation42_spill] sm:$0xff] %v5434_v16  ;;  %7887 = vst [vmem:[#allocation43_spill] sm:$0xff] %v5436_v49  ;;  %1248 = vperm.xlu1 %4800, %v5149_v23   ;;  %1243 = vperm.xlu0 %4799, %v5152_v24  }
 0x109   : > { %v5440_v50 = vpop.permute.xlu1 %736  ;;  %v5442_v12 = vpop.permute.xlu0 %731 }
 0x10a   : > { %7888 = vst [vmem:[#allocation44_spill] sm:$0xff] %v5440_v50  ;;  %7889 = vst [vmem:[#allocation45_spill] sm:$0xff] %v5442_v12  ;;  %1258 = vperm.xlu1 %4800, %v5157_v25   ;;  %1253 = vperm.xlu0 %4799, %v5160_v26  }
 0x10d   : > { %v5446_v13 = vpop.permute.xlu1 %746  ;;  %v5448_v21 = vpop.permute.xlu0 %741 }
 0x10e   : > { %7890 = vst [vmem:[#allocation46_spill] sm:$0xff] %v5446_v13  ;;  %7891 = vst [vmem:[#allocation47_spill] sm:$0xff] %v5448_v21  ;;  %1268 = vperm.xlu1 %4800, %v5165_v27   ;;  %1263 = vperm.xlu0 %4799, %v5168_v28   ;;  %v4305_v28 = vld [vmem:[%s5070_s9 + $0xe1] sm:$0xff] }
 0x111   : > { %v5452_v22 = vpop.permute.xlu1 %756  ;;  %v5454_v23 = vpop.permute.xlu0 %751 }
 0x112   : > { %7892 = vst [vmem:[#allocation48_spill] sm:$0xff] %v5452_v22  ;;  %7893 = vst [vmem:[#allocation49_spill] sm:$0xff] %v5454_v23  ;;  %1278 = vperm.xlu1 %4800, %v5173_v29   ;;  %1273 = vperm.xlu0 %4799, %v5176_v30   ;;  %v4304_v29 = vld [vmem:[%s5070_s9 + $0xd9] sm:$0xff] }
 0x115   : > { %v5458_v24 = vpop.permute.xlu1 %766  ;;  %v5460_v25 = vpop.permute.xlu0 %761 }
 0x116   : > { %7894 = vst [vmem:[#allocation50_spill] sm:$0xff] %v5458_v24  ;;  %7895 = vst [vmem:[#allocation51_spill] sm:$0xff] %v5460_v25  ;;  %1288 = vperm.xlu1 %4800, %v5181_v31   ;;  %1283 = vperm.xlu0 %4799, %v5184_v32  }
 0x119   : > { %v5464_v26 = vpop.permute.xlu1 %776  ;;  %v5466_v27 = vpop.permute.xlu0 %771 }
 0x11a   : > { %7896 = vst [vmem:[#allocation52_spill] sm:$0xff] %v5464_v26  ;;  %7897 = vst [vmem:[#allocation53_spill] sm:$0xff] %v5466_v27  ;;  %1298 = vperm.xlu1 %4800, %v5315_v3   ;;  %1293 = vperm.xlu0 %4799, %v5318_v4  }
 0x11d   : > { %v5472_v23 = vpop.permute.xlu1 %838  ;;  %v5474_v30 = vpop.permute.xlu0 %833 }
 0x11e   : > { %7898 = vst [vmem:[#allocation54_spill] sm:$0xff] %v5472_v23  ;;  %7899 = vst [vmem:[#allocation55_spill] sm:$0xff] %v5474_v30  ;;  %1308 = vperm.xlu1 %4800, %v4305_v28   ;;  %1303 = vperm.xlu0 %4799, %v4304_v29  }
 0x121   : > { %v5476_v25 = vpop.permute.xlu1 %848  ;;  %v5478_v31 = vpop.permute.xlu0 %843 }
 0x122   : > { %7900 = vst [vmem:[#allocation56_spill] sm:$0xff] %v5476_v25  ;;  %7901 = vst [vmem:[#allocation57_spill] sm:$0xff] %v5478_v31  ;;  %1370 = vperm.xlu1 %4800, %v5199_v37   ;;  %1365 = vperm.xlu0 %4799, %v5202_v38   ;;  %v5621_v25 = vld [vmem:[%s5070_s9 + $0x1d1] sm:$0xff] }
 0x125   : > { %v5482_v32 = vpop.permute.xlu1 %858  ;;  %v5484_v3 = vpop.permute.xlu0 %853 }
 0x126   : > { %7902 = vst [vmem:[#allocation58_spill] sm:$0xff] %v5482_v32  ;;  %7903 = vst [vmem:[#allocation59_spill] sm:$0xff] %v5484_v3  ;;  %1380 = vperm.xlu1 %4800, %v5207_v39   ;;  %1375 = vperm.xlu0 %4799, %v5210_v40  }
 0x129   : > { %v5488_v4 = vpop.permute.xlu1 %868  ;;  %v5490_v28 = vpop.permute.xlu0 %863 }
 0x12a   : > { %7904 = vst [vmem:[#allocation60_spill] sm:$0xff] %v5488_v4  ;;  %7905 = vst [vmem:[#allocation61_spill] sm:$0xff] %v5490_v28  ;;  %1390 = vperm.xlu1 %4800, %v5215_v41   ;;  %1385 = vperm.xlu0 %4799, %v5218_v42  }
 0x12d   : > { %v5494_v29 = vpop.permute.xlu1 %878  ;;  %v5496_v37 = vpop.permute.xlu0 %873 }
 0x12e   : > { %7906 = vst [vmem:[#allocation62_spill] sm:$0xff] %v5494_v29  ;;  %7907 = vst [vmem:[#allocation63_spill] sm:$0xff] %v5496_v37  ;;  %1400 = vperm.xlu1 %4800, %v5223_v43   ;;  %1395 = vperm.xlu0 %4799, %v5226_v44   ;;  %v4321_v44 = vld [vmem:[%s5070_s9 + $0xe2] sm:$0xff] }
 0x131   : > { %v5500_v38 = vpop.permute.xlu1 %888  ;;  %v5502_v39 = vpop.permute.xlu0 %883 }
 0x132   : > { %7908 = vst [vmem:[#allocation64_spill] sm:$0xff] %v5500_v38  ;;  %7909 = vst [vmem:[#allocation65_spill] sm:$0xff] %v5502_v39  ;;  %1410 = vperm.xlu1 %4800, %v5231_v45   ;;  %1405 = vperm.xlu0 %4799, %v5234_v46   ;;  %v4320_v45 = vld [vmem:[%s5070_s9 + $0xda] sm:$0xff] }
 0x135   : > { %v5506_v40 = vpop.permute.xlu1 %898  ;;  %v5508_v41 = vpop.permute.xlu0 %893 }
 0x136   : > { %7910 = vst [vmem:[#allocation66_spill] sm:$0xff] %v5506_v40  ;;  %7911 = vst [vmem:[#allocation67_spill] sm:$0xff] %v5508_v41  ;;  %1420 = vperm.xlu1 %4800, %v5239_v47   ;;  %1415 = vperm.xlu0 %4799, %v5242_v48   ;;  %v4323_v47 = vld [vmem:[%s5070_s9 + $0x1b8] sm:$0xff]  ;;  %v4322_v48 = vld [vmem:[%s5070_s9 + $0x1b0] sm:$0xff] }
 0x139   : > { %v5512_v42 = vpop.permute.xlu1 %908  ;;  %v5514_v43 = vpop.permute.xlu0 %903 }
 0x13a   : > { %7912 = vst [vmem:[#allocation68_spill] sm:$0xff] %v5512_v42  ;;  %7913 = vst [vmem:[#allocation69_spill] sm:$0xff] %v5514_v43  ;;  %1430 = vperm.xlu1 %4800, %v5369_v34   ;;  %1425 = vperm.xlu0 %4799, %v5372_v36   ;;  %v5531_v34 = vld [vmem:[%s5070_s9 + $0x1d0] sm:$0xff]  ;;  %v5534_v36 = vld [vmem:[%s5070_s9 + $0x1c8] sm:$0xff] }
 0x13d   : > { %v5520_v46 = vpop.permute.xlu1 %970  ;;  %v5522_v41 = vpop.permute.xlu0 %965 }
 0x13e   : > { %7914 = vst [vmem:[#allocation70_spill] sm:$0xff] %v5520_v46  ;;  %7915 = vst [vmem:[#allocation71_spill] sm:$0xff] %v5522_v41  ;;  %1440 = vperm.xlu1 %4800, %v4321_v44   ;;  %1435 = vperm.xlu0 %4799, %v4320_v45   ;;  %v5543_v44 = vld [vmem:[%s5070_s9 + $0x1e8] sm:$0xff]  ;;  %v5546_v45 = vld [vmem:[%s5070_s9 + $0x1e0] sm:$0xff] }
 0x141   : > { %v5526_v42 = vpop.permute.xlu1 %980  ;;  %v5528_v43 = vpop.permute.xlu0 %975 }
 0x142   : > { %7916 = vst [vmem:[#allocation72_spill] sm:$0xff] %v5526_v42  ;;  %7917 = vst [vmem:[#allocation73_spill] sm:$0xff] %v5528_v43  ;;  %1506 = vperm.xlu1 %4800, %v4323_v47   ;;  %1501 = vperm.xlu0 %4799, %v4322_v48  }
 0x145   : > { %v5536_v46 = vpop.permute.xlu1 %990  ;;  %v5538_v41 = vpop.permute.xlu0 %985 }
 0x146   : > { %7918 = vst [vmem:[#allocation74_spill] sm:$0xff] %v5536_v46  ;;  %7919 = vst [vmem:[#allocation75_spill] sm:$0xff] %v5538_v41  ;;  %1516 = vperm.xlu1 %4800, %v5531_v34   ;;  %1511 = vperm.xlu0 %4799, %v5534_v36   ;;  %v5555_v41 = vld [vmem:[%s5070_s9 + $0x200] sm:$0xff]  ;;  %v5558_v46 = vld [vmem:[%s5070_s9 + $0x1f8] sm:$0xff] }
 0x149   : > { %v5548_v47 = vpop.permute.xlu1 %1000  ;;  %v5550_v48 = vpop.permute.xlu0 %995 }
 0x14a   : > { %7920 = vst [vmem:[#allocation76_spill] sm:$0xff] %v5548_v47  ;;  %7921 = vst [vmem:[#allocation77_spill] sm:$0xff] %v5550_v48  ;;  %1526 = vperm.xlu1 %4800, %v5543_v44   ;;  %1521 = vperm.xlu0 %4799, %v5546_v45   ;;  %v5567_v48 = vld [vmem:[%s5070_s9 + $0x218] sm:$0xff]  ;;  %v5570_v47 = vld [vmem:[%s5070_s9 + $0x210] sm:$0xff] }
 0x14d   : > { %v5560_v43 = vpop.permute.xlu1 %1010  ;;  %v5562_v42 = vpop.permute.xlu0 %1005 }
 0x14e   : > { %7922 = vst [vmem:[#allocation78_spill] sm:$0xff] %v5560_v43  ;;  %7923 = vst [vmem:[#allocation79_spill] sm:$0xff] %v5562_v42  ;;  %1536 = vperm.xlu1 %4800, %v5555_v41   ;;  %1531 = vperm.xlu0 %4799, %v5558_v46   ;;  %v5579_v42 = vld [vmem:[%s5070_s9 + $0x230] sm:$0xff]  ;;  %v5582_v43 = vld [vmem:[%s5070_s9 + $0x228] sm:$0xff] }
 0x151   : > { %v5572_v40 = vpop.permute.xlu1 %1020  ;;  %v5574_v39 = vpop.permute.xlu0 %1015 }
 0x152   : > { %7924 = vst [vmem:[#allocation80_spill] sm:$0xff] %v5572_v40  ;;  %7925 = vst [vmem:[#allocation81_spill] sm:$0xff] %v5574_v39  ;;  %1546 = vperm.xlu1 %4800, %v5567_v48   ;;  %1541 = vperm.xlu0 %4799, %v5570_v47   ;;  %v5591_v39 = vld [vmem:[%s5070_s9 + $0x248] sm:$0xff]  ;;  %v5594_v40 = vld [vmem:[%s5070_s9 + $0x240] sm:$0xff] }
 0x155   : > { %v5584_v38 = vpop.permute.xlu1 %1030  ;;  %v5586_v37 = vpop.permute.xlu0 %1025 }
 0x156   : > { %7926 = vst [vmem:[#allocation82_spill] sm:$0xff] %v5584_v38  ;;  %7927 = vst [vmem:[#allocation83_spill] sm:$0xff] %v5586_v37  ;;  %1556 = vperm.xlu1 %4800, %v5579_v42   ;;  %1551 = vperm.xlu0 %4799, %v5582_v43   ;;  %v5603_v37 = vld [vmem:[%s5070_s9 + $0x260] sm:$0xff]  ;;  %v5606_v38 = vld [vmem:[%s5070_s9 + $0x258] sm:$0xff] }
 0x159   : > { %v5596_v29 = vpop.permute.xlu1 %1040  ;;  %v5598_v28 = vpop.permute.xlu0 %1035 }
 0x15a   : > { %7928 = vst [vmem:[#allocation84_spill] sm:$0xff] %v5596_v29  ;;  %7929 = vst [vmem:[#allocation85_spill] sm:$0xff] %v5598_v28  ;;  %1566 = vperm.xlu1 %4800, %v5591_v39   ;;  %1561 = vperm.xlu0 %4799, %v5594_v40   ;;  %v4339_v28 = vld [vmem:[%s5070_s9 + $0x1b9] sm:$0xff]  ;;  %v4338_v29 = vld [vmem:[%s5070_s9 + $0x1b1] sm:$0xff] }
 0x15d   : > { %v5608_v4 = vpop.permute.xlu1 %1106  ;;  %v5610_v3 = vpop.permute.xlu0 %1101 }
 0x15e   : > { %7930 = vst [vmem:[#allocation86_spill] sm:$0xff] %v5608_v4  ;;  %7931 = vst [vmem:[#allocation87_spill] sm:$0xff] %v5610_v3  ;;  %1576 = vperm.xlu1 %4800, %v5603_v37   ;;  %1571 = vperm.xlu0 %4799, %v5606_v38   ;;  %v5624_v4 = vld [vmem:[%s5070_s9 + $0x1c9] sm:$0xff] }
 0x161   : > { %v5616_v32 = vpop.permute.xlu1 %1116  ;;  %v5618_v31 = vpop.permute.xlu0 %1111 }
 0x162   : > { %7932 = vst [vmem:[#allocation88_spill] sm:$0xff] %v5616_v32  ;;  %7933 = vst [vmem:[#allocation89_spill] sm:$0xff] %v5618_v31  ;;  %1638 = vperm.xlu1 %4800, %v4339_v28   ;;  %1633 = vperm.xlu0 %4799, %v4338_v29   ;;  %v5633_v32 = vld [vmem:[%s5070_s9 + $0x1e9] sm:$0xff]  ;;  %v5636_v31 = vld [vmem:[%s5070_s9 + $0x1e1] sm:$0xff] }
 0x165   : > { %v5626_v3 = vpop.permute.xlu1 %1126  ;;  %v5628_v30 = vpop.permute.xlu0 %1121 }
 0x166   : > { %7934 = vst [vmem:[#allocation90_spill] sm:$0xff] %v5626_v3  ;;  %7935 = vst [vmem:[#allocation91_spill] sm:$0xff] %v5628_v30  ;;  %1648 = vperm.xlu1 %4800, %v5621_v25   ;;  %1643 = vperm.xlu0 %4799, %v5624_v4   ;;  %v5645_v30 = vld [vmem:[%s5070_s9 + $0x201] sm:$0xff]  ;;  %v5648_v3 = vld [vmem:[%s5070_s9 + $0x1f9] sm:$0xff] }
 0x169   : > { %v5638_v28 = vpop.permute.xlu1 %1136  ;;  %v5640_v29 = vpop.permute.xlu0 %1131 }
 0x16a   : > { %7936 = vst [vmem:[#allocation92_spill] sm:$0xff] %v5638_v28  ;;  %7937 = vst [vmem:[#allocation93_spill] sm:$0xff] %v5640_v29  ;;  %1658 = vperm.xlu1 %4800, %v5633_v32   ;;  %1653 = vperm.xlu0 %4799, %v5636_v31   ;;  %v5657_v29 = vld [vmem:[%s5070_s9 + $0x219] sm:$0xff]  ;;  %v5660_v28 = vld [vmem:[%s5070_s9 + $0x211] sm:$0xff] }
 0x16d   : > { %v5650_v23 = vpop.permute.xlu1 %1146  ;;  %v5652_v27 = vpop.permute.xlu0 %1141 }
 0x16e   : > { %7938 = vst [vmem:[#allocation94_spill] sm:$0xff] %v5650_v23  ;;  %7939 = vst [vmem:[#allocation95_spill] sm:$0xff] %v5652_v27  ;;  %1668 = vperm.xlu1 %4800, %v5645_v30   ;;  %1663 = vperm.xlu0 %4799, %v5648_v3   ;;  %v5669_v27 = vld [vmem:[%s5070_s9 + $0x231] sm:$0xff]  ;;  %v5672_v23 = vld [vmem:[%s5070_s9 + $0x229] sm:$0xff] }
 0x171   : > { %v5662_v26 = vpop.permute.xlu1 %1156  ;;  %v5664_v24 = vpop.permute.xlu0 %1151 }
 0x172   : > { %7940 = vst [vmem:[#allocation96_spill] sm:$0xff] %v5662_v26  ;;  %7941 = vst [vmem:[#allocation97_spill] sm:$0xff] %v5664_v24  ;;  %1678 = vperm.xlu1 %4800, %v5657_v29   ;;  %1673 = vperm.xlu0 %4799, %v5660_v28   ;;  %v5681_v24 = vld [vmem:[%s5070_s9 + $0x249] sm:$0xff]  ;;  %v5684_v26 = vld [vmem:[%s5070_s9 + $0x241] sm:$0xff] }
 0x175   : > { %v5674_v22 = vpop.permute.xlu1 %1166  ;;  %v5676_v21 = vpop.permute.xlu0 %1161 }
 0x176   : > { %7942 = vst [vmem:[#allocation98_spill] sm:$0xff] %v5674_v22  ;;  %7943 = vst [vmem:[#allocation99_spill] sm:$0xff] %v5676_v21  ;;  %1688 = vperm.xlu1 %4800, %v5669_v27   ;;  %1683 = vperm.xlu0 %4799, %v5672_v23   ;;  %v5693_v21 = vld [vmem:[%s5070_s9 + $0x261] sm:$0xff]  ;;  %v5696_v22 = vld [vmem:[%s5070_s9 + $0x259] sm:$0xff] }
 0x179   : > { %v5686_v13 = vpop.permute.xlu1 %1176  ;;  %v5688_v12 = vpop.permute.xlu0 %1171 }
 0x17a   : > { %7944 = vst [vmem:[#allocation100_spill] sm:$0xff] %v5686_v13  ;;  %7945 = vst [vmem:[#allocation101_spill] sm:$0xff] %v5688_v12  ;;  %1698 = vperm.xlu1 %4800, %v5681_v24   ;;  %1693 = vperm.xlu0 %4799, %v5684_v26   ;;  %v4355_v12 = vld [vmem:[%s5070_s9 + $0x1ba] sm:$0xff]  ;;  %v4354_v13 = vld [vmem:[%s5070_s9 + $0x1b2] sm:$0xff] }
 0x17d   : > { %v5698_v50 = vpop.permute.xlu1 %1238  ;;  %v5700_v49 = vpop.permute.xlu0 %1233 }
 0x17e   : > { %7946 = vst [vmem:[#allocation102_spill] sm:$0xff] %v5698_v50  ;;  %7947 = vst [vmem:[#allocation103_spill] sm:$0xff] %v5700_v49  ;;  %1708 = vperm.xlu1 %4800, %v5693_v21   ;;  %1703 = vperm.xlu0 %4799, %v5696_v22   ;;  %v5714_v50 = vld [vmem:[%s5070_s9 + $0x1ca] sm:$0xff] }
 0x181   : > { %v5706_v16 = vpop.permute.xlu1 %1248  ;;  %v5708_v15 = vpop.permute.xlu0 %1243 }
 0x182   : > { %7948 = vst [vmem:[#allocation104_spill] sm:$0xff] %v5706_v16  ;;  %7949 = vst [vmem:[#allocation105_spill] sm:$0xff] %v5708_v15  ;;  %1770 = vperm.xlu1 %4800, %v4355_v12   ;;  %1765 = vperm.xlu0 %4799, %v4354_v13   ;;  %v5723_v16 = vld [vmem:[%s5070_s9 + $0x1ea] sm:$0xff]  ;;  %v5726_v15 = vld [vmem:[%s5070_s9 + $0x1e2] sm:$0xff] }
 0x185   : > { %v5716_v49 = vpop.permute.xlu1 %1258  ;;  %v5718_v14 = vpop.permute.xlu0 %1253 }
 0x186   : > { %7950 = vst [vmem:[#allocation106_spill] sm:$0xff] %v5716_v49  ;;  %7951 = vst [vmem:[#allocation107_spill] sm:$0xff] %v5718_v14  ;;  %1780 = vperm.xlu1 %4800, %v5711_v9   ;;  %1775 = vperm.xlu0 %4799, %v5714_v50   ;;  %v5735_v14 = vld [vmem:[%s5070_s9 + $0x202] sm:$0xff]  ;;  %v5738_v49 = vld [vmem:[%s5070_s9 + $0x1fa] sm:$0xff] }
 0x189   : > { %v5728_v12 = vpop.permute.xlu1 %1268  ;;  %v5730_v13 = vpop.permute.xlu0 %1263 }
 0x18a   : > { %7952 = vst [vmem:[#allocation108_spill] sm:$0xff] %v5728_v12  ;;  %7953 = vst [vmem:[#allocation109_spill] sm:$0xff] %v5730_v13  ;;  %1790 = vperm.xlu1 %4800, %v5723_v16   ;;  %1785 = vperm.xlu0 %4799, %v5726_v15   ;;  %v5747_v13 = vld [vmem:[%s5070_s9 + $0x21a] sm:$0xff]  ;;  %v5750_v12 = vld [vmem:[%s5070_s9 + $0x212] sm:$0xff] }
 0x18d   : > { %v5740_v7 = vpop.permute.xlu1 %1278  ;;  %v5742_v11 = vpop.permute.xlu0 %1273 }
 0x18e   : > { %7954 = vst [vmem:[#allocation110_spill] sm:$0xff] %v5740_v7  ;;  %7955 = vst [vmem:[#allocation111_spill] sm:$0xff] %v5742_v11  ;;  %1800 = vperm.xlu1 %4800, %v5735_v14   ;;  %1795 = vperm.xlu0 %4799, %v5738_v49   ;;  %v5759_v11 = vld [vmem:[%s5070_s9 + $0x232] sm:$0xff]  ;;  %v5762_v7 = vld [vmem:[%s5070_s9 + $0x22a] sm:$0xff] }
 0x191   : > { %v5752_v10 = vpop.permute.xlu1 %1288  ;;  %v5754_v8 = vpop.permute.xlu0 %1283 }
 0x192   : > { %7956 = vst [vmem:[#allocation112_spill] sm:$0xff] %v5752_v10  ;;  %7957 = vst [vmem:[#allocation113_spill] sm:$0xff] %v5754_v8  ;;  %1810 = vperm.xlu1 %4800, %v5747_v13   ;;  %1805 = vperm.xlu0 %4799, %v5750_v12   ;;  %v5771_v10 = vld [vmem:[%s5070_s9 + $0x24a] sm:$0xff]  ;;  %v5774_v8 = vld [vmem:[%s5070_s9 + $0x242] sm:$0xff] }
 0x195   : > { %v5764_v6 = vpop.permute.xlu1 %1298  ;;  %v5766_v5 = vpop.permute.xlu0 %1293 }
 0x196   : > { %7958 = vst [vmem:[#allocation114_spill] sm:$0xff] %v5764_v6  ;;  %7959 = vst [vmem:[#allocation115_spill] sm:$0xff] %v5766_v5  ;;  %1820 = vperm.xlu1 %4800, %v5759_v11   ;;  %1815 = vperm.xlu0 %4799, %v5762_v7   ;;  %v5786_v6 = vld [vmem:[%s5070_s9 + $0x25a] sm:$0xff] }
 0x199   : > { %v5776_v35 = vpop.permute.xlu1 %1308  ;;  %v5778_v33 = vpop.permute.xlu0 %1303 }
 0x19a   : > { %7960 = vst [vmem:[#allocation116_spill] sm:$0xff] %v5776_v35  ;;  %7961 = vst [vmem:[#allocation117_spill] sm:$0xff] %v5778_v33  ;;  %1830 = vperm.xlu1 %4800, %v5771_v10   ;;  %1825 = vperm.xlu0 %4799, %v5774_v8  }
 0x19d   : > { %v5788_v5 = vpop.permute.xlu1 %1370  ;;  %v5790_v20 = vpop.permute.xlu0 %1365 }
 0x19e   : > { %7962 = vst [vmem:[#allocation118_spill] sm:$0xff] %v5788_v5  ;;  %7963 = vst [vmem:[#allocation119_spill] sm:$0xff] %v5790_v20  ;;  %1840 = vperm.xlu1 %4800, %v5783_v1   ;;  %1835 = vperm.xlu0 %4799, %v5786_v6  }
 0x1a1   : > { %v5794_v0 = vpop.permute.xlu1 %1380  ;;  %v5796_v35 = vpop.permute.xlu0 %1375 }
 0x1a2   : > { %7964 = vst [vmem:[#allocation120_spill] sm:$0xff] %v5794_v0  ;;  %7965 = vst [vmem:[#allocation121_spill] sm:$0xff] %v5796_v35  ;;  %1904 = vperm.xlu1 %4800, %v5531_v34   ;;  %1899 = vperm.xlu0 %4799, %v5534_v36  }
 0x1a5   : > { %v5800_v33 = vpop.permute.xlu1 %1390  ;;  %v5802_v2 = vpop.permute.xlu0 %1385 }
 0x1a6   : > { %7966 = vst [vmem:[#allocation122_spill] sm:$0xff] %v5800_v33  ;;  %7967 = vst [vmem:[#allocation123_spill] sm:$0xff] %v5802_v2  ;;  %1914 = vperm.xlu1 %4800, %v5543_v44   ;;  %1909 = vperm.xlu0 %4799, %v5546_v45  }
 0x1a9   : > { %v5806_v20 = vpop.permute.xlu1 %1400  ;;  %v5808_v5 = vpop.permute.xlu0 %1395 }
 0x1aa   : > { %7968 = vst [vmem:[#allocation124_spill] sm:$0xff] %v5806_v20  ;;  %7969 = vst [vmem:[#allocation125_spill] sm:$0xff] %v5808_v5  ;;  %1924 = vperm.xlu1 %4800, %v5555_v41   ;;  %1919 = vperm.xlu0 %4799, %v5558_v46  }
 0x1ad   : > { %v5812_v35 = vpop.permute.xlu1 %1410  ;;  %v5814_v34 = vpop.permute.xlu0 %1405 }
 0x1ae   : > { %7970 = vst [vmem:[#allocation126_spill] sm:$0xff] %v5812_v35  ;;  %7971 = vst [vmem:[#allocation127_spill] sm:$0xff] %v5814_v34  ;;  %1934 = vperm.xlu1 %4800, %v5567_v48   ;;  %1929 = vperm.xlu0 %4799, %v5570_v47  }
 0x1b1   : > { %v5818_v36 = vpop.permute.xlu1 %1420  ;;  %v5820_v2 = vpop.permute.xlu0 %1415 }
 0x1b2   : > { %7972 = vst [vmem:[#allocation128_spill] sm:$0xff] %v5818_v36  ;;  %7973 = vst [vmem:[#allocation129_spill] sm:$0xff] %v5820_v2  ;;  %1944 = vperm.xlu1 %4800, %v5579_v42   ;;  %1939 = vperm.xlu0 %4799, %v5582_v43   ;;  %v5837_v2 = vld [vmem:[%s5070_s9 + $0x278] sm:$0xff]  ;;  %v5840_v36 = vld [vmem:[%s5070_s9 + $0x270] sm:$0xff] }
 0x1b5   : > { %v5824_v5 = vpop.permute.xlu1 %1430  ;;  %v5826_v20 = vpop.permute.xlu0 %1425 }
 0x1b6   : > { %7974 = vst [vmem:[#allocation130_spill] sm:$0xff] %v5824_v5  ;;  %7975 = vst [vmem:[#allocation131_spill] sm:$0xff] %v5826_v20  ;;  %1954 = vperm.xlu1 %4800, %v5591_v39   ;;  %1949 = vperm.xlu0 %4799, %v5594_v40  }
 0x1b9   : > { %v5830_v34 = vpop.permute.xlu1 %1440  ;;  %v5832_v35 = vpop.permute.xlu0 %1435 }
 0x1ba   : > { %7976 = vst [vmem:[#allocation132_spill] sm:$0xff] %v5830_v34  ;;  %7977 = vst [vmem:[#allocation133_spill] sm:$0xff] %v5832_v35  ;;  %1964 = vperm.xlu1 %4800, %v5603_v37   ;;  %1959 = vperm.xlu0 %4799, %v5606_v38  }
 0x1bd   : > { %v5842_v33 = vpop.permute.xlu1 %1506  ;;  %v5844_v5 = vpop.permute.xlu0 %1501 }
 0x1be   : > { %7978 = vst [vmem:[#allocation134_spill] sm:$0xff] %v5842_v33  ;;  %7979 = vst [vmem:[#allocation135_spill] sm:$0xff] %v5844_v5  ;;  %1974 = vperm.xlu1 %4800, %v5837_v2   ;;  %1969 = vperm.xlu0 %4799, %v5840_v36  }
 0x1c1   : > { %v5848_v20 = vpop.permute.xlu1 %1516  ;;  %v5850_v34 = vpop.permute.xlu0 %1511 }
 0x1c2   : > { %7980 = vst [vmem:[#allocation136_spill] sm:$0xff] %v5848_v20  ;;  %7981 = vst [vmem:[#allocation137_spill] sm:$0xff] %v5850_v34  ;;  %2036 = vperm.xlu1 %4800, %v5621_v25   ;;  %2031 = vperm.xlu0 %4799, %v5624_v4  }
 0x1c5   : > { %v5854_v35 = vpop.permute.xlu1 %1526  ;;  %v5856_v0 = vpop.permute.xlu0 %1521 }
 0x1c6   : > { %7982 = vst [vmem:[#allocation138_spill] sm:$0xff] %v5854_v35  ;;  %7983 = vst [vmem:[#allocation139_spill] sm:$0xff] %v5856_v0  ;;  %2046 = vperm.xlu1 %4800, %v5633_v32   ;;  %2041 = vperm.xlu0 %4799, %v5636_v31  }
 0x1c9   : > { %v5860_v5 = vpop.permute.xlu1 %1536  ;;  %v5862_v33 = vpop.permute.xlu0 %1531 }
 0x1ca   : > { %7984 = vst [vmem:[#allocation140_spill] sm:$0xff] %v5860_v5  ;;  %7985 = vst [vmem:[#allocation141_spill] sm:$0xff] %v5862_v33  ;;  %2056 = vperm.xlu1 %4800, %v5645_v30   ;;  %2051 = vperm.xlu0 %4799, %v5648_v3  }
 0x1cd   : > { %v5866_v34 = vpop.permute.xlu1 %1546  ;;  %v5868_v25 = vpop.permute.xlu0 %1541 }
 0x1ce   : > { %7986 = vst [vmem:[#allocation142_spill] sm:$0xff] %v5866_v34  ;;  %7987 = vst [vmem:[#allocation143_spill] sm:$0xff] %v5868_v25  ;;  %2066 = vperm.xlu1 %4800, %v5657_v29   ;;  %2061 = vperm.xlu0 %4799, %v5660_v28  }
 0x1d1   : > { %v5872_v4 = vpop.permute.xlu1 %1556  ;;  %v5874_v0 = vpop.permute.xlu0 %1551 }
 0x1d2   : > { %7988 = vst [vmem:[#allocation144_spill] sm:$0xff] %v5872_v4  ;;  %7989 = vst [vmem:[#allocation145_spill] sm:$0xff] %v5874_v0  ;;  %2076 = vperm.xlu1 %4800, %v5669_v27   ;;  %2071 = vperm.xlu0 %4799, %v5672_v23   ;;  %v5891_v0 = vld [vmem:[%s5070_s9 + $0x279] sm:$0xff]  ;;  %v5894_v4 = vld [vmem:[%s5070_s9 + $0x271] sm:$0xff] }
 0x1d5   : > { %v5878_v33 = vpop.permute.xlu1 %1566  ;;  %v5880_v5 = vpop.permute.xlu0 %1561 }
 0x1d6   : > { %7990 = vst [vmem:[#allocation146_spill] sm:$0xff] %v5878_v33  ;;  %7991 = vst [vmem:[#allocation147_spill] sm:$0xff] %v5880_v5  ;;  %2086 = vperm.xlu1 %4800, %v5681_v24   ;;  %2081 = vperm.xlu0 %4799, %v5684_v26  }
 0x1d9   : > { %v5884_v25 = vpop.permute.xlu1 %1576  ;;  %v5886_v34 = vpop.permute.xlu0 %1571 }
 0x1da   : > { %7992 = vst [vmem:[#allocation148_spill] sm:$0xff] %v5884_v25  ;;  %7993 = vst [vmem:[#allocation149_spill] sm:$0xff] %v5886_v34  ;;  %2096 = vperm.xlu1 %4800, %v5693_v21   ;;  %2091 = vperm.xlu0 %4799, %v5696_v22  }
 0x1dd   : > { %v5896_v35 = vpop.permute.xlu1 %1638  ;;  %v5898_v33 = vpop.permute.xlu0 %1633 }
 0x1de   : > { %7994 = vst [vmem:[#allocation150_spill] sm:$0xff] %v5896_v35  ;;  %7995 = vst [vmem:[#allocation151_spill] sm:$0xff] %v5898_v33  ;;  %2106 = vperm.xlu1 %4800, %v5891_v0   ;;  %2101 = vperm.xlu0 %4799, %v5894_v4  }
 0x1e1   : > { %v5902_v5 = vpop.permute.xlu1 %1648  ;;  %v5904_v25 = vpop.permute.xlu0 %1643 }
 0x1e2   : > { %7996 = vst [vmem:[#allocation152_spill] sm:$0xff] %v5902_v5  ;;  %7997 = vst [vmem:[#allocation153_spill] sm:$0xff] %v5904_v25  ;;  %2168 = vperm.xlu1 %4800, %v5711_v9   ;;  %2163 = vperm.xlu0 %4799, %v5714_v50  }
 0x1e5   : > { %v5908_v34 = vpop.permute.xlu1 %1658  ;;  %v5910_v20 = vpop.permute.xlu0 %1653 }
 0x1e6   : > { %7998 = vst [vmem:[#allocation154_spill] sm:$0xff] %v5908_v34  ;;  %7999 = vst [vmem:[#allocation155_spill] sm:$0xff] %v5910_v20  ;;  %2178 = vperm.xlu1 %4800, %v5723_v16   ;;  %2173 = vperm.xlu0 %4799, %v5726_v15  }
 0x1e9   : > { %v5914_v33 = vpop.permute.xlu1 %1668  ;;  %v5916_v35 = vpop.permute.xlu0 %1663 }
 0x1ea   : > { %8000 = vst [vmem:[#allocation156_spill] sm:$0xff] %v5914_v33  ;;  %8001 = vst [vmem:[#allocation157_spill] sm:$0xff] %v5916_v35  ;;  %2188 = vperm.xlu1 %4800, %v5735_v14   ;;  %2183 = vperm.xlu0 %4799, %v5738_v49  }
 0x1ed   : > { %v5920_v25 = vpop.permute.xlu1 %1678  ;;  %v5922_v9 = vpop.permute.xlu0 %1673 }
 0x1ee   : > { %8002 = vst [vmem:[#allocation158_spill] sm:$0xff] %v5920_v25  ;;  %8003 = vst [vmem:[#allocation159_spill] sm:$0xff] %v5922_v9  ;;  %2198 = vperm.xlu1 %4800, %v5747_v13   ;;  %2193 = vperm.xlu0 %4799, %v5750_v12  }
 0x1f1   : > { %v5926_v50 = vpop.permute.xlu1 %1688  ;;  %v5928_v20 = vpop.permute.xlu0 %1683 }
 0x1f2   : > { %8004 = vst [vmem:[#allocation160_spill] sm:$0xff] %v5926_v50  ;;  %8005 = vst [vmem:[#allocation161_spill] sm:$0xff] %v5928_v20  ;;  %2208 = vperm.xlu1 %4800, %v5759_v11   ;;  %2203 = vperm.xlu0 %4799, %v5762_v7   ;;  %v5945_v20 = vld [vmem:[%s5070_s9 + $0x27a] sm:$0xff]  ;;  %v5948_v50 = vld [vmem:[%s5070_s9 + $0x272] sm:$0xff] }
 0x1f5   : > { %v5932_v35 = vpop.permute.xlu1 %1698  ;;  %v5934_v33 = vpop.permute.xlu0 %1693 }
 0x1f6   : > { %8006 = vst [vmem:[#allocation162_spill] sm:$0xff] %v5932_v35  ;;  %8007 = vst [vmem:[#allocation163_spill] sm:$0xff] %v5934_v33  ;;  %2218 = vperm.xlu1 %4800, %v5771_v10   ;;  %2213 = vperm.xlu0 %4799, %v5774_v8  }
 0x1f9   : > { %v5938_v9 = vpop.permute.xlu1 %1708  ;;  %v5940_v25 = vpop.permute.xlu0 %1703 }
 0x1fa   : > { %8008 = vst [vmem:[#allocation164_spill] sm:$0xff] %v5938_v9  ;;  %8009 = vst [vmem:[#allocation165_spill] sm:$0xff] %v5940_v25  ;;  %2228 = vperm.xlu1 %4800, %v5783_v1   ;;  %2223 = vperm.xlu0 %4799, %v5786_v6  }
 0x1fd   : > { %v5950_v34 = vpop.permute.xlu1 %1770  ;;  %v5952_v35 = vpop.permute.xlu0 %1765 }
 0x1fe   : > { %8010 = vst [vmem:[#allocation166_spill] sm:$0xff] %v5950_v34  ;;  %8011 = vst [vmem:[#allocation167_spill] sm:$0xff] %v5952_v35  ;;  %2238 = vperm.xlu1 %4800, %v5945_v20   ;;  %2233 = vperm.xlu0 %4799, %v5948_v50  }
 0x201   : > { %v5956_v33 = vpop.permute.xlu1 %1780  ;;  %v5958_v9 = vpop.permute.xlu0 %1775 }
 0x202   : > { %8012 = vst [vmem:[#allocation168_spill] sm:$0xff] %v5956_v33  ;;  %8013 = vst [vmem:[#allocation169_spill] sm:$0xff] %v5958_v9  ;;  %2302 = vperm.xlu1 %4800, %v5543_v44   ;;  %2297 = vperm.xlu0 %4799, %v5546_v45  }
 0x205   : > { %v5962_v25 = vpop.permute.xlu1 %1790  ;;  %v5964_v5 = vpop.permute.xlu0 %1785 }
 0x206   : > { %8014 = vst [vmem:[#allocation170_spill] sm:$0xff] %v5962_v25  ;;  %8015 = vst [vmem:[#allocation171_spill] sm:$0xff] %v5964_v5  ;;  %2312 = vperm.xlu1 %4800, %v5555_v41   ;;  %2307 = vperm.xlu0 %4799, %v5558_v46   ;;  %v6349_v5 = vld [vmem:[%s5070_s9 + $0x3ca] sm:$0xff]  ;;  %v6352_v25 = vld [vmem:[%s5070_s9 + $0x3c2] sm:$0xff] }
 0x207   : > { %8124 = vst [vmem:[#allocation280_spill] sm:$0xff] %v6349_v5  ;;  %8125 = vst [vmem:[#allocation281_spill] sm:$0xff] %v6352_v25 }
 0x209   : > { %v5968_v35 = vpop.permute.xlu1 %1800  ;;  %v5970_v34 = vpop.permute.xlu0 %1795 }
 0x20a   : > { %8016 = vst [vmem:[#allocation172_spill] sm:$0xff] %v5968_v35  ;;  %8017 = vst [vmem:[#allocation173_spill] sm:$0xff] %v5970_v34  ;;  %2322 = vperm.xlu1 %4800, %v5567_v48   ;;  %2317 = vperm.xlu0 %4799, %v5570_v47  }
 0x20d   : > { %v5974_v9 = vpop.permute.xlu1 %1810  ;;  %v5976_v44 = vpop.permute.xlu0 %1805 }
 0x20e   : > { %8018 = vst [vmem:[#allocation174_spill] sm:$0xff] %v5974_v9  ;;  %8019 = vst [vmem:[#allocation175_spill] sm:$0xff] %v5976_v44  ;;  %2332 = vperm.xlu1 %4800, %v5579_v42   ;;  %2327 = vperm.xlu0 %4799, %v5582_v43   ;;  %v4437_v43 = vld [vmem:[%s5070_s9 + $0x290] sm:$0xff] }
 0x211   : > { %v5980_v41 = vpop.permute.xlu1 %1820  ;;  %v5982_v46 = vpop.permute.xlu0 %1815 }
 0x212   : > { %8020 = vst [vmem:[#allocation176_spill] sm:$0xff] %v5980_v41  ;;  %8021 = vst [vmem:[#allocation177_spill] sm:$0xff] %v5982_v46  ;;  %2342 = vperm.xlu1 %4800, %v5591_v39   ;;  %2337 = vperm.xlu0 %4799, %v5594_v40   ;;  %v4436_v39 = vld [vmem:[%s5070_s9 + $0x288] sm:$0xff] }
 0x215   : > { %v5986_v45 = vpop.permute.xlu1 %1830  ;;  %v5988_v47 = vpop.permute.xlu0 %1825 }
 0x216   : > { %8022 = vst [vmem:[#allocation178_spill] sm:$0xff] %v5986_v45  ;;  %8023 = vst [vmem:[#allocation179_spill] sm:$0xff] %v5988_v47  ;;  %2352 = vperm.xlu1 %4800, %v5603_v37   ;;  %2347 = vperm.xlu0 %4799, %v5606_v38   ;;  %v6327_v45 = vld [vmem:[%s5070_s9 + $0x3aa] sm:$0xff] }
 0x217   : > { %8118 = vst [vmem:[#allocation274_spill] sm:$0xff] %v6327_v45 }
 0x219   : > { %v5992_v48 = vpop.permute.xlu1 %1840  ;;  %v5994_v42 = vpop.permute.xlu0 %1835 }
 0x21a   : > { %8024 = vst [vmem:[#allocation180_spill] sm:$0xff] %v5992_v48  ;;  %8025 = vst [vmem:[#allocation181_spill] sm:$0xff] %v5994_v42  ;;  %2362 = vperm.xlu1 %4800, %v5837_v2   ;;  %2357 = vperm.xlu0 %4799, %v5840_v36  }
 0x21d   : > { %v6000_v46 = vpop.permute.xlu1 %1904  ;;  %v6002_v40 = vpop.permute.xlu0 %1899 }
 0x21e   : > { %8026 = vst [vmem:[#allocation182_spill] sm:$0xff] %v6000_v46  ;;  %8027 = vst [vmem:[#allocation183_spill] sm:$0xff] %v6002_v40  ;;  %2372 = vperm.xlu1 %4800, %v4437_v43   ;;  %2367 = vperm.xlu0 %4799, %v4436_v39   ;;  %v6287_v40 = vld [vmem:[%s5070_s9 + $0x382] sm:$0xff] }
 0x21f   : > { %8107 = vst [vmem:[#allocation263_spill] sm:$0xff] %v6287_v40 }
 0x221   : > { %v6004_v47 = vpop.permute.xlu1 %1914  ;;  %v6006_v37 = vpop.permute.xlu0 %1909 }
 0x222   : > { %8028 = vst [vmem:[#allocation184_spill] sm:$0xff] %v6004_v47  ;;  %8029 = vst [vmem:[#allocation185_spill] sm:$0xff] %v6006_v37  ;;  %2434 = vperm.xlu1 %4800, %v5633_v32   ;;  %2429 = vperm.xlu0 %4799, %v5636_v31  }
 0x225   : > { %v6010_v38 = vpop.permute.xlu1 %1924  ;;  %v6012_v2 = vpop.permute.xlu0 %1919 }
 0x226   : > { %8030 = vst [vmem:[#allocation186_spill] sm:$0xff] %v6010_v38  ;;  %8031 = vst [vmem:[#allocation187_spill] sm:$0xff] %v6012_v2  ;;  %2444 = vperm.xlu1 %4800, %v5645_v30   ;;  %2439 = vperm.xlu0 %4799, %v5648_v3   ;;  %v379_v38 = vlaneseq }
 0x229   : > { %v6016_v36 = vpop.permute.xlu1 %1934  ;;  %v6018_v43 = vpop.permute.xlu0 %1929 }
 0x22a   : > { %8032 = vst [vmem:[#allocation188_spill] sm:$0xff] %v6016_v36  ;;  %8033 = vst [vmem:[#allocation189_spill] sm:$0xff] %v6018_v43  ;;  %2454 = vperm.xlu1 %4800, %v5657_v29   ;;  %2449 = vperm.xlu0 %4799, %v5660_v28  }
 0x22d   : > { %v6022_v39 = vpop.permute.xlu1 %1944  ;;  %v6024_v31 = vpop.permute.xlu0 %1939 }
 0x22e   : > { %8034 = vst [vmem:[#allocation190_spill] sm:$0xff] %v6022_v39  ;;  %8035 = vst [vmem:[#allocation191_spill] sm:$0xff] %v6024_v31  ;;  %2464 = vperm.xlu1 %4800, %v5669_v27   ;;  %2459 = vperm.xlu0 %4799, %v5672_v23   ;;  %v4453_v23 = vld [vmem:[%s5070_s9 + $0x291] sm:$0xff] }
 0x231   : > { %v6028_v30 = vpop.permute.xlu1 %1954  ;;  %v6030_v32 = vpop.permute.xlu0 %1949 }
 0x232   : > { %8036 = vst [vmem:[#allocation192_spill] sm:$0xff] %v6028_v30  ;;  %8037 = vst [vmem:[#allocation193_spill] sm:$0xff] %v6030_v32  ;;  %2474 = vperm.xlu1 %4800, %v5681_v24   ;;  %2469 = vperm.xlu0 %4799, %v5684_v26   ;;  %v4452_v24 = vld [vmem:[%s5070_s9 + $0x289] sm:$0xff] }
 0x235   : > { %v6034_v3 = vpop.permute.xlu1 %1964  ;;  %v6036_v28 = vpop.permute.xlu0 %1959 }
 0x236   : > { %8038 = vst [vmem:[#allocation194_spill] sm:$0xff] %v6034_v3  ;;  %8039 = vst [vmem:[#allocation195_spill] sm:$0xff] %v6036_v28  ;;  %2484 = vperm.xlu1 %4800, %v5693_v21   ;;  %2479 = vperm.xlu0 %4799, %v5696_v22  }
 0x239   : > { %v6040_v29 = vpop.permute.xlu1 %1974  ;;  %v6042_v27 = vpop.permute.xlu0 %1969 }
 0x23a   : > { %8040 = vst [vmem:[#allocation196_spill] sm:$0xff] %v6040_v29  ;;  %8041 = vst [vmem:[#allocation197_spill] sm:$0xff] %v6042_v27  ;;  %2494 = vperm.xlu1 %4800, %v5891_v0   ;;  %2489 = vperm.xlu0 %4799, %v5894_v4  }
 0x23d   : > { %v6048_v32 = vpop.permute.xlu1 %2036  ;;  %v6050_v26 = vpop.permute.xlu0 %2031 }
 0x23e   : > { %8042 = vst [vmem:[#allocation198_spill] sm:$0xff] %v6048_v32  ;;  %8043 = vst [vmem:[#allocation199_spill] sm:$0xff] %v6050_v26  ;;  %2504 = vperm.xlu1 %4800, %v4453_v23   ;;  %2499 = vperm.xlu0 %4799, %v4452_v24  }
 0x241   : > { %v6052_v28 = vpop.permute.xlu1 %2046  ;;  %v6054_v21 = vpop.permute.xlu0 %2041 }
 0x242   : > { %8044 = vst [vmem:[#allocation200_spill] sm:$0xff] %v6052_v28  ;;  %8045 = vst [vmem:[#allocation201_spill] sm:$0xff] %v6054_v21  ;;  %2566 = vperm.xlu1 %4800, %v5723_v16   ;;  %2561 = vperm.xlu0 %4799, %v5726_v15   ;;  %v6197_v28 = vld [vmem:[%s5070_s9 + $0x381] sm:$0xff] }
 0x245   : > { %v6058_v22 = vpop.permute.xlu1 %2056  ;;  %v6060_v0 = vpop.permute.xlu0 %2051 }
 0x246   : > { %8046 = vst [vmem:[#allocation202_spill] sm:$0xff] %v6058_v22  ;;  %8047 = vst [vmem:[#allocation203_spill] sm:$0xff] %v6060_v0  ;;  %2576 = vperm.xlu1 %4800, %v5735_v14   ;;  %2571 = vperm.xlu0 %4799, %v5738_v49  }
 0x249   : > { %v6064_v4 = vpop.permute.xlu1 %2066  ;;  %v6066_v23 = vpop.permute.xlu0 %2061 }
 0x24a   : > { %8048 = vst [vmem:[#allocation204_spill] sm:$0xff] %v6064_v4  ;;  %8049 = vst [vmem:[#allocation205_spill] sm:$0xff] %v6066_v23  ;;  %2586 = vperm.xlu1 %4800, %v5747_v13   ;;  %2581 = vperm.xlu0 %4799, %v5750_v12  }
 0x24d   : > { %v6070_v24 = vpop.permute.xlu1 %2076  ;;  %v6072_v15 = vpop.permute.xlu0 %2071 }
 0x24e   : > { %8050 = vst [vmem:[#allocation206_spill] sm:$0xff] %v6070_v24  ;;  %8051 = vst [vmem:[#allocation207_spill] sm:$0xff] %v6072_v15  ;;  %2596 = vperm.xlu1 %4800, %v5759_v11   ;;  %2591 = vperm.xlu0 %4799, %v5762_v7  }
 0x251   : > { %v6076_v14 = vpop.permute.xlu1 %2086  ;;  %v6078_v16 = vpop.permute.xlu0 %2081 }
 0x252   : > { %8052 = vst [vmem:[#allocation208_spill] sm:$0xff] %v6076_v14  ;;  %8053 = vst [vmem:[#allocation209_spill] sm:$0xff] %v6078_v16  ;;  %2606 = vperm.xlu1 %4800, %v5771_v10   ;;  %2601 = vperm.xlu0 %4799, %v5774_v8   ;;  %v4469_v8 = vld [vmem:[%s5070_s9 + $0x292] sm:$0xff]  ;;  %v4468_v10 = vld [vmem:[%s5070_s9 + $0x28a] sm:$0xff] }
 0x255   : > { %v6082_v49 = vpop.permute.xlu1 %2096  ;;  %v6084_v12 = vpop.permute.xlu0 %2091 }
 0x256   : > { %8054 = vst [vmem:[#allocation210_spill] sm:$0xff] %v6082_v49  ;;  %8055 = vst [vmem:[#allocation211_spill] sm:$0xff] %v6084_v12  ;;  %2616 = vperm.xlu1 %4800, %v5783_v1   ;;  %2611 = vperm.xlu0 %4799, %v5786_v6   ;;  %v4471_v1 = vld [vmem:[%s5070_s9 + $0x368] sm:$0xff]  ;;  %v4470_v6 = vld [vmem:[%s5070_s9 + $0x360] sm:$0xff] }
 0x259   : > { %v6088_v11 = vpop.permute.xlu1 %2106  ;;  %v6090_v7 = vpop.permute.xlu0 %2101 }
 0x25a   : > { %8056 = vst [vmem:[#allocation212_spill] sm:$0xff] %v6088_v11  ;;  %8057 = vst [vmem:[#allocation213_spill] sm:$0xff] %v6090_v7  ;;  %2626 = vperm.xlu1 %4800, %v5945_v20   ;;  %2621 = vperm.xlu0 %4799, %v5948_v50   ;;  %v6107_v20 = vld [vmem:[%s5070_s9 + $0x380] sm:$0xff]  ;;  %v6110_v50 = vld [vmem:[%s5070_s9 + $0x378] sm:$0xff] }
 0x25d   : > { %v6096_v13 = vpop.permute.xlu1 %2168  ;;  %v6098_v12 = vpop.permute.xlu0 %2163 }
 0x25e   : > { %8058 = vst [vmem:[#allocation214_spill] sm:$0xff] %v6096_v13  ;;  %8059 = vst [vmem:[#allocation215_spill] sm:$0xff] %v6098_v12  ;;  %2636 = vperm.xlu1 %4800, %v4469_v8   ;;  %2631 = vperm.xlu0 %4799, %v4468_v10   ;;  %v6119_v8 = vld [vmem:[%s5070_s9 + $0x398] sm:$0xff]  ;;  %v6122_v10 = vld [vmem:[%s5070_s9 + $0x390] sm:$0xff] }
 0x261   : > { %v6102_v11 = vpop.permute.xlu1 %2178  ;;  %v6104_v7 = vpop.permute.xlu0 %2173 }
 0x262   : > { %8060 = vst [vmem:[#allocation216_spill] sm:$0xff] %v6102_v11  ;;  %8061 = vst [vmem:[#allocation217_spill] sm:$0xff] %v6104_v7  ;;  %2702 = vperm.xlu1 %4800, %v4471_v1   ;;  %2697 = vperm.xlu0 %4799, %v4470_v6  }
 0x265   : > { %v6112_v13 = vpop.permute.xlu1 %2188  ;;  %v6114_v12 = vpop.permute.xlu0 %2183 }
 0x266   : > { %8062 = vst [vmem:[#allocation218_spill] sm:$0xff] %v6112_v13  ;;  %8063 = vst [vmem:[#allocation219_spill] sm:$0xff] %v6114_v12  ;;  %2712 = vperm.xlu1 %4800, %v6107_v20   ;;  %2707 = vperm.xlu0 %4799, %v6110_v50   ;;  %v6131_v12 = vld [vmem:[%s5070_s9 + $0x3b0] sm:$0xff]  ;;  %v6134_v13 = vld [vmem:[%s5070_s9 + $0x3a8] sm:$0xff] }
 0x269   : > { %v6124_v1 = vpop.permute.xlu1 %2198  ;;  %v6126_v6 = vpop.permute.xlu0 %2193 }
 0x26a   : > { %8064 = vst [vmem:[#allocation220_spill] sm:$0xff] %v6124_v1  ;;  %8065 = vst [vmem:[#allocation221_spill] sm:$0xff] %v6126_v6  ;;  %2722 = vperm.xlu1 %4800, %v6119_v8   ;;  %2717 = vperm.xlu0 %4799, %v6122_v10   ;;  %v6143_v6 = vld [vmem:[%s5070_s9 + $0x3c8] sm:$0xff]  ;;  %v6146_v1 = vld [vmem:[%s5070_s9 + $0x3c0] sm:$0xff] }
 0x26d   : > { %v6136_v7 = vpop.permute.xlu1 %2208  ;;  %v6138_v11 = vpop.permute.xlu0 %2203 }
 0x26e   : > { %8066 = vst [vmem:[#allocation222_spill] sm:$0xff] %v6136_v7  ;;  %8067 = vst [vmem:[#allocation223_spill] sm:$0xff] %v6138_v11  ;;  %2732 = vperm.xlu1 %4800, %v6131_v12   ;;  %2727 = vperm.xlu0 %4799, %v6134_v13   ;;  %v6155_v11 = vld [vmem:[%s5070_s9 + $0x3e0] sm:$0xff]  ;;  %v6158_v7 = vld [vmem:[%s5070_s9 + $0x3d8] sm:$0xff] }
 0x271   : > { %v6148_v49 = vpop.permute.xlu1 %2218  ;;  %v6150_v16 = vpop.permute.xlu0 %2213 }
 0x272   : > { %8068 = vst [vmem:[#allocation224_spill] sm:$0xff] %v6148_v49  ;;  %8069 = vst [vmem:[#allocation225_spill] sm:$0xff] %v6150_v16  ;;  %2742 = vperm.xlu1 %4800, %v6143_v6   ;;  %2737 = vperm.xlu0 %4799, %v6146_v1   ;;  %v6167_v16 = vld [vmem:[%s5070_s9 + $0x3f8] sm:$0xff]  ;;  %v6170_v49 = vld [vmem:[%s5070_s9 + $0x3f0] sm:$0xff] }
 0x275   : > { %v6160_v14 = vpop.permute.xlu1 %2228  ;;  %v6162_v15 = vpop.permute.xlu0 %2223 }
 0x276   : > { %8070 = vst [vmem:[#allocation226_spill] sm:$0xff] %v6160_v14  ;;  %8071 = vst [vmem:[#allocation227_spill] sm:$0xff] %v6162_v15  ;;  %2752 = vperm.xlu1 %4800, %v6155_v11   ;;  %2747 = vperm.xlu0 %4799, %v6158_v7   ;;  %v6179_v15 = vld [vmem:[%s5070_s9 + $0x410] sm:$0xff]  ;;  %v6182_v14 = vld [vmem:[%s5070_s9 + $0x408] sm:$0xff] }
 0x279   : > { %v6172_v24 = vpop.permute.xlu1 %2238  ;;  %v6174_v23 = vpop.permute.xlu0 %2233 }
 0x27a   : > { %8072 = vst [vmem:[#allocation228_spill] sm:$0xff] %v6172_v24  ;;  %8073 = vst [vmem:[#allocation229_spill] sm:$0xff] %v6174_v23  ;;  %2762 = vperm.xlu1 %4800, %v6167_v16   ;;  %2757 = vperm.xlu0 %4799, %v6170_v49   ;;  %v4487_v23 = vld [vmem:[%s5070_s9 + $0x369] sm:$0xff]  ;;  %v4486_v24 = vld [vmem:[%s5070_s9 + $0x361] sm:$0xff] }
 0x27d   : > { %v6184_v4 = vpop.permute.xlu1 %2302  ;;  %v6186_v0 = vpop.permute.xlu0 %2297 }
 0x27e   : > { %8074 = vst [vmem:[#allocation230_spill] sm:$0xff] %v6184_v4  ;;  %8075 = vst [vmem:[#allocation231_spill] sm:$0xff] %v6186_v0  ;;  %2772 = vperm.xlu1 %4800, %v6179_v15   ;;  %2767 = vperm.xlu0 %4799, %v6182_v14   ;;  %v6200_v4 = vld [vmem:[%s5070_s9 + $0x379] sm:$0xff] }
 0x27f   : > { %8078 = vst [vmem:[#allocation234_spill] sm:$0xff] %v6200_v4 }
 0x281   : > { %v6192_v22 = vpop.permute.xlu1 %2312  ;;  %v6194_v21 = vpop.permute.xlu0 %2307 }
 0x282   : > { %8076 = vst [vmem:[#allocation232_spill] sm:$0xff] %v6192_v22  ;;  %8077 = vst [vmem:[#allocation233_spill] sm:$0xff] %v6194_v21  ;;  %2834 = vperm.xlu1 %4800, %v4487_v23   ;;  %2829 = vperm.xlu0 %4799, %v4486_v24   ;;  %v6209_v22 = vld [vmem:[%s5070_s9 + $0x399] sm:$0xff]  ;;  %v6212_v21 = vld [vmem:[%s5070_s9 + $0x391] sm:$0xff] }
 0x283   : > { %8081 = vst [vmem:[#allocation237_spill] sm:$0xff] %v6209_v22  ;;  %8082 = vst [vmem:[#allocation238_spill] sm:$0xff] %v6212_v21 }
 0x285   : > { %v6202_v0 = vpop.permute.xlu1 %2322  ;;  %v6204_v26 = vpop.permute.xlu0 %2317 }
 0x286   : > { %8079 = vst [vmem:[#allocation235_spill] sm:$0xff] %v6202_v0  ;;  %8080 = vst [vmem:[#allocation236_spill] sm:$0xff] %v6204_v26  ;;  %2844 = vperm.xlu1 %4800, %v6197_v28   ;;  %2839 = vperm.xlu0 %4799, %v6200_v4   ;;  %v6221_v26 = vld [vmem:[%s5070_s9 + $0x3b1] sm:$0xff]  ;;  %v6224_v0 = vld [vmem:[%s5070_s9 + $0x3a9] sm:$0xff] }
 0x287   : > { %8085 = vst [vmem:[#allocation241_spill] sm:$0xff] %v6221_v26  ;;  %8086 = vst [vmem:[#allocation242_spill] sm:$0xff] %v6224_v0  ;;  %v8147_v4 = vld [vmem:[#allocation17_spill] sm:$0xff] }
 0x289   : > { %v6214_v23 = vpop.permute.xlu1 %2332  ;;  %v6216_v24 = vpop.permute.xlu0 %2327 }
 0x28a   : > { %8083 = vst [vmem:[#allocation239_spill] sm:$0xff] %v6214_v23  ;;  %8084 = vst [vmem:[#allocation240_spill] sm:$0xff] %v6216_v24  ;;  %2854 = vperm.xlu1 %4800, %v6209_v22   ;;  %2849 = vperm.xlu0 %4799, %v6212_v21   ;;  %v6233_v24 = vld [vmem:[%s5070_s9 + $0x3c9] sm:$0xff]  ;;  %v6236_v23 = vld [vmem:[%s5070_s9 + $0x3c1] sm:$0xff] }
 0x28b   : > { %8089 = vst [vmem:[#allocation245_spill] sm:$0xff] %v6233_v24  ;;  %8090 = vst [vmem:[#allocation246_spill] sm:$0xff] %v6236_v23 }
 0x28d   : > { %v6226_v32 = vpop.permute.xlu1 %2342  ;;  %v6228_v27 = vpop.permute.xlu0 %2337 }
 0x28e   : > { %8087 = vst [vmem:[#allocation243_spill] sm:$0xff] %v6226_v32  ;;  %8088 = vst [vmem:[#allocation244_spill] sm:$0xff] %v6228_v27  ;;  %2864 = vperm.xlu1 %4800, %v6221_v26   ;;  %2859 = vperm.xlu0 %4799, %v6224_v0   ;;  %v6245_v27 = vld [vmem:[%s5070_s9 + $0x3e1] sm:$0xff]  ;;  %v6248_v32 = vld [vmem:[%s5070_s9 + $0x3d9] sm:$0xff] }
 0x28f   : > { %8093 = vst [vmem:[#allocation249_spill] sm:$0xff] %v6245_v27  ;;  %8094 = vst [vmem:[#allocation250_spill] sm:$0xff] %v6248_v32 }
 0x291   : > { %v6238_v29 = vpop.permute.xlu1 %2352  ;;  %v6240_v3 = vpop.permute.xlu0 %2347 }
 0x292   : > { %8091 = vst [vmem:[#allocation247_spill] sm:$0xff] %v6238_v29  ;;  %8092 = vst [vmem:[#allocation248_spill] sm:$0xff] %v6240_v3  ;;  %2874 = vperm.xlu1 %4800, %v6233_v24   ;;  %2869 = vperm.xlu0 %4799, %v6236_v23   ;;  %v6257_v3 = vld [vmem:[%s5070_s9 + $0x3f9] sm:$0xff]  ;;  %v6260_v29 = vld [vmem:[%s5070_s9 + $0x3f1] sm:$0xff] }
 0x293   : > { %8097 = vst [vmem:[#allocation253_spill] sm:$0xff] %v6257_v3  ;;  %8098 = vst [vmem:[#allocation254_spill] sm:$0xff] %v6260_v29  ;;  %v8136_v23 = vld [vmem:[#allocation7_spill] sm:$0xff] }
 0x294   : > { %v8137_v24 = vld [vmem:[#allocation11_spill] sm:$0xff] }
 0x295   : > { %v6250_v30 = vpop.permute.xlu1 %2362  ;;  %v6252_v31 = vpop.permute.xlu0 %2357 }
 0x296   : > { %8095 = vst [vmem:[#allocation251_spill] sm:$0xff] %v6250_v30  ;;  %8096 = vst [vmem:[#allocation252_spill] sm:$0xff] %v6252_v31  ;;  %2884 = vperm.xlu1 %4800, %v6245_v27   ;;  %2879 = vperm.xlu0 %4799, %v6248_v32   ;;  %v6269_v31 = vld [vmem:[%s5070_s9 + $0x411] sm:$0xff]  ;;  %v6272_v30 = vld [vmem:[%s5070_s9 + $0x409] sm:$0xff] }
 0x297   : > { %8101 = vst [vmem:[#allocation257_spill] sm:$0xff] %v6269_v31  ;;  %8102 = vst [vmem:[#allocation258_spill] sm:$0xff] %v6272_v30 }
 0x299   : > { %v6262_v39 = vpop.permute.xlu1 %2372  ;;  %v6264_v43 = vpop.permute.xlu0 %2367 }
 0x29a   : > { %8099 = vst [vmem:[#allocation255_spill] sm:$0xff] %v6262_v39  ;;  %8100 = vst [vmem:[#allocation256_spill] sm:$0xff] %v6264_v43  ;;  %2894 = vperm.xlu1 %4800, %v6257_v3   ;;  %2889 = vperm.xlu0 %4799, %v6260_v29   ;;  %v4503_v43 = vld [vmem:[%s5070_s9 + $0x36a] sm:$0xff]  ;;  %v4502_v39 = vld [vmem:[%s5070_s9 + $0x362] sm:$0xff] }
 0x29b   : > { %v8132_v3 = vld [vmem:[#allocation10_spill] sm:$0xff] }
 0x29d   : > { %v6274_v36 = vpop.permute.xlu1 %2434  ;;  %v6276_v2 = vpop.permute.xlu0 %2429 }
 0x29e   : > { %8103 = vst [vmem:[#allocation259_spill] sm:$0xff] %v6274_v36  ;;  %8104 = vst [vmem:[#allocation260_spill] sm:$0xff] %v6276_v2  ;;  %2904 = vperm.xlu1 %4800, %v6269_v31   ;;  %2899 = vperm.xlu0 %4799, %v6272_v30   ;;  %v6290_v36 = vld [vmem:[%s5070_s9 + $0x37a] sm:$0xff]  ;;  %v6292_v2 = vshrl.u32 %v379_v38, 7 }
 0x29f   : > { %8108 = vst [vmem:[#allocation264_spill] sm:$0xff] %v6290_v36  ;;  %v6316_v38 = vld [vmem:[%s7801_s1] sm:$0xff] }
 0x2a0   : > { %v6336_v41 = vsub.s32 4, %v6292_v2 }
 0x2a1   : > { %v6282_v37 = vpop.permute.xlu1 %2444  ;;  %v6284_v47 = vpop.permute.xlu0 %2439 }
 0x2a2   : > { %8105 = vst [vmem:[#allocation261_spill] sm:$0xff] %v6282_v37  ;;  %8106 = vst [vmem:[#allocation262_spill] sm:$0xff] %v6284_v47  ;;  %2966 = vperm.xlu1 %4800, %v4503_v43   ;;  %2961 = vperm.xlu0 %4799, %v4502_v39   ;;  %v6301_v37 = vld [vmem:[%s5070_s9 + $0x39a] sm:$0xff]  ;;  %v6304_v43 = vld [vmem:[%s5070_s9 + $0x392] sm:$0xff]  ;;  %v6307_v39 = vsub.s32 0, %v6292_v2 }
 0x2a3   : > { %8111 = vst [vmem:[#allocation267_spill] sm:$0xff] %v6301_v37  ;;  %8112 = vst [vmem:[#allocation268_spill] sm:$0xff] %v6304_v43 }
 0x2a4   : > { %8113 = vst [vmem:[#allocation269_spill] sm:$0xff] %v6307_v39  ;;  %8121 = vst [vmem:[#allocation277_spill] sm:$0xff] %v6336_v41  ;;  %v382_v44 = vrot.slane %v6316_v38, %v6307_v39 }
 0x2a5   : > { %v6294_v46 = vpop.permute.xlu1 %2454  ;;  %v6296_v42 = vpop.permute.xlu0 %2449 }
 0x2a6   : > { %8109 = vst [vmem:[#allocation265_spill] sm:$0xff] %v6294_v46  ;;  %8110 = vst [vmem:[#allocation266_spill] sm:$0xff] %v6296_v42  ;;  %2976 = vperm.xlu1 %4800, %v6287_v40   ;;  %2971 = vperm.xlu0 %4799, %v6290_v36   ;;  %v6321_v42 = vsub.s32 1, %v6292_v2  ;;  %v6324_v46 = vld [vmem:[%s5070_s9 + $0x3b2] sm:$0xff]  ;;  %v388_v30 = vmul.f32 %v382_v44, %v5278_v55  ;;  %v387_v31 = vmul.f32 %v382_v44, %v5280_v56  ;;  %v6389_v55 = vld [vmem:[%s5070_s9 + $0x3da] sm:$0xff] }
 0x2a7   : > { %8117 = vst [vmem:[#allocation273_spill] sm:$0xff] %v6324_v46  ;;  %v390_v29 = vmul.f32 %v382_v44, %v5284_v57  ;;  %8130 = vst [vmem:[#allocation286_spill] sm:$0xff] %v6389_v55  ;;  %v391_v56 = vmul.f32 %v382_v44, %v5292_v60  ;;  %v394_v57 = vmul.f32 %v382_v44, %v5296_v61  ;;  %v8135_v60 = vld [vmem:[#allocation6_spill] sm:$0xff] }
 0x2a8   : > { %8116 = vst [vmem:[#allocation272_spill] sm:$0xff] %v6321_v42  ;;  %v514_v35 = vrot.slane %v6316_v38, %v6321_v42  ;;  %v395_v61 = vmul.f32 %v382_v44, %v8135_v60  ;;  %v6418_v60 = vld [vmem:[%s5070_s9 + $0x3f2] sm:$0xff] }
 0x2a9   : > { %v6309_v47 = vpop.permute.xlu1 %2464  ;;  %v6311_v48 = vpop.permute.xlu0 %2459  ;;  %8140 = vst [vmem:[#allocation6_spill] sm:$0xff] %v6418_v60 }
 0x2aa   : > { %8114 = vst [vmem:[#allocation270_spill] sm:$0xff] %v6309_v47  ;;  %8115 = vst [vmem:[#allocation271_spill] sm:$0xff] %v6311_v48  ;;  %2986 = vperm.xlu1 %4800, %v6301_v37   ;;  %2981 = vperm.xlu0 %4799, %v6304_v43   ;;  %v6330_v48 = vsub.s32 2, %v6292_v2  ;;  %v6333_v47 = vsub.s32 3, %v6292_v2  ;;  %v386_v43 = vmul.f32 %v382_v44, %v5272_v53 }
 0x2ab   : > { %v384_v37 = vmul.f32 %v382_v44, %v5274_v54  ;;  %v516_v53 = vmul.f32 %v514_v35, %v5320_v17  ;;  %v6383_v54 = vsub.s32 5, %v6292_v2  ;;  %v8131_v17 = vld [vmem:[#allocation9_spill] sm:$0xff] }
 0x2ac   : > { %8119 = vst [vmem:[#allocation275_spill] sm:$0xff] %v6330_v48  ;;  %8120 = vst [vmem:[#allocation276_spill] sm:$0xff] %v6333_v47  ;;  %v6356_v33 = vrot.slane %v6316_v38, %v6330_v48 }
 0x2ad   : > { %v6340_v9 = vpop.permute.xlu1 %2474  ;;  %v6342_v34 = vpop.permute.xlu0 %2469  ;;  %8128 = vst [vmem:[#allocation284_spill] sm:$0xff] %v6383_v54 }
 0x2ae   : > { %8122 = vst [vmem:[#allocation278_spill] sm:$0xff] %v6340_v9  ;;  %8123 = vst [vmem:[#allocation279_spill] sm:$0xff] %v6342_v34  ;;  %2996 = vperm.xlu1 %4800, %v6324_v46   ;;  %2991 = vperm.xlu0 %4799, %v6327_v45   ;;  %v6360_v9 = vrot.slane %v6316_v38, %v6333_v47  ;;  %v6364_v34 = vrot.slane %v6316_v38, %v6336_v41 }
 0x2af   : > { %v385_v45 = vmul.f32 %v382_v44, %v5266_v51  ;;  %v383_v46 = vmul.f32 %v382_v44, %v5268_v52  ;;  %v389_v51 = vmul.f32 %v382_v44, %v5286_v58  ;;  %v392_v52 = vmul.f32 %v382_v44, %v5290_v59 }
 0x2b0   : > { %v393_v58 = vmul.f32 %v382_v44, %v5298_v62  ;;  %v396_v59 = vmul.f32 %v382_v44, %v5302_v63  ;;  %v520_v41 = vmul.f32 %v514_v35, %v8132_v3  ;;  %v8138_v62 = vld [vmem:[#allocation8_spill] sm:$0xff]  ;;  %v532_v47 = vadd.f32 %v516_v53, %v384_v37  ;;  %v8143_v37 = vld [vmem:[#allocation15_spill] sm:$0xff] }
 0x2b1   : > { %v6370_v36 = vpop.permute.xlu1 %2484  ;;  %v6372_v40 = vpop.permute.xlu0 %2479  ;;  %v397_v63 = vmul.f32 %v382_v44, %v8138_v62  ;;  %v6412_v3 = vrot.slane %v6316_v38, %v6383_v54  ;;  %v523_v53 = vmul.f32 %v514_v35, %v8143_v37  ;;  %v8144_v62 = vld [vmem:[#allocation16_spill] sm:$0xff] }
 0x2b2   : > { %8126 = vst [vmem:[#allocation282_spill] sm:$0xff] %v6370_v36  ;;  %8127 = vst [vmem:[#allocation283_spill] sm:$0xff] %v6372_v40  ;;  %3006 = vperm.xlu1 %4800, %v6349_v5   ;;  %3001 = vperm.xlu0 %4799, %v6352_v25   ;;  %v6386_v40 = vld [vmem:[%s5070_s9 + $0x3e2] sm:$0xff]  ;;  %v515_v36 = vmul.f32 %v514_v35, %v5322_v18  ;;  %v518_v25 = vmul.f32 %v514_v35, %v5326_v19  ;;  %v6436_v37 = vld [vmem:[%s5070_s9 + $0x412] sm:$0xff] }
 0x2b3   : > { %8129 = vst [vmem:[#allocation285_spill] sm:$0xff] %v6386_v40  ;;  %v517_v5 = vmul.f32 %v514_v35, %v8131_v17  ;;  %v398_v18 = vmul.f32 %v382_v44, %v8136_v23  ;;  %v519_v19 = vmul.f32 %v514_v35, %v8137_v24  ;;  %v8139_v17 = vld [vmem:[#allocation12_spill] sm:$0xff]  ;;  %v8141_v24 = vld [vmem:[#allocation13_spill] sm:$0xff]  ;;  %v536_v44 = vadd.f32 %v520_v41, %v388_v30 }
 0x2b4   : > { %v522_v0 = vmul.f32 %v514_v35, %v8139_v17  ;;  %v531_v23 = vadd.f32 %v515_v36, %v383_v46  ;;  %v521_v26 = vmul.f32 %v514_v35, %v8141_v24  ;;  %v526_v17 = vmul.f32 %v514_v35, %v8144_v62  ;;  %v6439_v62 = vld [vmem:[%s5070_s9 + $0x40a] sm:$0xff] }
 0x2b5   : > { %v6399_v32 = vpop.permute.xlu1 %2494  ;;  %v6401_v27 = vpop.permute.xlu0 %2489  ;;  %v535_v48 = vadd.f32 %v519_v19, %v387_v31  ;;  %v525_v46 = vmul.f32 %v514_v35, %v8147_v4  ;;  %8152 = vst [vmem:[#allocation8_spill] sm:$0xff] %v6439_v62  ;;  %v8153_v4 = vld [vmem:[#allocation22_spill] sm:$0xff] }
 0x2b6   : > { %8133 = vst [vmem:[#allocation9_spill] sm:$0xff] %v6399_v32  ;;  %8134 = vst [vmem:[#allocation10_spill] sm:$0xff] %v6401_v27  ;;  %3016 = vperm.xlu1 %4800, %v6386_v40   ;;  %3011 = vperm.xlu0 %4799, %v6389_v55   ;;  %v6415_v27 = vld [vmem:[%s5070_s9 + $0x3fa] sm:$0xff]  ;;  %v534_v32 = vadd.f32 %v518_v25, %v386_v43  ;;  %v533_v55 = vadd.f32 %v517_v5, %v385_v45  ;;  %v8149_v45 = vld [vmem:[#allocation19_spill] sm:$0xff] }
 0x2b7   : > { %v8142_v40 = vld [vmem:[#allocation14_spill] sm:$0xff]  ;;  %v538_v5 = vadd.f32 %v522_v0, %v390_v29  ;;  %v527_v41 = vmul.f32 %v514_v35, %v8149_v45  ;;  %v8151_v43 = vld [vmem:[#allocation21_spill] sm:$0xff]  ;;  %v537_v31 = vadd.f32 %v521_v26, %v389_v51  ;;  %v542_v29 = vadd.f32 %v526_v17, %v394_v57  ;;  %v8154_v0 = vld [vmem:[#allocation23_spill] sm:$0xff] }
 0x2b8   : > { %v524_v21 = vmul.f32 %v514_v35, %v8142_v40  ;;  %v8148_v25 = vld [vmem:[#allocation18_spill] sm:$0xff]  ;;  %v8150_v40 = vld [vmem:[#allocation20_spill] sm:$0xff]  ;;  %v529_v24 = vmul.f32 %v514_v35, %v8151_v43  ;;  %v647_v45 = vmul.f32 %v6356_v33, %v8154_v0  ;;  %v541_v26 = vadd.f32 %v525_v46, %v393_v58  ;;  %v8158_v51 = vld [vmem:[#allocation25_spill] sm:$0xff] }
 0x2b9   : > { %v6424_v54 = vpop.permute.xlu1 %2504  ;;  %v6426_v22 = vpop.permute.xlu0 %2499  ;;  %v528_v36 = vmul.f32 %v514_v35, %v8148_v25  ;;  %v530_v30 = vmul.f32 %v514_v35, %v8150_v40  ;;  %v648_v25 = vmul.f32 %v6356_v33, %v8153_v4  ;;  %v8155_v40 = vld [vmem:[#allocation24_spill] sm:$0xff]  ;;  %v8159_v17 = vld [vmem:[#allocation26_spill] sm:$0xff] }
 0x2ba   : > { %8145 = vst [vmem:[#allocation7_spill] sm:$0xff] %v6424_v54  ;;  %8146 = vst [vmem:[#allocation11_spill] sm:$0xff] %v6426_v22  ;;  %3026 = vperm.xlu1 %4800, %v6415_v27   ;;  %3021 = vperm.xlu0 %4799, %v6418_v60   ;;  %v540_v19 = vadd.f32 %v524_v21, %v392_v52  ;;  %v6444_v22 = vsub.s32 6, %v6292_v2  ;;  %v539_v54 = vadd.f32 %v523_v53, %v391_v56 }
 0x2bb   : > { %v650_v35 = vmul.f32 %v6356_v33, %v8155_v40  ;;  %v544_v21 = vadd.f32 %v528_v36, %v396_v59  ;;  %v649_v52 = vmul.f32 %v6356_v33, %v8158_v51  ;;  %v543_v56 = vadd.f32 %v527_v41, %v395_v61  ;;  %v8160_v40 = vld [vmem:[#allocation27_spill] sm:$0xff]  ;;  %v8162_v51 = vld [vmem:[#allocation29_spill] sm:$0xff] }
 0x2bc   : > { %v546_v57 = vadd.f32 %v530_v30, %v398_v18  ;;  %v545_v53 = vadd.f32 %v529_v24, %v397_v63  ;;  %v652_v4 = vmul.f32 %v6356_v33, %v8159_v17  ;;  %v664_v0 = vadd.f32 %v648_v25, %v532_v47  ;;  %v8163_v18 = vld [vmem:[#allocation30_spill] sm:$0xff]  ;;  %v8166_v24 = vld [vmem:[#allocation31_spill] sm:$0xff]  ;;  %v8167_v25 = vld [vmem:[#allocation32_spill] sm:$0xff] }
 0x2bd   : > { %v6450_v43 = vpop.permute.xlu1 %2566  ;;  %v6452_v60 = vpop.permute.xlu0 %2561  ;;  %v6466_v59 = vrot.slane %v6316_v38, %v6444_v22  ;;  %v663_v46 = vadd.f32 %v647_v45, %v531_v23  ;;  %v666_v36 = vadd.f32 %v650_v35, %v534_v32  ;;  %v653_v61 = vmul.f32 %v6356_v33, %v8162_v51  ;;  %v8168_v23 = vld [vmem:[#allocation33_spill] sm:$0xff]  ;;  %v8169_v35 = vld [vmem:[#allocation34_spill] sm:$0xff]  ;;  %v8170_v51 = vld [vmem:[#allocation35_spill] sm:$0xff] }
 0x2be   : > { %8156 = vst [vmem:[#allocation12_spill] sm:$0xff] %v6450_v43  ;;  %8157 = vst [vmem:[#allocation13_spill] sm:$0xff] %v6452_v60  ;;  %3036 = vperm.xlu1 %4800, %v6436_v37   ;;  %3031 = vperm.xlu0 %4799, %v6439_v62   ;;  %v651_v43 = vmul.f32 %v6356_v33, %v8160_v40  ;;  %v8161_v60 = vld [vmem:[#allocation28_spill] sm:$0xff]  ;;  %v656_v63 = vmul.f32 %v6356_v33, %v8163_v18 }
 0x2bf   : > { %v654_v58 = vmul.f32 %v6356_v33, %v8161_v60  ;;  %v665_v30 = vadd.f32 %v649_v52, %v533_v55  ;;  %v655_v60 = vmul.f32 %v6356_v33, %v8166_v24  ;;  %v658_v17 = vmul.f32 %v6356_v33, %v8167_v25  ;;  %v8171_v24 = vld [vmem:[#allocation36_spill] sm:$0xff]  ;;  %v8172_v25 = vld [vmem:[#allocation37_spill] sm:$0xff] }
 0x2c0   : > { %v668_v32 = vadd.f32 %v652_v4, %v536_v44  ;;  %v657_v45 = vmul.f32 %v6356_v33, %v8168_v23  ;;  %v660_v40 = vmul.f32 %v6356_v33, %v8169_v35  ;;  %v659_v55 = vmul.f32 %v6356_v33, %v8170_v51  ;;  %v8173_v44 = vld [vmem:[#allocation38_spill] sm:$0xff] }
 0x2c1   : > { %v6472_v41 = vpop.permute.xlu1 %2576  ;;  %v6474_v47 = vpop.permute.xlu0 %2571  ;;  %v667_v52 = vadd.f32 %v651_v43, %v535_v48  ;;  %v670_v18 = vadd.f32 %v654_v58, %v538_v5  ;;  %v784_v4 = vmul.f32 %v6360_v9, %v8173_v44  ;;  %v6495_v23 = vsub.s32 7, %v6292_v2  ;;  %v8175_v43 = vld [vmem:[#allocation39_spill] sm:$0xff]  ;;  %v8180_v44 = vld [vmem:[#allocation44_spill] sm:$0xff] }
 0x2c2   : > { %8164 = vst [vmem:[#allocation14_spill] sm:$0xff] %v6472_v41  ;;  %8165 = vst [vmem:[#allocation15_spill] sm:$0xff] %v6474_v47  ;;  %3100 = vperm.xlu1 %4800, %v6107_v20   ;;  %3095 = vperm.xlu0 %4799, %v6110_v50   ;;  %v662_v47 = vmul.f32 %v6356_v33, %v8171_v24  ;;  %v661_v20 = vmul.f32 %v6356_v33, %v8172_v25  ;;  %v8177_v24 = vld [vmem:[#allocation41_spill] sm:$0xff] }
 0x2c3   : > { %v669_v41 = vadd.f32 %v653_v61, %v537_v31  ;;  %v672_v50 = vadd.f32 %v656_v63, %v540_v19  ;;  %8174 = vst [vmem:[#allocation16_spill] sm:$0xff] %v6495_v23  ;;  %v671_v48 = vadd.f32 %v655_v60, %v539_v54  ;;  %v674_v5 = vadd.f32 %v658_v17, %v542_v29  ;;  %v8176_v61 = vld [vmem:[#allocation40_spill] sm:$0xff]  ;;  %v8178_v54 = vld [vmem:[#allocation42_spill] sm:$0xff]  ;;  %v8179_v17 = vld [vmem:[#allocation43_spill] sm:$0xff] }
 0x2c4   : > { %v783_v58 = vmul.f32 %v6360_v9, %v8175_v43  ;;  %v673_v33 = vadd.f32 %v657_v45, %v541_v26  ;;  %v676_v31 = vadd.f32 %v660_v40, %v544_v21  ;;  %v675_v19 = vadd.f32 %v659_v55, %v543_v56  ;;  %v8182_v45 = vld [vmem:[#allocation46_spill] sm:$0xff]  ;;  %v8183_v55 = vld [vmem:[#allocation47_spill] sm:$0xff]  ;;  %v8185_v43 = vld [vmem:[#allocation49_spill] sm:$0xff] }
 0x2c5   : > { %v6497_v35 = vpop.permute.xlu1 %2586  ;;  %v6499_v62 = vpop.permute.xlu0 %2581  ;;  %v786_v2 = vmul.f32 %v6360_v9, %v8176_v61  ;;  %v678_v63 = vadd.f32 %v662_v47, %v546_v57  ;;  %v677_v51 = vadd.f32 %v661_v20, %v545_v53  ;;  %v785_v25 = vmul.f32 %v6360_v9, %v8177_v24  ;;  %v8181_v53 = vld [vmem:[#allocation45_spill] sm:$0xff]  ;;  %v8184_v20 = vld [vmem:[#allocation48_spill] sm:$0xff]  ;;  %v8186_v24 = vld [vmem:[#allocation50_spill] sm:$0xff] }
 0x2c6   : > { %3110 = vperm.xlu1 %4800, %v6119_v8   ;;  %3105 = vperm.xlu0 %4799, %v6122_v10   ;;  %v788_v29 = vmul.f32 %v6360_v9, %v8178_v54  ;;  %v800_v60 = vadd.f32 %v784_v4, %v664_v0  ;;  %v787_v8 = vmul.f32 %v6360_v9, %v8179_v17  ;;  %v8187_v17 = vld [vmem:[#allocation51_spill] sm:$0xff] }
 0x2c7   : > { %v790_v10 = vmul.f32 %v6360_v9, %v8180_v44  ;;  %v6517_v26 = vrot.slane %v6316_v38, %v6495_v23  ;;  %v799_v57 = vadd.f32 %v783_v58, %v663_v46  ;;  %v789_v47 = vmul.f32 %v6360_v9, %v8181_v53  ;;  %v8189_v53 = vld [vmem:[#allocation53_spill] sm:$0xff] }
 0x2c8   : > { %v792_v0 = vmul.f32 %v6360_v9, %v8182_v45  ;;  %v802_v40 = vadd.f32 %v786_v2, %v666_v36  ;;  %v791_v38 = vmul.f32 %v6360_v9, %v8183_v55  ;;  %v794_v4 = vmul.f32 %v6360_v9, %v8184_v20  ;;  %v8188_v36 = vld [vmem:[#allocation52_spill] sm:$0xff] }
 0x2c9   : > { %v6519_v21 = vpop.permute.xlu1 %2596  ;;  %v6521_v56 = vpop.permute.xlu0 %2591  ;;  %v793_v46 = vmul.f32 %v6360_v9, %v8185_v43  ;;  %v801_v58 = vadd.f32 %v785_v25, %v665_v30  ;;  %v804_v61 = vadd.f32 %v788_v29, %v668_v32  ;;  %v796_v54 = vmul.f32 %v6360_v9, %v8186_v24  ;;  %v8190_v25 = vld [vmem:[#allocation54_spill] sm:$0xff]  ;;  %v8193_v24 = vld [vmem:[#allocation57_spill] sm:$0xff] }
 0x2ca   : > { %3120 = vperm.xlu1 %4800, %v6131_v12   ;;  %3115 = vperm.xlu0 %4799, %v6134_v13   ;;  %v795_v12 = vmul.f32 %v6360_v9, %v8187_v17  ;;  %v803_v44 = vadd.f32 %v787_v8, %v667_v52  ;;  %v806_v13 = vadd.f32 %v790_v10, %v670_v18  ;;  %v6552_v52 = vld [vmem:[%s7801_s1 + $0x8] sm:$0xff] }
 0x2cb   : > { %v798_v2 = vmul.f32 %v6360_v9, %v8188_v36  ;;  %v797_v45 = vmul.f32 %v6360_v9, %v8189_v53  ;;  %v805_v30 = vadd.f32 %v789_v47, %v669_v41  ;;  %v808_v32 = vadd.f32 %v792_v0, %v672_v50  ;;  %v8191_v10 = vld [vmem:[#allocation55_spill] sm:$0xff]  ;;  %v8192_v47 = vld [vmem:[#allocation56_spill] sm:$0xff] }
 0x2cc   : > { %v916_v29 = vmul.f32 %v6364_v34, %v8190_v25  ;;  %v807_v18 = vadd.f32 %v791_v38, %v671_v48  ;;  %v810_v9 = vadd.f32 %v794_v4, %v674_v5  ;;  %v809_v8 = vadd.f32 %v793_v46, %v673_v33  ;;  %v8194_v25 = vld [vmem:[#allocation58_spill] sm:$0xff]  ;;  %v8198_v38 = vld [vmem:[#allocation60_spill] sm:$0xff] }
 0x2cd   : > { %v6543_v55 = vpop.permute.xlu1 %2606  ;;  %v6545_v20 = vpop.permute.xlu0 %2601  ;;  %v915_v43 = vmul.f32 %v6364_v34, %v8191_v10  ;;  %v812_v41 = vadd.f32 %v796_v54, %v676_v31  ;;  %v811_v50 = vadd.f32 %v795_v12, %v675_v19  ;;  %v918_v0 = vmul.f32 %v6364_v34, %v8192_v47  ;;  %v8197_v31 = vld [vmem:[#allocation59_spill] sm:$0xff]  ;;  %v8200_v54 = vld [vmem:[#allocation62_spill] sm:$0xff]  ;;  %v8202_v10 = vld [vmem:[#allocation64_spill] sm:$0xff] }
 0x2ce   : > { %3130 = vperm.xlu1 %4800, %v6143_v6   ;;  %3125 = vperm.xlu0 %4799, %v6146_v1   ;;  %v917_v17 = vmul.f32 %v6364_v34, %v8193_v24  ;;  %v814_v36 = vadd.f32 %v798_v2, %v678_v63  ;;  %v813_v53 = vadd.f32 %v797_v45, %v677_v51  ;;  %v8199_v51 = vld [vmem:[#allocation61_spill] sm:$0xff]  ;;  %v8201_v2 = vld [vmem:[#allocation63_spill] sm:$0xff] }
 0x2cf   : > { %v920_v6 = vmul.f32 %v6364_v34, %v8194_v25  ;;  %v6566_v1 = vrot.slane %v6552_v52, %v6307_v39  ;;  %v932_v33 = vadd.f32 %v916_v29, %v800_v60  ;;  %v919_v19 = vmul.f32 %v6364_v34, %v8197_v31  ;;  %v8203_v24 = vld [vmem:[#allocation65_spill] sm:$0xff] }
 0x2d0   : > { %v922_v4 = vmul.f32 %v6364_v34, %v8198_v38  ;;  %v931_v63 = vadd.f32 %v915_v43, %v799_v57  ;;  %v921_v46 = vmul.f32 %v6364_v34, %v8199_v51  ;;  %v924_v12 = vmul.f32 %v6364_v34, %v8200_v54  ;;  %v8205_v43 = vld [vmem:[#allocation67_spill] sm:$0xff]  ;;  %v8206_v38 = vld [vmem:[#allocation68_spill] sm:$0xff] }
 0x2d1   : > { %v6568_v48 = vpop.permute.xlu1 %2616  ;;  %v6570_v5 = vpop.permute.xlu0 %2611  ;;  %v923_v60 = vmul.f32 %v6364_v34, %v8201_v2  ;;  %v934_v45 = vadd.f32 %v918_v0, %v802_v40  ;;  %v933_v29 = vadd.f32 %v917_v17, %v801_v58  ;;  %v926_v47 = vmul.f32 %v6364_v34, %v8202_v10  ;;  %v8209_v17 = vld [vmem:[#allocation69_spill] sm:$0xff] }
 0x2d2   : > { %8195 = vst [vmem:[#allocation17_spill] sm:$0xff] %v6568_v48  ;;  %8196 = vst [vmem:[#allocation18_spill] sm:$0xff] %v6570_v5  ;;  %3140 = vperm.xlu1 %4800, %v6155_v11   ;;  %3135 = vperm.xlu0 %4799, %v6158_v7   ;;  %v925_v11 = vmul.f32 %v6364_v34, %v8203_v24  ;;  %v936_v25 = vadd.f32 %v920_v6, %v804_v61  ;;  %v8204_v7 = vld [vmem:[#allocation66_spill] sm:$0xff] }
 0x2d3   : > { %v928_v57 = vmul.f32 %v6364_v34, %v8204_v7  ;;  %v927_v31 = vmul.f32 %v6364_v34, %v8205_v43  ;;  %v930_v51 = vmul.f32 %v6364_v34, %v8206_v38  ;;  %v935_v58 = vadd.f32 %v919_v19, %v803_v44  ;;  %v8210_v24 = vld [vmem:[#allocation70_spill] sm:$0xff]  ;;  %v8212_v44 = vld [vmem:[#allocation72_spill] sm:$0xff] }
 0x2d4   : > { %v938_v0 = vadd.f32 %v922_v4, %v806_v13  ;;  %v929_v2 = vmul.f32 %v6364_v34, %v8209_v17  ;;  %v937_v61 = vadd.f32 %v921_v46, %v805_v30  ;;  %v940_v6 = vadd.f32 %v924_v12, %v808_v32  ;;  %v8218_v12 = vld [vmem:[#allocation76_spill] sm:$0xff] }
 0x2d5   : > { %v6594_v54 = vpop.permute.xlu1 %2626  ;;  %v6596_v40 = vpop.permute.xlu0 %2621  ;;  %v939_v10 = vadd.f32 %v923_v60, %v807_v18  ;;  %v1048_v7 = vmul.f32 %v6412_v3, %v8210_v24  ;;  %v942_v43 = vadd.f32 %v926_v47, %v810_v9  ;;  %v941_v38 = vadd.f32 %v925_v11, %v809_v8  ;;  %v8216_v8 = vld [vmem:[#allocation74_spill] sm:$0xff]  ;;  %v8219_v47 = vld [vmem:[#allocation77_spill] sm:$0xff]  ;;  %v6629_v11 = vld [vmem:[%s5070_s9 + $0x428] sm:$0xff] }
 0x2d6   : > { %8207 = vst [vmem:[#allocation19_spill] sm:$0xff] %v6594_v54  ;;  %8208 = vst [vmem:[#allocation20_spill] sm:$0xff] %v6596_v40  ;;  %3150 = vperm.xlu1 %4800, %v6167_v16   ;;  %3145 = vperm.xlu0 %4799, %v6170_v49   ;;  %v8211_v54 = vld [vmem:[#allocation71_spill] sm:$0xff]  ;;  %v1050_v13 = vmul.f32 %v6412_v3, %v8212_v44  ;;  %v944_v34 = vadd.f32 %v928_v57, %v812_v41  ;;  %v8213_v49 = vld [vmem:[#allocation73_spill] sm:$0xff] }
 0x2d7   : > { %v1047_v40 = vmul.f32 %v6412_v3, %v8211_v54  ;;  %v943_v16 = vadd.f32 %v927_v31, %v811_v50  ;;  %v946_v19 = vadd.f32 %v930_v51, %v814_v36  ;;  %v1049_v30 = vmul.f32 %v6412_v3, %v8213_v49  ;;  %v8217_v50 = vld [vmem:[#allocation75_spill] sm:$0xff]  ;;  %v6632_v57 = vld [vmem:[%s5070_s9 + $0x420] sm:$0xff] }
 0x2d8   : > { %v945_v9 = vadd.f32 %v929_v2, %v813_v53  ;;  %v1052_v4 = vmul.f32 %v6412_v3, %v8216_v8  ;;  %v6618_v46 = vrot.slane %v6552_v52, %v6321_v42  ;;  %v1064_v41 = vadd.f32 %v1048_v7, %v932_v33  ;;  %v8220_v54 = vld [vmem:[#allocation78_spill] sm:$0xff]  ;;  %v8222_v2 = vld [vmem:[#allocation80_spill] sm:$0xff]  ;;  %v8223_v7 = vld [vmem:[#allocation81_spill] sm:$0xff] }
 0x2d9   : > { %v6610_v32 = vpop.permute.xlu1 %2636  ;;  %v6612_v18 = vpop.permute.xlu0 %2631  ;;  %v1051_v36 = vmul.f32 %v6412_v3, %v8217_v50  ;;  %v1054_v60 = vmul.f32 %v6412_v3, %v8218_v12  ;;  %v1053_v53 = vmul.f32 %v6412_v3, %v8219_v47  ;;  %v1063_v31 = vadd.f32 %v1047_v40, %v931_v63  ;;  %v8224_v49 = vld [vmem:[#allocation82_spill] sm:$0xff]  ;;  %v8227_v40 = vld [vmem:[#allocation83_spill] sm:$0xff]  ;;  %v8228_v12 = vld [vmem:[#allocation84_spill] sm:$0xff] }
 0x2da   : > { %8214 = vst [vmem:[#allocation21_spill] sm:$0xff] %v6610_v32  ;;  %8215 = vst [vmem:[#allocation22_spill] sm:$0xff] %v6612_v18  ;;  %3160 = vperm.xlu1 %4800, %v6179_v15   ;;  %3155 = vperm.xlu0 %4799, %v6182_v14   ;;  %v1066_v51 = vadd.f32 %v1050_v13, %v934_v45  ;;  %v1056_v15 = vmul.f32 %v6412_v3, %v8220_v54  ;;  %v8221_v14 = vld [vmem:[#allocation79_spill] sm:$0xff]  ;;  %v8232_v32 = vld [vmem:[#allocation88_spill] sm:$0xff] }
 0x2db   : > { %v1055_v33 = vmul.f32 %v6412_v3, %v8221_v14  ;;  %v1065_v17 = vadd.f32 %v1049_v30, %v933_v29  ;;  %v1058_v24 = vmul.f32 %v6412_v3, %v8222_v2  ;;  %v1057_v44 = vmul.f32 %v6412_v3, %v8223_v7  ;;  %v8229_v14 = vld [vmem:[#allocation85_spill] sm:$0xff] }
 0x2dc   : > { %v1060_v8 = vmul.f32 %v6412_v3, %v8224_v49  ;;  %v1068_v45 = vadd.f32 %v1052_v4, %v936_v25  ;;  %v1059_v13 = vmul.f32 %v6412_v3, %v8227_v40  ;;  %v1062_v29 = vmul.f32 %v6412_v3, %v8228_v12  ;;  %v8231_v4 = vld [vmem:[#allocation87_spill] sm:$0xff] }
 0x2dd   : > { %v6644_v50 = vpop.permute.xlu1 %2702  ;;  %v6646_v63 = vpop.permute.xlu0 %2697  ;;  %v1067_v30 = vadd.f32 %v1051_v36, %v935_v58  ;;  %v1070_v47 = vadd.f32 %v1054_v60, %v938_v0  ;;  %v1069_v54 = vadd.f32 %v1053_v53, %v937_v61  ;;  %v1061_v2 = vmul.f32 %v6412_v3, %v8229_v14  ;;  %v8236_v36 = vld [vmem:[#allocation234_spill] sm:$0xff]  ;;  %v8239_v53 = vld [vmem:[#allocation275_spill] sm:$0xff]  ;;  %v8244_v14 = vld [vmem:[#allocation96_spill] sm:$0xff] }
 0x2de   : > { %8225 = vst [vmem:[#allocation23_spill] sm:$0xff] %v6644_v50  ;;  %8226 = vst [vmem:[#allocation24_spill] sm:$0xff] %v6646_v63  ;;  %3170 = vperm.xlu1 %4800, %v6629_v11   ;;  %3165 = vperm.xlu0 %4799, %v6632_v57   ;;  %v1072_v7 = vadd.f32 %v1056_v15, %v940_v6  ;;  %v1071_v49 = vadd.f32 %v1055_v33, %v939_v10  ;;  %v8230_v63 = vld [vmem:[#allocation86_spill] sm:$0xff]  ;;  %v8235_v6 = vld [vmem:[#allocation89_spill] sm:$0xff] }
 0x2df   : > { %v1184_v25 = vmul.f32 %v6466_v59, %v8230_v63  ;;  %v1183_v40 = vmul.f32 %v6466_v59, %v8231_v4  ;;  %v1074_v50 = vadd.f32 %v1058_v24, %v942_v43  ;;  %v1073_v12 = vadd.f32 %v1057_v44, %v941_v38  ;;  %v8237_v43 = vld [vmem:[#allocation90_spill] sm:$0xff]  ;;  %v8240_v33 = vld [vmem:[#allocation92_spill] sm:$0xff]  ;;  %v8241_v44 = vld [vmem:[#allocation93_spill] sm:$0xff] }
 0x2e0   : > { %v1076_v18 = vadd.f32 %v1060_v8, %v944_v34  ;;  %v1186_v5 = vmul.f32 %v6466_v59, %v8232_v32  ;;  %v1075_v61 = vadd.f32 %v1059_v13, %v943_v16  ;;  %v1078_v3 = vadd.f32 %v1062_v29, %v946_v19  ;;  %v8238_v34 = vld [vmem:[#allocation91_spill] sm:$0xff] }
 0x2e1   : > { %v6662_v58 = vpop.permute.xlu1 %2712  ;;  %v6664_v0 = vpop.permute.xlu0 %2707  ;;  %v1185_v10 = vmul.f32 %v6466_v59, %v8235_v6  ;;  %v1077_v60 = vadd.f32 %v1061_v2, %v945_v9  ;;  %v1188_v38 = vmul.f32 %v6466_v59, %v8237_v43  ;;  %v1187_v32 = vmul.f32 %v6466_v59, %v8238_v34  ;;  %v8242_v9 = vld [vmem:[#allocation94_spill] sm:$0xff]  ;;  %v8243_v13 = vld [vmem:[#allocation95_spill] sm:$0xff] }
 0x2e2   : > { %8233 = vst [vmem:[#allocation25_spill] sm:$0xff] %v6662_v58  ;;  %8234 = vst [vmem:[#allocation26_spill] sm:$0xff] %v6664_v0  ;;  %3232 = vperm.xlu1 %4800, %v6197_v28   ;;  %3227 = vperm.xlu0 %4799, %v8236_v36   ;;  %v6676_v15 = vrot.slane %v6552_v52, %v8239_v53  ;;  %v1200_v16 = vadd.f32 %v1184_v25, %v1064_v41  ;;  %v8247_v25 = vld [vmem:[#allocation97_spill] sm:$0xff]  ;;  %v8248_v6 = vld [vmem:[#allocation98_spill] sm:$0xff] }
 0x2e3   : > { %v1199_v19 = vadd.f32 %v1183_v40, %v1063_v31  ;;  %v1190_v24 = vmul.f32 %v6466_v59, %v8240_v33  ;;  %v1189_v28 = vmul.f32 %v6466_v59, %v8241_v44  ;;  %v1202_v8 = vadd.f32 %v1186_v5, %v1066_v51  ;;  %v8249_v51 = vld [vmem:[#allocation237_spill] sm:$0xff]  ;;  %v8250_v36 = vld [vmem:[#allocation238_spill] sm:$0xff]  ;;  %v8251_v33 = vld [vmem:[#allocation99_spill] sm:$0xff] }
 0x2e4   : > { %v1192_v63 = vmul.f32 %v6466_v59, %v8242_v9  ;;  %v1191_v29 = vmul.f32 %v6466_v59, %v8243_v13  ;;  %v1194_v2 = vmul.f32 %v6466_v59, %v8244_v14  ;;  %v1201_v31 = vadd.f32 %v1185_v10, %v1065_v17  ;;  %v8252_v9 = vld [vmem:[#allocation100_spill] sm:$0xff]  ;;  %v8253_v10 = vld [vmem:[#allocation101_spill] sm:$0xff] }
 0x2e5   : > { %v6688_v4 = vpop.permute.xlu1 %2722  ;;  %v6690_v41 = vpop.permute.xlu0 %2717  ;;  %v1193_v40 = vmul.f32 %v6466_v59, %v8247_v25  ;;  %v1196_v5 = vmul.f32 %v6466_v59, %v8248_v6  ;;  %v1204_v43 = vadd.f32 %v1188_v38, %v1068_v45  ;;  %v1203_v34 = vadd.f32 %v1187_v32, %v1067_v30  ;;  %v8318_v58 = vld [vmem:[#allocation140_spill] sm:$0xff] }
 0x2e6   : > { %8245 = vst [vmem:[#allocation27_spill] sm:$0xff] %v6688_v4  ;;  %8246 = vst [vmem:[#allocation28_spill] sm:$0xff] %v6690_v41  ;;  %3242 = vperm.xlu1 %4800, %v8249_v51   ;;  %3237 = vperm.xlu0 %4799, %v8250_v36   ;;  %v1195_v44 = vmul.f32 %v6466_v59, %v8251_v33  ;;  %v1198_v13 = vmul.f32 %v6466_v59, %v8252_v9  ;;  %v8254_v41 = vld [vmem:[#allocation102_spill] sm:$0xff]  ;;  %v8255_v36 = vld [vmem:[#allocation103_spill] sm:$0xff] }
 0x2e7   : > { %v1206_v14 = vadd.f32 %v1190_v24, %v1070_v47  ;;  %v1205_v17 = vadd.f32 %v1189_v28, %v1069_v54  ;;  %v1197_v25 = vmul.f32 %v6466_v59, %v8253_v10  ;;  %v1316_v6 = vmul.f32 %v6517_v26, %v8254_v41  ;;  %v8258_v47 = vld [vmem:[#allocation104_spill] sm:$0xff]  ;;  %v8259_v24 = vld [vmem:[#allocation241_spill] sm:$0xff]  ;;  %v8260_v59 = vld [vmem:[#allocation242_spill] sm:$0xff] }
 0x2e8   : > { %v1208_v4 = vadd.f32 %v1192_v63, %v1072_v7  ;;  %v1207_v51 = vadd.f32 %v1191_v29, %v1071_v49  ;;  %v1210_v0 = vadd.f32 %v1194_v2, %v1074_v50  ;;  %v1315_v45 = vmul.f32 %v6517_v26, %v8255_v36  ;;  %v8261_v49 = vld [vmem:[#allocation105_spill] sm:$0xff]  ;;  %v8262_v63 = vld [vmem:[#allocation106_spill] sm:$0xff]  ;;  %v8263_v9 = vld [vmem:[#allocation107_spill] sm:$0xff] }
 0x2e9   : > { %v6708_v30 = vpop.permute.xlu1 %2732  ;;  %v6710_v38 = vpop.permute.xlu0 %2727  ;;  %v1209_v32 = vadd.f32 %v1193_v40, %v1073_v12  ;;  %v1212_v33 = vadd.f32 %v1196_v5, %v1076_v18  ;;  %v1318_v54 = vmul.f32 %v6517_v26, %v8258_v47  ;;  %v1211_v28 = vadd.f32 %v1195_v44, %v1075_v61  ;;  %v8264_v12 = vld [vmem:[#allocation276_spill] sm:$0xff] }
 0x2ea   : > { %8256 = vst [vmem:[#allocation29_spill] sm:$0xff] %v6708_v30  ;;  %8257 = vst [vmem:[#allocation30_spill] sm:$0xff] %v6710_v38  ;;  %3252 = vperm.xlu1 %4800, %v8259_v24   ;;  %3247 = vperm.xlu0 %4799, %v8260_v59   ;;  %v1214_v7 = vadd.f32 %v1198_v13, %v1078_v3  ;;  %v1317_v50 = vmul.f32 %v6517_v26, %v8261_v49  ;;  %v8265_v10 = vld [vmem:[#allocation108_spill] sm:$0xff]  ;;  %v8266_v3 = vld [vmem:[#allocation109_spill] sm:$0xff] }
 0x2eb   : > { %v1320_v29 = vmul.f32 %v6517_v26, %v8262_v63  ;;  %v1213_v2 = vadd.f32 %v1197_v25, %v1077_v60  ;;  %v1332_v41 = vadd.f32 %v1316_v6, %v1200_v16  ;;  %v1319_v18 = vmul.f32 %v6517_v26, %v8263_v9  ;;  %v8267_v13 = vld [vmem:[#allocation110_spill] sm:$0xff]  ;;  %v8270_v25 = vld [vmem:[#allocation111_spill] sm:$0xff]  ;;  %v8271_v24 = vld [vmem:[#allocation112_spill] sm:$0xff] }
 0x2ec   : > { %v6724_v40 = vrot.slane %v6552_v52, %v8264_v12  ;;  %v1331_v5 = vadd.f32 %v1315_v45, %v1199_v19  ;;  %v1322_v61 = vmul.f32 %v6517_v26, %v8265_v10  ;;  %v1321_v44 = vmul.f32 %v6517_v26, %v8266_v3  ;;  %v8272_v45 = vld [vmem:[#allocation245_spill] sm:$0xff]  ;;  %v8273_v59 = vld [vmem:[#allocation246_spill] sm:$0xff] }
 0x2ed   : > { %v1324_v36 = vmul.f32 %v6517_v26, %v8267_v13  ;;  %v6732_v47 = vpop.permute.xlu1 %2742  ;;  %v6734_v60 = vpop.permute.xlu0 %2737  ;;  %v1334_v16 = vadd.f32 %v1318_v54, %v1202_v8  ;;  %v1323_v6 = vmul.f32 %v6517_v26, %v8270_v25  ;;  %v1326_v19 = vmul.f32 %v6517_v26, %v8271_v24  ;;  %v8274_v9 = vld [vmem:[#allocation113_spill] sm:$0xff]  ;;  %v8275_v3 = vld [vmem:[#allocation114_spill] sm:$0xff]  ;;  %v8276_v8 = vld [vmem:[#allocation115_spill] sm:$0xff] }
 0x2ee   : > { %8268 = vst [vmem:[#allocation31_spill] sm:$0xff] %v6732_v47  ;;  %8269 = vst [vmem:[#allocation32_spill] sm:$0xff] %v6734_v60  ;;  %3262 = vperm.xlu1 %4800, %v8272_v45   ;;  %3257 = vperm.xlu0 %4799, %v8273_v59   ;;  %v1333_v49 = vadd.f32 %v1317_v50, %v1201_v31  ;;  %v1336_v63 = vadd.f32 %v1320_v29, %v1204_v43  ;;  %v8277_v25 = vld [vmem:[#allocation116_spill] sm:$0xff]  ;;  %v8278_v24 = vld [vmem:[#allocation117_spill] sm:$0xff] }
 0x2ef   : > { %v1325_v10 = vmul.f32 %v6517_v26, %v8274_v9  ;;  %v1328_v13 = vmul.f32 %v6517_v26, %v8275_v3  ;;  %v1335_v60 = vadd.f32 %v1319_v18, %v1203_v34  ;;  %v1327_v54 = vmul.f32 %v6517_v26, %v8276_v8  ;;  %v8279_v43 = vld [vmem:[#allocation118_spill] sm:$0xff]  ;;  %v8282_v3 = vld [vmem:[#allocation119_spill] sm:$0xff]  ;;  %v8283_v30 = vld [vmem:[#allocation249_spill] sm:$0xff] }
 0x2f0   : > { %v1330_v47 = vmul.f32 %v6517_v26, %v8277_v25  ;;  %v1329_v45 = vmul.f32 %v6517_v26, %v8278_v24  ;;  %v1338_v38 = vadd.f32 %v1322_v61, %v1206_v14  ;;  %v1337_v59 = vadd.f32 %v1321_v44, %v1205_v17  ;;  %v8284_v25 = vld [vmem:[#allocation250_spill] sm:$0xff]  ;;  %v8285_v17 = vld [vmem:[#allocation120_spill] sm:$0xff]  ;;  %v8286_v61 = vld [vmem:[#allocation121_spill] sm:$0xff] }
 0x2f1   : > { %v1340_v31 = vadd.f32 %v1324_v36, %v1208_v4  ;;  %v1448_v50 = vmul.f32 %v6566_v1, %v8279_v43  ;;  %v6754_v29 = vpop.permute.xlu1 %2752  ;;  %v6756_v9 = vpop.permute.xlu0 %2747  ;;  %v1339_v34 = vadd.f32 %v1323_v6, %v1207_v51  ;;  %v1342_v18 = vadd.f32 %v1326_v19, %v1210_v0  ;;  %v8287_v51 = vld [vmem:[#allocation122_spill] sm:$0xff]  ;;  %v8288_v19 = vld [vmem:[#allocation123_spill] sm:$0xff] }
 0x2f2   : > { %8280 = vst [vmem:[#allocation33_spill] sm:$0xff] %v6754_v29  ;;  %8281 = vst [vmem:[#allocation34_spill] sm:$0xff] %v6756_v9  ;;  %v1447_v8 = vmul.f32 %v6566_v1, %v8282_v3  ;;  %3272 = vperm.xlu1 %4800, %v8283_v30   ;;  %3267 = vperm.xlu0 %4799, %v8284_v25   ;;  %v1341_v26 = vadd.f32 %v1325_v10, %v1209_v32  ;;  %v8289_v3 = vld [vmem:[#allocation124_spill] sm:$0xff] }
 0x2f3   : > { %v1344_v14 = vadd.f32 %v1328_v13, %v1212_v33  ;;  %v1450_v4 = vmul.f32 %v6566_v1, %v8285_v17  ;;  %v1449_v44 = vmul.f32 %v6566_v1, %v8286_v61  ;;  %v1343_v36 = vadd.f32 %v1327_v54, %v1211_v28  ;;  %v8290_v33 = vld [vmem:[#allocation277_spill] sm:$0xff]  ;;  %v8297_v61 = vld [vmem:[#allocation127_spill] sm:$0xff]  ;;  %v8310_v29 = vld [vmem:[#allocation136_spill] sm:$0xff] }
 0x2f4   : > { %v1346_v24 = vadd.f32 %v1330_v47, %v1214_v7  ;;  %v1345_v43 = vadd.f32 %v1329_v45, %v1213_v2  ;;  %v1452_v0 = vmul.f32 %v6566_v1, %v8287_v51  ;;  %v1464_v6 = vadd.f32 %v1448_v50, %v1332_v41  ;;  %v8293_v7 = vld [vmem:[#allocation125_spill] sm:$0xff]  ;;  %v8294_v47 = vld [vmem:[#allocation126_spill] sm:$0xff] }
 0x2f5   : > { %v1451_v30 = vmul.f32 %v6566_v1, %v8288_v19  ;;  %v1454_v32 = vmul.f32 %v6566_v1, %v8289_v3  ;;  %v6774_v10 = vrot.slane %v6552_v52, %v8290_v33  ;;  %v6776_v13 = vpop.permute.xlu1 %2762  ;;  %v6778_v25 = vpop.permute.xlu0 %2757  ;;  %v1463_v28 = vadd.f32 %v1447_v8, %v1331_v5  ;;  %v8295_v54 = vld [vmem:[#allocation253_spill] sm:$0xff]  ;;  %v8296_v45 = vld [vmem:[#allocation254_spill] sm:$0xff]  ;;  %v8298_v19 = vld [vmem:[#allocation128_spill] sm:$0xff] }
 0x2f6   : > { %8291 = vst [vmem:[#allocation35_spill] sm:$0xff] %v6776_v13  ;;  %8292 = vst [vmem:[#allocation36_spill] sm:$0xff] %v6778_v25  ;;  %v1453_v2 = vmul.f32 %v6566_v1, %v8293_v7  ;;  %v1456_v41 = vmul.f32 %v6566_v1, %v8294_v47  ;;  %3282 = vperm.xlu1 %4800, %v8295_v54   ;;  %3277 = vperm.xlu0 %4799, %v8296_v45   ;;  %v8299_v5 = vld [vmem:[#allocation129_spill] sm:$0xff]  ;;  %v8300_v7 = vld [vmem:[#allocation130_spill] sm:$0xff] }
 0x2f7   : > { %v1466_v50 = vadd.f32 %v1450_v4, %v1334_v16  ;;  %v1465_v17 = vadd.f32 %v1449_v44, %v1333_v49  ;;  %v1455_v51 = vmul.f32 %v6566_v1, %v8297_v61  ;;  %v1458_v3 = vmul.f32 %v6566_v1, %v8298_v19  ;;  %v8301_v47 = vld [vmem:[#allocation131_spill] sm:$0xff]  ;;  %v8302_v49 = vld [vmem:[#allocation132_spill] sm:$0xff]  ;;  %v8303_v44 = vld [vmem:[#allocation133_spill] sm:$0xff] }
 0x2f8   : > { %v1468_v25 = vadd.f32 %v1452_v0, %v1336_v63  ;;  %v1457_v8 = vmul.f32 %v6566_v1, %v8299_v5  ;;  %v1460_v13 = vmul.f32 %v6566_v1, %v8300_v7  ;;  %v1459_v54 = vmul.f32 %v6566_v1, %v8301_v47  ;;  %v8306_v7 = vld [vmem:[#allocation134_spill] sm:$0xff]  ;;  %v8307_v47 = vld [vmem:[#allocation257_spill] sm:$0xff] }
 0x2f9   : > { %v1467_v45 = vadd.f32 %v1451_v30, %v1335_v60  ;;  %v1470_v16 = vadd.f32 %v1454_v32, %v1338_v38  ;;  %v1462_v4 = vmul.f32 %v6566_v1, %v8302_v49  ;;  %v1461_v61 = vmul.f32 %v6566_v1, %v8303_v44  ;;  %v6800_v63 = vpop.permute.xlu1 %2772  ;;  %v6802_v0 = vpop.permute.xlu0 %2767  ;;  %v8308_v60 = vld [vmem:[#allocation258_spill] sm:$0xff]  ;;  %v8309_v32 = vld [vmem:[#allocation135_spill] sm:$0xff] }
 0x2fa   : > { %8304 = vst [vmem:[#allocation37_spill] sm:$0xff] %v6800_v63  ;;  %8305 = vst [vmem:[#allocation38_spill] sm:$0xff] %v6802_v0  ;;  %v1469_v19 = vadd.f32 %v1453_v2, %v1337_v59  ;;  %v1472_v5 = vadd.f32 %v1456_v41, %v1340_v31  ;;  %v1584_v9 = vmul.f32 %v6618_v46, %v8306_v7  ;;  %3292 = vperm.xlu1 %4800, %v8307_v47   ;;  %v6813_v44 = vld [vmem:[%s5070_s9 + $0x429] sm:$0xff]  ;;  %v6816_v0 = vld [vmem:[%s5070_s9 + $0x421] sm:$0xff] }
 0x2fb   : > { %3287 = vperm.xlu0 %4799, %v8308_v60   ;;  %v1471_v38 = vadd.f32 %v1455_v51, %v1339_v34  ;;  %v1474_v30 = vadd.f32 %v1458_v3, %v1342_v18  ;;  %v1583_v49 = vmul.f32 %v6618_v46, %v8309_v32  ;;  %v1586_v1 = vmul.f32 %v6618_v46, %v8310_v29  ;;  %v8313_v41 = vld [vmem:[#allocation137_spill] sm:$0xff]  ;;  %v8314_v34 = vld [vmem:[#allocation138_spill] sm:$0xff]  ;;  %v8315_v51 = vld [vmem:[#allocation139_spill] sm:$0xff] }
 0x2fc   : > { %8311 = vst [vmem:[#allocation39_spill] sm:$0xff] %v6813_v44  ;;  %8312 = vst [vmem:[#allocation40_spill] sm:$0xff] %v6816_v0  ;;  %v1473_v59 = vadd.f32 %v1457_v8, %v1341_v26  ;;  %v1476_v31 = vadd.f32 %v1460_v13, %v1344_v14  ;;  %v1475_v2 = vadd.f32 %v1459_v54, %v1343_v36  ;;  %v8319_v14 = vld [vmem:[#allocation284_spill] sm:$0xff]  ;;  %v8320_v13 = vld [vmem:[#allocation141_spill] sm:$0xff] }
 0x2fd   : > { %v1585_v7 = vmul.f32 %v6618_v46, %v8313_v41  ;;  %v1478_v47 = vadd.f32 %v1462_v4, %v1346_v24  ;;  %v1477_v60 = vadd.f32 %v1461_v61, %v1345_v43  ;;  %v1588_v18 = vmul.f32 %v6618_v46, %v8314_v34  ;;  %v6824_v32 = vpop.permute.xlu1 %2834  ;;  %v6826_v29 = vpop.permute.xlu0 %2829  ;;  %v8321_v54 = vld [vmem:[#allocation142_spill] sm:$0xff]  ;;  %v8323_v61 = vld [vmem:[#allocation144_spill] sm:$0xff]  ;;  %v8324_v34 = vld [vmem:[#allocation145_spill] sm:$0xff] }
 0x2fe   : > { %v1587_v3 = vmul.f32 %v6618_v46, %v8315_v51  ;;  %8316 = vst [vmem:[#allocation41_spill] sm:$0xff] %v6824_v32  ;;  %8317 = vst [vmem:[#allocation42_spill] sm:$0xff] %v6826_v29  ;;  %v1600_v63 = vadd.f32 %v1584_v9, %v1464_v6  ;;  %v1590_v26 = vmul.f32 %v6618_v46, %v8318_v58  ;;  %3302 = vperm.xlu1 %4800, %v6813_v44   ;;  %v8322_v6 = vld [vmem:[#allocation143_spill] sm:$0xff]  ;;  %v8335_v32 = vld [vmem:[#allocation152_spill] sm:$0xff] }
 0x2ff   : > { %v6832_v36 = vrot.slane %v6552_v52, %v8319_v14  ;;  %3297 = vperm.xlu0 %4799, %v6816_v0   ;;  %v1599_v24 = vadd.f32 %v1583_v49, %v1463_v28  ;;  %v1602_v43 = vadd.f32 %v1586_v1, %v1466_v50  ;;  %v1589_v8 = vmul.f32 %v6618_v46, %v8320_v13  ;;  %v8325_v28 = vld [vmem:[#allocation146_spill] sm:$0xff]  ;;  %v8326_v49 = vld [vmem:[#allocation147_spill] sm:$0xff] }
 0x300   : > { %v1592_v4 = vmul.f32 %v6618_v46, %v8321_v54  ;;  %v1601_v9 = vadd.f32 %v1585_v7, %v1465_v17  ;;  %v1591_v58 = vmul.f32 %v6618_v46, %v8322_v6  ;;  %v1594_v41 = vmul.f32 %v6618_v46, %v8323_v61  ;;  %v8329_v54 = vld [vmem:[#allocation148_spill] sm:$0xff]  ;;  %v8330_v61 = vld [vmem:[#allocation149_spill] sm:$0xff] }
 0x301   : > { %v1593_v51 = vmul.f32 %v6618_v46, %v8324_v34  ;;  %v1604_v44 = vadd.f32 %v1588_v18, %v1468_v25  ;;  %v1603_v0 = vadd.f32 %v1587_v3, %v1467_v45  ;;  %v1596_v50 = vmul.f32 %v6618_v46, %v8325_v28  ;;  %v6850_v13 = vpop.permute.xlu1 %2844  ;;  %v6852_v17 = vpop.permute.xlu0 %2839  ;;  %v8331_v34 = vld [vmem:[#allocation263_spill] sm:$0xff]  ;;  %v8332_v25 = vld [vmem:[#allocation264_spill] sm:$0xff]  ;;  %v8333_v3 = vld [vmem:[#allocation150_spill] sm:$0xff] }
 0x302   : > { %v1595_v1 = vmul.f32 %v6618_v46, %v8326_v49  ;;  %8327 = vst [vmem:[#allocation43_spill] sm:$0xff] %v6850_v13  ;;  %8328 = vst [vmem:[#allocation44_spill] sm:$0xff] %v6852_v17  ;;  %v1606_v7 = vadd.f32 %v1590_v26, %v1470_v16  ;;  %v1598_v6 = vmul.f32 %v6618_v46, %v8329_v54  ;;  %3364 = vperm.xlu1 %4800, %v8331_v34   ;;  %v8334_v49 = vld [vmem:[#allocation151_spill] sm:$0xff] }
 0x303   : > { %v1597_v29 = vmul.f32 %v6618_v46, %v8330_v61  ;;  %3359 = vperm.xlu0 %4799, %v8332_v25   ;;  %v1605_v45 = vadd.f32 %v1589_v8, %v1469_v19  ;;  %v1608_v18 = vadd.f32 %v1592_v4, %v1472_v5  ;;  %v1716_v28 = vmul.f32 %v6676_v15, %v8333_v3  ;;  %v8336_v61 = vld [vmem:[#allocation153_spill] sm:$0xff]  ;;  %v8337_v25 = vld [vmem:[#allocation154_spill] sm:$0xff] }
 0x304   : > { %v1715_v13 = vmul.f32 %v6676_v15, %v8334_v49  ;;  %v1607_v17 = vadd.f32 %v1591_v58, %v1471_v38  ;;  %v1610_v16 = vadd.f32 %v1594_v41, %v1474_v30  ;;  %v1609_v26 = vadd.f32 %v1593_v51, %v1473_v59  ;;  %v8340_v38 = vld [vmem:[#allocation155_spill] sm:$0xff]  ;;  %v8343_v58 = vld [vmem:[#allocation156_spill] sm:$0xff] }
 0x305   : > { %v1718_v54 = vmul.f32 %v6676_v15, %v8335_v32  ;;  %v1612_v48 = vadd.f32 %v1596_v50, %v1476_v31  ;;  %v1611_v46 = vadd.f32 %v1595_v1, %v1475_v2  ;;  %v1717_v34 = vmul.f32 %v6676_v15, %v8336_v61  ;;  %v6870_v5 = vpop.permute.xlu1 %2854  ;;  %v6872_v8 = vpop.permute.xlu0 %2849  ;;  %v8341_v59 = vld [vmem:[#allocation267_spill] sm:$0xff]  ;;  %v8342_v32 = vld [vmem:[#allocation268_spill] sm:$0xff]  ;;  %v8344_v1 = vld [vmem:[#allocation157_spill] sm:$0xff] }
 0x306   : > { %v1720_v19 = vmul.f32 %v6676_v15, %v8337_v25  ;;  %8338 = vst [vmem:[#allocation45_spill] sm:$0xff] %v6870_v5  ;;  %8339 = vst [vmem:[#allocation46_spill] sm:$0xff] %v6872_v8  ;;  %v1614_v4 = vadd.f32 %v1598_v6, %v1478_v47  ;;  %v1613_v3 = vadd.f32 %v1597_v29, %v1477_v60  ;;  %3374 = vperm.xlu1 %4800, %v8341_v59   ;;  %v8345_v60 = vld [vmem:[#allocation158_spill] sm:$0xff]  ;;  %v8346_v6 = vld [vmem:[#allocation159_spill] sm:$0xff] }
 0x307   : > { %v1719_v30 = vmul.f32 %v6676_v15, %v8340_v38  ;;  %3369 = vperm.xlu0 %4799, %v8342_v32   ;;  %v1732_v31 = vadd.f32 %v1716_v28, %v1600_v63  ;;  %v1731_v2 = vadd.f32 %v1715_v13, %v1599_v24  ;;  %v1722_v41 = vmul.f32 %v6676_v15, %v8343_v58  ;;  %v8347_v24 = vld [vmem:[#allocation160_spill] sm:$0xff]  ;;  %v8348_v28 = vld [vmem:[#allocation161_spill] sm:$0xff]  ;;  %v8351_v59 = vld [vmem:[#allocation162_spill] sm:$0xff] }
 0x308   : > { %v6882_v51 = vrot.slane %v6552_v52, %v6444_v22  ;;  %v1734_v50 = vadd.f32 %v1718_v54, %v1602_v43  ;;  %v1721_v47 = vmul.f32 %v6676_v15, %v8344_v1  ;;  %v1724_v29 = vmul.f32 %v6676_v15, %v8345_v60  ;;  %v8352_v58 = vld [vmem:[#allocation163_spill] sm:$0xff]  ;;  %v8353_v60 = vld [vmem:[#allocation273_spill] sm:$0xff]  ;;  %v8359_v5 = vld [vmem:[#allocation168_spill] sm:$0xff] }
 0x309   : > { %v1723_v49 = vmul.f32 %v6676_v15, %v8346_v6  ;;  %v1733_v61 = vadd.f32 %v1717_v34, %v1601_v9  ;;  %v1736_v63 = vadd.f32 %v1720_v19, %v1604_v44  ;;  %v1726_v13 = vmul.f32 %v6676_v15, %v8347_v24  ;;  %v6894_v38 = vpop.permute.xlu1 %2864  ;;  %v6896_v43 = vpop.permute.xlu0 %2859  ;;  %v8354_v44 = vld [vmem:[#allocation274_spill] sm:$0xff]  ;;  %v8355_v34 = vld [vmem:[#allocation164_spill] sm:$0xff]  ;;  %v8356_v6 = vld [vmem:[#allocation165_spill] sm:$0xff] }
 0x30a   : > { %v1725_v25 = vmul.f32 %v6676_v15, %v8348_v28  ;;  %8349 = vst [vmem:[#allocation47_spill] sm:$0xff] %v6894_v38  ;;  %8350 = vst [vmem:[#allocation48_spill] sm:$0xff] %v6896_v43  ;;  %v1735_v54 = vadd.f32 %v1719_v30, %v1603_v0  ;;  %v1728_v32 = vmul.f32 %v6676_v15, %v8351_v59  ;;  %3384 = vperm.xlu1 %4800, %v8353_v60   ;;  %v8357_v28 = vld [vmem:[#allocation166_spill] sm:$0xff]  ;;  %v8358_v38 = vld [vmem:[#allocation167_spill] sm:$0xff] }
 0x30b   : > { %v1727_v1 = vmul.f32 %v6676_v15, %v8352_v58  ;;  %3379 = vperm.xlu0 %4799, %v8354_v44   ;;  %v1738_v9 = vadd.f32 %v1722_v41, %v1606_v7  ;;  %v1730_v19 = vmul.f32 %v6676_v15, %v8355_v34  ;;  %v1729_v24 = vmul.f32 %v6676_v15, %v8356_v6  ;;  %v8360_v41 = vld [vmem:[#allocation169_spill] sm:$0xff] }
 0x30c   : > { %v1848_v0 = vmul.f32 %v6724_v40, %v8357_v28  ;;  %v1737_v30 = vadd.f32 %v1721_v47, %v1605_v45  ;;  %v1740_v43 = vadd.f32 %v1724_v29, %v1608_v18  ;;  %v1739_v59 = vadd.f32 %v1723_v49, %v1607_v17  ;;  %v8363_v45 = vld [vmem:[#allocation170_spill] sm:$0xff]  ;;  %v8364_v18 = vld [vmem:[#allocation280_spill] sm:$0xff]  ;;  %v8365_v47 = vld [vmem:[#allocation281_spill] sm:$0xff] }
 0x30d   : > { %v1847_v58 = vmul.f32 %v6724_v40, %v8358_v38  ;;  %v1742_v8 = vadd.f32 %v1726_v13, %v1610_v16  ;;  %v1741_v60 = vadd.f32 %v1725_v25, %v1609_v26  ;;  %v1850_v7 = vmul.f32 %v6724_v40, %v8359_v5  ;;  %v6916_v34 = vpop.permute.xlu1 %2874  ;;  %v6918_v15 = vpop.permute.xlu0 %2869  ;;  %v8366_v13 = vld [vmem:[#allocation171_spill] sm:$0xff]  ;;  %v8368_v38 = vld [vmem:[#allocation173_spill] sm:$0xff] }
 0x30e   : > { %v1849_v44 = vmul.f32 %v6724_v40, %v8360_v41  ;;  %8361 = vst [vmem:[#allocation49_spill] sm:$0xff] %v6916_v34  ;;  %8362 = vst [vmem:[#allocation50_spill] sm:$0xff] %v6918_v15  ;;  %v1744_v6 = vadd.f32 %v1728_v32, %v1612_v48  ;;  %v1743_v28 = vadd.f32 %v1727_v1, %v1611_v46  ;;  %3394 = vperm.xlu1 %4800, %v8364_v18   ;;  %v8367_v48 = vld [vmem:[#allocation172_spill] sm:$0xff] }
 0x30f   : > { %v1852_v17 = vmul.f32 %v6724_v40, %v8363_v45  ;;  %3389 = vperm.xlu0 %4799, %v8365_v47   ;;  %v1746_v16 = vadd.f32 %v1730_v19, %v1614_v4  ;;  %v1745_v26 = vadd.f32 %v1729_v24, %v1613_v3  ;;  %v1864_v29 = vadd.f32 %v1848_v0, %v1732_v31  ;;  %v8369_v45 = vld [vmem:[#allocation174_spill] sm:$0xff]  ;;  %v8370_v3 = vld [vmem:[#allocation175_spill] sm:$0xff]  ;;  %v8373_v24 = vld [vmem:[#allocation176_spill] sm:$0xff] }
 0x310   : > { %v6926_v5 = vrot.slane %v6552_v52, %v6495_v23  ;;  %v1863_v49 = vadd.f32 %v1847_v58, %v1731_v2  ;;  %v1851_v25 = vmul.f32 %v6724_v40, %v8366_v13  ;;  %v1854_v46 = vmul.f32 %v6724_v40, %v8367_v48  ;;  %v8374_v58 = vld [vmem:[#allocation177_spill] sm:$0xff]  ;;  %v8379_v48 = vld [vmem:[#allocation180_spill] sm:$0xff] }
 0x311   : > { %v1853_v32 = vmul.f32 %v6724_v40, %v8368_v38  ;;  %v1866_v1 = vadd.f32 %v1850_v7, %v1734_v50  ;;  %v1865_v41 = vadd.f32 %v1849_v44, %v1733_v61  ;;  %v1856_v4 = vmul.f32 %v6724_v40, %v8369_v45  ;;  %v6938_v52 = vpop.permute.xlu1 %2884  ;;  %v6940_v2 = vpop.permute.xlu0 %2879  ;;  %v8375_v47 = vld [vmem:[#allocation285_spill] sm:$0xff]  ;;  %v8376_v50 = vld [vmem:[#allocation286_spill] sm:$0xff]  ;;  %v8378_v44 = vld [vmem:[#allocation179_spill] sm:$0xff] }
 0x312   : > { %v1855_v31 = vmul.f32 %v6724_v40, %v8370_v3  ;;  %8371 = vst [vmem:[#allocation51_spill] sm:$0xff] %v6938_v52  ;;  %8372 = vst [vmem:[#allocation52_spill] sm:$0xff] %v6940_v2  ;;  %v1868_v19 = vadd.f32 %v1852_v17, %v1736_v63  ;;  %v1858_v0 = vmul.f32 %v6724_v40, %v8373_v24  ;;  %3404 = vperm.xlu1 %4800, %v8375_v47   ;;  %v8377_v61 = vld [vmem:[#allocation178_spill] sm:$0xff]  ;;  %v8380_v63 = vld [vmem:[#allocation181_spill] sm:$0xff] }
 0x313   : > { %v1857_v18 = vmul.f32 %v6724_v40, %v8374_v58  ;;  %3399 = vperm.xlu0 %4799, %v8376_v50   ;;  %v1860_v7 = vmul.f32 %v6724_v40, %v8377_v61  ;;  %v1859_v13 = vmul.f32 %v6724_v40, %v8378_v44  ;;  %v1862_v38 = vmul.f32 %v6724_v40, %v8379_v48  ;;  %v8381_v58 = vld [vmem:[#allocation182_spill] sm:$0xff]  ;;  %v8382_v2 = vld [vmem:[#allocation183_spill] sm:$0xff]  ;;  %v8383_v52 = vld [vmem:[#allocation184_spill] sm:$0xff] }
 0x314   : > { %v1861_v17 = vmul.f32 %v6724_v40, %v8380_v63  ;;  %v1867_v45 = vadd.f32 %v1851_v25, %v1735_v54  ;;  %v1870_v3 = vadd.f32 %v1854_v46, %v1738_v9  ;;  %v1869_v24 = vadd.f32 %v1853_v32, %v1737_v30  ;;  %v6965_v48 = vld [vmem:[%s7801_s1 + $0x10] sm:$0xff]  ;;  %v8386_v25 = vld [vmem:[#allocation185_spill] sm:$0xff] }
 0x315   : > { %v1982_v47 = vmul.f32 %v6774_v10, %v8381_v58  ;;  %v1872_v23 = vadd.f32 %v1856_v4, %v1740_v43  ;;  %v1871_v50 = vadd.f32 %v1855_v31, %v1739_v59  ;;  %v1981_v61 = vmul.f32 %v6774_v10, %v8382_v2  ;;  %v6967_v40 = vpop.permute.xlu1 %2894  ;;  %v6969_v54 = vpop.permute.xlu0 %2889  ;;  %v8387_v59 = vld [vmem:[#allocation6_spill] sm:$0xff]  ;;  %v8389_v58 = vld [vmem:[#allocation187_spill] sm:$0xff] }
 0x316   : > { %v1984_v44 = vmul.f32 %v6774_v10, %v8383_v52  ;;  %8384 = vst [vmem:[#allocation53_spill] sm:$0xff] %v6967_v40  ;;  %8385 = vst [vmem:[#allocation54_spill] sm:$0xff] %v6969_v54  ;;  %v1874_v9 = vadd.f32 %v1858_v0, %v1742_v8  ;;  %v1873_v30 = vadd.f32 %v1857_v18, %v1741_v60  ;;  %3414 = vperm.xlu1 %4800, %v6415_v27   ;;  %v8388_v2 = vld [vmem:[#allocation186_spill] sm:$0xff]  ;;  %v8390_v0 = vld [vmem:[#allocation188_spill] sm:$0xff] }
 0x317   : > { %v1983_v43 = vmul.f32 %v6774_v10, %v8386_v25  ;;  %3409 = vperm.xlu0 %4799, %v8387_v59   ;;  %v1876_v46 = vadd.f32 %v1860_v7, %v1744_v6  ;;  %v1875_v32 = vadd.f32 %v1859_v13, %v1743_v28  ;;  %v1878_v4 = vadd.f32 %v1862_v38, %v1746_v16  ;;  %v8391_v28 = vld [vmem:[#allocation189_spill] sm:$0xff]  ;;  %v8392_v7 = vld [vmem:[#allocation190_spill] sm:$0xff]  ;;  %v8393_v38 = vld [vmem:[#allocation191_spill] sm:$0xff] }
 0x318   : > { %v1877_v31 = vadd.f32 %v1861_v17, %v1745_v26  ;;  %v1998_v52 = vadd.f32 %v1982_v47, %v1864_v29  ;;  %v1986_v63 = vmul.f32 %v6774_v10, %v8388_v2  ;;  %v1985_v54 = vmul.f32 %v6774_v10, %v8389_v58  ;;  %v8397_v25 = vld [vmem:[#allocation194_spill] sm:$0xff]  ;;  %v7006_v2 = vld [vmem:[%s5070_s9 + $0x42a] sm:$0xff] }
 0x319   : > { %v6981_v8 = vrot.slane %v6965_v48, %v6307_v39  ;;  %v1997_v60 = vadd.f32 %v1981_v61, %v1863_v49  ;;  %v2000_v27 = vadd.f32 %v1984_v44, %v1866_v1  ;;  %v1988_v6 = vmul.f32 %v6774_v10, %v8390_v0  ;;  %v6987_v26 = vpop.permute.xlu1 %2904  ;;  %v6989_v29 = vpop.permute.xlu0 %2899  ;;  %v8394_v49 = vld [vmem:[#allocation8_spill] sm:$0xff]  ;;  %v8396_v61 = vld [vmem:[#allocation193_spill] sm:$0xff]  ;;  %8399 = vst [vmem:[#allocation55_spill] sm:$0xff] %v7006_v2  ;;  %v7009_v58 = vld [vmem:[%s5070_s9 + $0x422] sm:$0xff] }
 0x31a   : > { %v1987_v16 = vmul.f32 %v6774_v10, %v8391_v28  ;;  %v1999_v18 = vadd.f32 %v1983_v43, %v1865_v41  ;;  %v1990_v13 = vmul.f32 %v6774_v10, %v8392_v7  ;;  %v1989_v17 = vmul.f32 %v6774_v10, %v8393_v38  ;;  %3424 = vperm.xlu1 %4800, %v6436_v37   ;;  %v8395_v1 = vld [vmem:[#allocation192_spill] sm:$0xff]  ;;  %v8398_v41 = vld [vmem:[#allocation195_spill] sm:$0xff]  ;;  %v8402_v38 = vld [vmem:[#allocation197_spill] sm:$0xff] }
 0x31b   : > { %3419 = vperm.xlu0 %4799, %v8394_v49   ;;  %v1992_v47 = vmul.f32 %v6774_v10, %v8395_v1  ;;  %v1991_v44 = vmul.f32 %v6774_v10, %v8396_v61  ;;  %v1994_v59 = vmul.f32 %v6774_v10, %v8397_v25  ;;  %v1993_v43 = vmul.f32 %v6774_v10, %v8398_v41  ;;  %v8401_v28 = vld [vmem:[#allocation196_spill] sm:$0xff]  ;;  %v8403_v39 = vld [vmem:[#allocation198_spill] sm:$0xff]  ;;  %v8404_v40 = vld [vmem:[#allocation199_spill] sm:$0xff] }
 0x31c   : > { %8400 = vst [vmem:[#allocation56_spill] sm:$0xff] %v7009_v58  ;;  %v2002_v0 = vadd.f32 %v1986_v63, %v1868_v19  ;;  %v2001_v37 = vadd.f32 %v1985_v54, %v1867_v45  ;;  %v1996_v7 = vmul.f32 %v6774_v10, %v8401_v28  ;;  %v1995_v49 = vmul.f32 %v6774_v10, %v8402_v38  ;;  %v8405_v54 = vld [vmem:[#allocation200_spill] sm:$0xff] }
 0x31d   : > { %v2004_v1 = vadd.f32 %v1988_v6, %v1870_v3  ;;  %v2003_v61 = vadd.f32 %v1987_v16, %v1869_v24  ;;  %v2114_v25 = vmul.f32 %v6832_v36, %v8403_v39  ;;  %v2113_v41 = vmul.f32 %v6832_v36, %v8404_v40  ;;  %v7019_v15 = vpop.permute.xlu1 %2966  ;;  %v7021_v34 = vpop.permute.xlu0 %2961  ;;  %v8406_v16 = vld [vmem:[#allocation201_spill] sm:$0xff] }
 0x31e   : > { %v2006_v19 = vadd.f32 %v1990_v13, %v1872_v23  ;;  %v2005_v45 = vadd.f32 %v1989_v17, %v1871_v50  ;;  %v2116_v63 = vmul.f32 %v6832_v36, %v8405_v54  ;;  %3434 = vperm.xlu1 %4800, %v7006_v2   ;;  %v2008_v10 = vadd.f32 %v1992_v47, %v1874_v9  ;;  %v8407_v17 = vld [vmem:[#allocation202_spill] sm:$0xff]  ;;  %v8408_v9 = vld [vmem:[#allocation203_spill] sm:$0xff]  ;;  %v8416_v54 = vld [vmem:[#allocation209_spill] sm:$0xff] }
 0x31f   : > { %3429 = vperm.xlu0 %4799, %v7009_v58   ;;  %v2007_v3 = vadd.f32 %v1991_v44, %v1873_v30  ;;  %v2010_v39 = vadd.f32 %v1994_v59, %v1876_v46  ;;  %v2009_v24 = vadd.f32 %v1993_v43, %v1875_v32  ;;  %v2012_v40 = vadd.f32 %v1996_v7, %v1878_v4  ;;  %v8412_v44 = vld [vmem:[#allocation205_spill] sm:$0xff] }
 0x320   : > { %v2011_v6 = vadd.f32 %v1995_v49, %v1877_v31  ;;  %v2115_v28 = vmul.f32 %v6832_v36, %v8406_v16  ;;  %v7031_v23 = vrot.slane %v6965_v48, %v6321_v42  ;;  %v2130_v50 = vadd.f32 %v2114_v25, %v1998_v52  ;;  %v8411_v31 = vld [vmem:[#allocation204_spill] sm:$0xff]  ;;  %v4801_v43 = vld [vmem:[%s5070_s9 + $0x398] sm:$0xff]  ;;  %v8414_v49 = vld [vmem:[#allocation207_spill] sm:$0xff] }
 0x321   : > { %v2129_v13 = vadd.f32 %v2113_v41, %v1997_v60  ;;  %v2118_v38 = vmul.f32 %v6832_v36, %v8407_v17  ;;  %v2117_v30 = vmul.f32 %v6832_v36, %v8408_v9  ;;  %v7037_v46 = vpop.permute.xlu1 %2976  ;;  %v7039_v32 = vpop.permute.xlu0 %2971  ;;  %v2132_v4 = vadd.f32 %v2116_v63, %v2000_v27  ;;  %v4802_v52 = vld [vmem:[%s5070_s9 + $0x390] sm:$0xff]  ;;  %v8413_v60 = vld [vmem:[#allocation206_spill] sm:$0xff]  ;;  %v8420_v42 = vld [vmem:[#allocation213_spill] sm:$0xff] }
 0x322   : > { %8409 = vst [vmem:[#allocation57_spill] sm:$0xff] %v7037_v46  ;;  %8410 = vst [vmem:[#allocation58_spill] sm:$0xff] %v7039_v32  ;;  %v2120_v47 = vmul.f32 %v6832_v36, %v8411_v31  ;;  %v2119_v59 = vmul.f32 %v6832_v36, %v8412_v44  ;;  %3498 = vperm.xlu1 %4800, %v4801_v43   ;;  %v2122_v7 = vmul.f32 %v6832_v36, %v8413_v60  ;;  %v8415_v41 = vld [vmem:[#allocation208_spill] sm:$0xff]  ;;  %v8417_v17 = vld [vmem:[#allocation210_spill] sm:$0xff] }
 0x323   : > { %3493 = vperm.xlu0 %4799, %v4802_v52   ;;  %v2121_v25 = vmul.f32 %v6832_v36, %v8414_v49  ;;  %v2124_v27 = vmul.f32 %v6832_v36, %v8415_v41  ;;  %v2123_v63 = vmul.f32 %v6832_v36, %v8416_v54  ;;  %v2131_v16 = vadd.f32 %v2115_v28, %v1999_v18  ;;  %v8418_v31 = vld [vmem:[#allocation211_spill] sm:$0xff]  ;;  %v8419_v43 = vld [vmem:[#allocation212_spill] sm:$0xff]  ;;  %v8421_v41 = vld [vmem:[#allocation214_spill] sm:$0xff] }
 0x324   : > { %v2126_v9 = vmul.f32 %v6832_v36, %v8417_v17  ;;  %v2125_v44 = vmul.f32 %v6832_v36, %v8418_v31  ;;  %v2128_v52 = vmul.f32 %v6832_v36, %v8419_v43  ;;  %v2134_v60 = vadd.f32 %v2118_v38, %v2002_v0  ;;  %v8424_v32 = vld [vmem:[#allocation215_spill] sm:$0xff]  ;;  %v4803_v46 = vld [vmem:[%s5070_s9 + $0x3b0] sm:$0xff] }
 0x325   : > { %v2133_v49 = vadd.f32 %v2117_v30, %v2001_v37  ;;  %v2127_v58 = vmul.f32 %v6832_v36, %v8420_v42  ;;  %v2246_v2 = vmul.f32 %v6882_v51, %v8421_v41  ;;  %v7065_v54 = vpop.permute.xlu1 %2986  ;;  %v7067_v18 = vpop.permute.xlu0 %2981  ;;  %v2136_v28 = vadd.f32 %v2120_v47, %v2004_v1  ;;  %v4804_v43 = vld [vmem:[%s5070_s9 + $0x3a8] sm:$0xff] }
 0x326   : > { %8422 = vst [vmem:[#allocation59_spill] sm:$0xff] %v7065_v54  ;;  %8423 = vst [vmem:[#allocation60_spill] sm:$0xff] %v7067_v18  ;;  %v2135_v17 = vadd.f32 %v2119_v59, %v2003_v61  ;;  %v2245_v31 = vmul.f32 %v6882_v51, %v8424_v32  ;;  %3508 = vperm.xlu1 %4800, %v4803_v46   ;;  %v2138_v0 = vadd.f32 %v2122_v7, %v2006_v19  ;;  %v8425_v54 = vld [vmem:[#allocation216_spill] sm:$0xff]  ;;  %v8426_v59 = vld [vmem:[#allocation217_spill] sm:$0xff] }
 0x327   : > { %3503 = vperm.xlu0 %4799, %v4804_v43   ;;  %v2137_v37 = vadd.f32 %v2121_v25, %v2005_v45  ;;  %v2140_v42 = vadd.f32 %v2124_v27, %v2008_v10  ;;  %v2139_v36 = vadd.f32 %v2123_v63, %v2007_v3  ;;  %v2142_v38 = vadd.f32 %v2126_v9, %v2010_v39  ;;  %v8429_v3 = vld [vmem:[#allocation218_spill] sm:$0xff]  ;;  %v8432_v7 = vld [vmem:[#allocation221_spill] sm:$0xff]  ;;  %v8434_v63 = vld [vmem:[#allocation223_spill] sm:$0xff] }
 0x328   : > { %v2141_v30 = vadd.f32 %v2125_v44, %v2009_v24  ;;  %v2144_v41 = vadd.f32 %v2128_v52, %v2012_v40  ;;  %v2248_v1 = vmul.f32 %v6882_v51, %v8425_v54  ;;  %v2143_v61 = vadd.f32 %v2127_v58, %v2011_v6  ;;  %v8430_v24 = vld [vmem:[#allocation219_spill] sm:$0xff]  ;;  %v8431_v6 = vld [vmem:[#allocation220_spill] sm:$0xff]  ;;  %v8433_v27 = vld [vmem:[#allocation222_spill] sm:$0xff] }
 0x329   : > { %v2262_v47 = vadd.f32 %v2246_v2, %v2130_v50  ;;  %v2247_v32 = vmul.f32 %v6882_v51, %v8426_v59  ;;  %v7079_v46 = vrot.slane %v6965_v48, %v8239_v53  ;;  %v7081_v19 = vpop.permute.xlu1 %2996  ;;  %v7083_v45 = vpop.permute.xlu0 %2991  ;;  %v2261_v10 = vadd.f32 %v2245_v31, %v2129_v13  ;;  %v4805_v58 = vld [vmem:[%s5070_s9 + $0x3c8] sm:$0xff]  ;;  %v4806_v2 = vld [vmem:[%s5070_s9 + $0x3c0] sm:$0xff]  ;;  %v8435_v52 = vld [vmem:[#allocation224_spill] sm:$0xff] }
 0x32a   : > { %8427 = vst [vmem:[#allocation61_spill] sm:$0xff] %v7081_v19  ;;  %8428 = vst [vmem:[#allocation62_spill] sm:$0xff] %v7083_v45  ;;  %v2250_v39 = vmul.f32 %v6882_v51, %v8429_v3  ;;  %v2249_v40 = vmul.f32 %v6882_v51, %v8430_v24  ;;  %3518 = vperm.xlu1 %4800, %v4805_v58   ;;  %v2252_v50 = vmul.f32 %v6882_v51, %v8431_v6  ;;  %v8436_v31 = vld [vmem:[#allocation225_spill] sm:$0xff]  ;;  %v8437_v59 = vld [vmem:[#allocation226_spill] sm:$0xff] }
 0x32b   : > { %3513 = vperm.xlu0 %4799, %v4806_v2   ;;  %v2251_v25 = vmul.f32 %v6882_v51, %v8432_v7  ;;  %v2254_v13 = vmul.f32 %v6882_v51, %v8433_v27  ;;  %v2253_v9 = vmul.f32 %v6882_v51, %v8434_v63  ;;  %v2264_v44 = vadd.f32 %v2248_v1, %v2132_v4  ;;  %v8438_v58 = vld [vmem:[#allocation227_spill] sm:$0xff]  ;;  %v8439_v6 = vld [vmem:[#allocation228_spill] sm:$0xff]  ;;  %v8440_v27 = vld [vmem:[#allocation229_spill] sm:$0xff] }
 0x32c   : > { %v2256_v54 = vmul.f32 %v6882_v51, %v8435_v52  ;;  %v2255_v43 = vmul.f32 %v6882_v51, %v8436_v31  ;;  %v2258_v3 = vmul.f32 %v6882_v51, %v8437_v59  ;;  %v2263_v24 = vadd.f32 %v2247_v32, %v2131_v16  ;;  %v8443_v31 = vld [vmem:[#allocation230_spill] sm:$0xff]  ;;  %v4808_v16 = vld [vmem:[%s5070_s9 + $0x3d8] sm:$0xff]  ;;  %v8444_v18 = vld [vmem:[#allocation231_spill] sm:$0xff] }
 0x32d   : > { %v2257_v2 = vmul.f32 %v6882_v51, %v8438_v58  ;;  %v2260_v7 = vmul.f32 %v6882_v51, %v8439_v6  ;;  %v2259_v63 = vmul.f32 %v6882_v51, %v8440_v27  ;;  %v7111_v4 = vpop.permute.xlu1 %3006  ;;  %v7113_v1 = vpop.permute.xlu0 %3001  ;;  %v2266_v52 = vadd.f32 %v2250_v39, %v2134_v60  ;;  %v4807_v59 = vld [vmem:[%s5070_s9 + $0x3e0] sm:$0xff] }
 0x32e   : > { %8441 = vst [vmem:[#allocation63_spill] sm:$0xff] %v7111_v4  ;;  %8442 = vst [vmem:[#allocation64_spill] sm:$0xff] %v7113_v1  ;;  %v2265_v53 = vadd.f32 %v2249_v40, %v2133_v49  ;;  %v2380_v45 = vmul.f32 %v6926_v5, %v8443_v31  ;;  %3528 = vperm.xlu1 %4800, %v4807_v59   ;;  %v2268_v32 = vadd.f32 %v2252_v50, %v2136_v28  ;;  %v8445_v31 = vld [vmem:[#allocation232_spill] sm:$0xff]  ;;  %v8451_v50 = vld [vmem:[#allocation239_spill] sm:$0xff] }
 0x32f   : > { %3523 = vperm.xlu0 %4799, %v4808_v16   ;;  %v2267_v58 = vadd.f32 %v2251_v25, %v2135_v17  ;;  %v2270_v6 = vadd.f32 %v2254_v13, %v2138_v0  ;;  %v2269_v19 = vadd.f32 %v2253_v9, %v2137_v37  ;;  %v2272_v51 = vadd.f32 %v2256_v54, %v2140_v42  ;;  %v8448_v0 = vld [vmem:[#allocation233_spill] sm:$0xff]  ;;  %v8453_v13 = vld [vmem:[#allocation243_spill] sm:$0xff]  ;;  %v8454_v54 = vld [vmem:[#allocation244_spill] sm:$0xff] }
 0x330   : > { %v2271_v27 = vadd.f32 %v2255_v43, %v2139_v36  ;;  %v2274_v4 = vadd.f32 %v2258_v3, %v2142_v38  ;;  %v2379_v60 = vmul.f32 %v6926_v5, %v8444_v18  ;;  %v2273_v49 = vadd.f32 %v2257_v2, %v2141_v30  ;;  %v4809_v36 = vld [vmem:[%s5070_s9 + $0x3f8] sm:$0xff]  ;;  %v4810_v18 = vld [vmem:[%s5070_s9 + $0x3f0] sm:$0xff]  ;;  %v8449_v38 = vld [vmem:[#allocation235_spill] sm:$0xff] }
 0x331   : > { %v2276_v39 = vadd.f32 %v2260_v7, %v2144_v41  ;;  %v2275_v40 = vadd.f32 %v2259_v63, %v2143_v61  ;;  %v2382_v59 = vmul.f32 %v6926_v5, %v8445_v31  ;;  %v7123_v1 = vpop.permute.xlu1 %3016  ;;  %v7125_v28 = vpop.permute.xlu0 %3011  ;;  %v2396_v17 = vadd.f32 %v2380_v45, %v2262_v47  ;;  %v8450_v41 = vld [vmem:[#allocation236_spill] sm:$0xff]  ;;  %v8455_v3 = vld [vmem:[#allocation247_spill] sm:$0xff] }
 0x332   : > { %8446 = vst [vmem:[#allocation65_spill] sm:$0xff] %v7123_v1  ;;  %8447 = vst [vmem:[#allocation66_spill] sm:$0xff] %v7125_v28  ;;  %v2381_v37 = vmul.f32 %v6926_v5, %v8448_v0  ;;  %v7131_v42 = vrot.slane %v6965_v48, %v8264_v12  ;;  %3538 = vperm.xlu1 %4800, %v4809_v36   ;;  %v2384_v30 = vmul.f32 %v6926_v5, %v8449_v38  ;;  %v8452_v45 = vld [vmem:[#allocation240_spill] sm:$0xff]  ;;  %v8457_v31 = vld [vmem:[#allocation251_spill] sm:$0xff] }
 0x333   : > { %3533 = vperm.xlu0 %4799, %v4810_v18   ;;  %v2383_v61 = vmul.f32 %v6926_v5, %v8450_v41  ;;  %v2386_v47 = vmul.f32 %v6926_v5, %v8451_v50  ;;  %v2385_v25 = vmul.f32 %v6926_v5, %v8452_v45  ;;  %v2395_v12 = vadd.f32 %v2379_v60, %v2261_v10  ;;  %v8456_v63 = vld [vmem:[#allocation248_spill] sm:$0xff]  ;;  %v8461_v41 = vld [vmem:[#allocation255_spill] sm:$0xff] }
 0x334   : > { %v2388_v9 = vmul.f32 %v6926_v5, %v8453_v13  ;;  %v2387_v43 = vmul.f32 %v6926_v5, %v8454_v54  ;;  %v2390_v2 = vmul.f32 %v6926_v5, %v8455_v3  ;;  %v2398_v7 = vadd.f32 %v2382_v59, %v2264_v44  ;;  %v8458_v36 = vld [vmem:[#allocation252_spill] sm:$0xff]  ;;  %v4812_v13 = vld [vmem:[%s5070_s9 + $0x408] sm:$0xff] }
 0x335   : > { %v2389_v16 = vmul.f32 %v6926_v5, %v8456_v63  ;;  %v2392_v0 = vmul.f32 %v6926_v5, %v8457_v31  ;;  %v2391_v18 = vmul.f32 %v6926_v5, %v8458_v36  ;;  %v7155_v10 = vpop.permute.xlu1 %3026  ;;  %v7157_v60 = vpop.permute.xlu0 %3021  ;;  %v2397_v38 = vadd.f32 %v2381_v37, %v2263_v24  ;;  %v8462_v45 = vld [vmem:[#allocation256_spill] sm:$0xff]  ;;  %v8463_v1 = vld [vmem:[#allocation259_spill] sm:$0xff] }
 0x336   : > { %8459 = vst [vmem:[#allocation67_spill] sm:$0xff] %v7155_v10  ;;  %8460 = vst [vmem:[#allocation68_spill] sm:$0xff] %v7157_v60  ;;  %v2394_v50 = vmul.f32 %v6926_v5, %v8461_v41  ;;  %v2393_v44 = vmul.f32 %v6926_v5, %v8462_v45  ;;  %v4811_v59 = vld [vmem:[%s5070_s9 + $0x410] sm:$0xff]  ;;  %v2400_v54 = vadd.f32 %v2384_v30, %v2266_v52  ;;  %v4584_v30 = vld [vmem:[%s5070_s9 + $0x438] sm:$0xff] }
 0x337   : > { %3548 = vperm.xlu1 %4800, %v4811_v59   ;;  %3543 = vperm.xlu0 %4799, %v4812_v13   ;;  %v2399_v3 = vadd.f32 %v2383_v61, %v2265_v53  ;;  %v2402_v63 = vadd.f32 %v2386_v47, %v2268_v32  ;;  %v2401_v31 = vadd.f32 %v2385_v25, %v2267_v58  ;;  %v8464_v5 = vld [vmem:[#allocation260_spill] sm:$0xff]  ;;  %v8465_v58 = vld [vmem:[#allocation261_spill] sm:$0xff]  ;;  %v8469_v47 = vld [vmem:[#allocation270_spill] sm:$0xff] }
 0x338   : > { %v2404_v36 = vadd.f32 %v2388_v9, %v2270_v6  ;;  %v2403_v28 = vadd.f32 %v2387_v43, %v2269_v19  ;;  %v2406_v10 = vadd.f32 %v2390_v2, %v2272_v51  ;;  %v2512_v24 = vmul.f32 %v6981_v8, %v8463_v1  ;;  %v8466_v1 = vld [vmem:[#allocation262_spill] sm:$0xff]  ;;  %v8467_v6 = vld [vmem:[#allocation265_spill] sm:$0xff] }
 0x339   : > { %v2405_v37 = vadd.f32 %v2389_v16, %v2271_v27  ;;  %v2408_v41 = vadd.f32 %v2392_v0, %v2274_v4  ;;  %v2407_v60 = vadd.f32 %v2391_v18, %v2273_v49  ;;  %v2511_v45 = vmul.f32 %v6981_v8, %v8464_v5  ;;  %v7169_v59 = vpop.permute.xlu1 %3036  ;;  %v7171_v52 = vpop.permute.xlu0 %3031  ;;  %v8468_v27 = vld [vmem:[#allocation266_spill] sm:$0xff]  ;;  %v8472_v16 = vld [vmem:[#allocation279_spill] sm:$0xff]  ;;  %v8476_v5 = vld [vmem:[#allocation9_spill] sm:$0xff] }
 0x33a   : > { %v2410_v53 = vadd.f32 %v2394_v50, %v2276_v39  ;;  %v2409_v32 = vadd.f32 %v2393_v44, %v2275_v40  ;;  %v2514_v19 = vmul.f32 %v6981_v8, %v8465_v58  ;;  %v2513_v4 = vmul.f32 %v6981_v8, %v8466_v1  ;;  %v4585_v40 = vld [vmem:[%s5070_s9 + $0x440] sm:$0xff]  ;;  %v8474_v50 = vld [vmem:[#allocation283_spill] sm:$0xff] }
 0x33b   : > { %3558 = vperm.xlu1 %4800, %v6629_v11   ;;  %3553 = vperm.xlu0 %4799, %v6632_v57   ;;  %v2516_v51 = vmul.f32 %v6981_v8, %v8467_v6  ;;  %v2515_v49 = vmul.f32 %v6981_v8, %v8468_v27  ;;  %v7185_v39 = vrot.slane %v6965_v48, %v8290_v33  ;;  %v8470_v57 = vld [vmem:[#allocation271_spill] sm:$0xff]  ;;  %v8471_v9 = vld [vmem:[#allocation278_spill] sm:$0xff] }
 0x33c   : > { %v2528_v61 = vadd.f32 %v2512_v24, %v2396_v17  ;;  %v2518_v11 = vmul.f32 %v6981_v8, %v8469_v47  ;;  %v2517_v25 = vmul.f32 %v6981_v8, %v8470_v57  ;;  %v2520_v43 = vmul.f32 %v6981_v8, %v8471_v9  ;;  %v8473_v18 = vld [vmem:[#allocation282_spill] sm:$0xff]  ;;  %v8478_v47 = vld [vmem:[#allocation7_spill] sm:$0xff] }
 0x33d   : > { %v2527_v2 = vadd.f32 %v2511_v45, %v2395_v12  ;;  %v2519_v0 = vmul.f32 %v6981_v8, %v8472_v16  ;;  %v2522_v33 = vmul.f32 %v6981_v8, %v8473_v18  ;;  %v2521_v44 = vmul.f32 %v6981_v8, %v8474_v50  ;;  %v7201_v17 = vpop.permute.xlu1 %3100  ;;  %v7203_v13 = vpop.permute.xlu0 %3095  ;;  %v8477_v1 = vld [vmem:[#allocation10_spill] sm:$0xff] }
 0x33e   : > { %8475 = vst [vmem:[#allocation69_spill] sm:$0xff] %v7203_v13  ;;  %v2530_v24 = vadd.f32 %v2514_v19, %v2398_v7  ;;  %v2524_v58 = vmul.f32 %v6981_v8, %v8476_v5  ;;  %v2523_v12 = vmul.f32 %v6981_v8, %v8477_v1  ;;  %v2529_v45 = vadd.f32 %v2513_v4, %v2397_v38  ;;  %v8479_v7 = vld [vmem:[#allocation11_spill] sm:$0xff]  ;;  %v8480_v1 = vld [vmem:[#allocation12_spill] sm:$0xff] }
 0x33f   : > { %3568 = vperm.xlu1 %4800, %v4585_v40   ;;  %3563 = vperm.xlu0 %4799, %v4584_v30   ;;  %v2532_v6 = vadd.f32 %v2516_v51, %v2400_v54  ;;  %v2531_v27 = vadd.f32 %v2515_v49, %v2399_v3  ;;  %v2526_v57 = vmul.f32 %v6981_v8, %v8478_v47  ;;  %v8481_v51 = vld [vmem:[#allocation13_spill] sm:$0xff] }
 0x340   : > { %v2534_v9 = vadd.f32 %v2518_v11, %v2402_v63  ;;  %v2533_v16 = vadd.f32 %v2517_v25, %v2401_v31  ;;  %v2536_v18 = vadd.f32 %v2520_v43, %v2404_v36  ;;  %v2525_v19 = vmul.f32 %v6981_v8, %v8479_v7  ;;  %v4813_v31 = vld [vmem:[%s5070_s9 + $0x399] sm:$0xff]  ;;  %v4814_v36 = vld [vmem:[%s5070_s9 + $0x391] sm:$0xff] }
 0x341   : > { %v2535_v50 = vadd.f32 %v2519_v0, %v2403_v28  ;;  %v2538_v5 = vadd.f32 %v2522_v33, %v2406_v10  ;;  %v2537_v13 = vadd.f32 %v2521_v44, %v2405_v37  ;;  %v2644_v40 = vmul.f32 %v7031_v23, %v8480_v1  ;;  %v7215_v38 = vpop.permute.xlu1 %3110  ;;  %v7217_v54 = vpop.permute.xlu0 %3105  ;;  %v8482_v28 = vld [vmem:[#allocation14_spill] sm:$0xff]  ;;  %v8483_v37 = vld [vmem:[#allocation15_spill] sm:$0xff] }
 0x342   : > { %v2540_v3 = vadd.f32 %v2524_v58, %v2408_v41  ;;  %v2539_v4 = vadd.f32 %v2523_v12, %v2407_v60  ;;  %v2643_v63 = vmul.f32 %v7031_v23, %v8481_v51  ;;  %v2542_v8 = vadd.f32 %v2526_v57, %v2410_v53  ;;  %v4815_v58 = vld [vmem:[%s5070_s9 + $0x3b1] sm:$0xff] }
 0x343   : > { %3630 = vperm.xlu1 %4800, %v4813_v31   ;;  %3625 = vperm.xlu0 %4799, %v4814_v36   ;;  %v2646_v10 = vmul.f32 %v7031_v23, %v8482_v28  ;;  %v2645_v49 = vmul.f32 %v7031_v23, %v8483_v37  ;;  %v2648_v30 = vmul.f32 %v7031_v23, %v6497_v35  ;;  %v8489_v28 = vld [vmem:[#allocation22_spill] sm:$0xff] }
 0x344   : > { %v2541_v60 = vadd.f32 %v2525_v19, %v2409_v32  ;;  %v2647_v41 = vmul.f32 %v7031_v23, %v6499_v62  ;;  %v2650_v11 = vmul.f32 %v7031_v23, %v6519_v21  ;;  %v7235_v53 = vrot.slane %v6965_v48, %v8319_v14  ;;  %v8484_v21 = vld [vmem:[#allocation17_spill] sm:$0xff]  ;;  %v8485_v14 = vld [vmem:[#allocation18_spill] sm:$0xff]  ;;  %v8487_v19 = vld [vmem:[#allocation20_spill] sm:$0xff] }
 0x345   : > { %v2660_v25 = vadd.f32 %v2644_v40, %v2528_v61  ;;  %v2649_v43 = vmul.f32 %v7031_v23, %v6521_v56  ;;  %v2652_v0 = vmul.f32 %v7031_v23, %v6543_v55  ;;  %v2651_v35 = vmul.f32 %v7031_v23, %v6545_v20  ;;  %v7243_v32 = vpop.permute.xlu1 %3120  ;;  %v7245_v62 = vpop.permute.xlu0 %3115  ;;  %v4816_v56 = vld [vmem:[%s5070_s9 + $0x3a9] sm:$0xff]  ;;  %v8488_v40 = vld [vmem:[#allocation21_spill] sm:$0xff] }
 0x346   : > { %v2659_v33 = vadd.f32 %v2643_v63, %v2527_v2  ;;  %v2654_v44 = vmul.f32 %v7031_v23, %v8484_v21  ;;  %v2653_v61 = vmul.f32 %v7031_v23, %v8485_v14  ;;  %v2662_v12 = vadd.f32 %v2646_v10, %v2530_v24  ;;  %v8486_v20 = vld [vmem:[#allocation19_spill] sm:$0xff]  ;;  %v8495_v21 = vld [vmem:[#allocation28_spill] sm:$0xff]  ;;  %v8496_v14 = vld [vmem:[#allocation29_spill] sm:$0xff] }
 0x347   : > { %3640 = vperm.xlu1 %4800, %v4815_v58   ;;  %3635 = vperm.xlu0 %4799, %v4816_v56   ;;  %v2661_v55 = vadd.f32 %v2645_v49, %v2529_v45  ;;  %v2664_v47 = vadd.f32 %v2648_v30, %v2532_v6  ;;  %v2656_v57 = vmul.f32 %v7031_v23, %v8486_v20  ;;  %v4817_v49 = vld [vmem:[%s5070_s9 + $0x3c9] sm:$0xff]  ;;  %v4818_v30 = vld [vmem:[%s5070_s9 + $0x3c1] sm:$0xff] }
 0x348   : > { %v2663_v7 = vadd.f32 %v2647_v41, %v2531_v27  ;;  %v2666_v2 = vadd.f32 %v2650_v11, %v2534_v9  ;;  %v2655_v1 = vmul.f32 %v7031_v23, %v8487_v19  ;;  %v2658_v51 = vmul.f32 %v7031_v23, %v8488_v40  ;;  %v8490_v27 = vld [vmem:[#allocation23_spill] sm:$0xff]  ;;  %v8493_v11 = vld [vmem:[#allocation26_spill] sm:$0xff] }
 0x349   : > { %v2665_v63 = vadd.f32 %v2649_v43, %v2533_v16  ;;  %v2668_v31 = vadd.f32 %v2652_v0, %v2536_v18  ;;  %v2667_v36 = vadd.f32 %v2651_v35, %v2535_v50  ;;  %v2657_v24 = vmul.f32 %v7031_v23, %v8489_v28  ;;  %v7261_v45 = vpop.permute.xlu1 %3130  ;;  %v7263_v6 = vpop.permute.xlu0 %3125  ;;  %v8491_v16 = vld [vmem:[#allocation24_spill] sm:$0xff]  ;;  %v8492_v50 = vld [vmem:[#allocation25_spill] sm:$0xff]  ;;  %v8494_v0 = vld [vmem:[#allocation27_spill] sm:$0xff] }
 0x34a   : > { %v2670_v10 = vadd.f32 %v2654_v44, %v2538_v5  ;;  %v2669_v37 = vadd.f32 %v2653_v61, %v2537_v13  ;;  %v2780_v9 = vmul.f32 %v7079_v46, %v8490_v27  ;;  %v2672_v41 = vadd.f32 %v2656_v57, %v2540_v3  ;;  %v8497_v58 = vld [vmem:[#allocation30_spill] sm:$0xff]  ;;  %v8498_v20 = vld [vmem:[#allocation31_spill] sm:$0xff] }
 0x34b   : > { %3650 = vperm.xlu1 %4800, %v4817_v49   ;;  %3645 = vperm.xlu0 %4799, %v4818_v30   ;;  %v2779_v18 = vmul.f32 %v7079_v46, %v8491_v16  ;;  %v2782_v23 = vmul.f32 %v7079_v46, %v8492_v50  ;;  %v2781_v5 = vmul.f32 %v7079_v46, %v8493_v11  ;;  %v8500_v30 = vld [vmem:[#allocation33_spill] sm:$0xff]  ;;  %v8501_v50 = vld [vmem:[#allocation34_spill] sm:$0xff] }
 0x34c   : > { %v7275_v13 = vadd.f32 %v2655_v1, %v2539_v4  ;;  %v2674_v43 = vadd.f32 %v2658_v51, %v2542_v8  ;;  %v2784_v35 = vmul.f32 %v7079_v46, %v8494_v0  ;;  %v2783_v3 = vmul.f32 %v7079_v46, %v8495_v21  ;;  %v8499_v1 = vld [vmem:[#allocation32_spill] sm:$0xff]  ;;  %v4819_v51 = vld [vmem:[%s5070_s9 + $0x3e1] sm:$0xff]  ;;  %v8502_v0 = vld [vmem:[#allocation37_spill] sm:$0xff] }
 0x34d   : > { %v2673_v44 = vadd.f32 %v2657_v24, %v2541_v60  ;;  %v2786_v61 = vmul.f32 %v7079_v46, %v8496_v14  ;;  %v2785_v56 = vmul.f32 %v7079_v46, %v8497_v58  ;;  %v2788_v57 = vmul.f32 %v7079_v46, %v8498_v20  ;;  %v7287_v19 = vpop.permute.xlu1 %3140  ;;  %v7289_v4 = vpop.permute.xlu0 %3135  ;;  %v4820_v60 = vld [vmem:[%s5070_s9 + $0x3d9] sm:$0xff] }
 0x34e   : > { %v2796_v8 = vadd.f32 %v2780_v9, %v2660_v25  ;;  %v2787_v40 = vmul.f32 %v7079_v46, %v8499_v1  ;;  %v7297_v28 = vrot.slane %v6965_v48, %v6444_v22  ;;  %v2795_v24 = vadd.f32 %v2779_v18, %v2659_v33  ;;  %v8507_v1 = vld [vmem:[#allocation43_spill] sm:$0xff] }
 0x34f   : > { %3660 = vperm.xlu1 %4800, %v4819_v51   ;;  %3655 = vperm.xlu0 %4799, %v4820_v60   ;;  %v2798_v27 = vadd.f32 %v2782_v23, %v2662_v12  ;;  %v2797_v49 = vadd.f32 %v2781_v5, %v2661_v55  ;;  %v2790_v16 = vmul.f32 %v7079_v46, %v8500_v30  ;;  %v8503_v12 = vld [vmem:[#allocation38_spill] sm:$0xff]  ;;  %v8508_v51 = vld [vmem:[#allocation44_spill] sm:$0xff]  ;;  %v8509_v30 = vld [vmem:[#allocation45_spill] sm:$0xff] }
 0x350   : > { %v2800_v25 = vadd.f32 %v2784_v35, %v2664_v47  ;;  %v2799_v9 = vadd.f32 %v2783_v3, %v2663_v7  ;;  %v2789_v11 = vmul.f32 %v7079_v46, %v8501_v50  ;;  %v2794_v21 = vmul.f32 %v7079_v46, %v8502_v0  ;;  %v8504_v7 = vld [vmem:[#allocation35_spill] sm:$0xff]  ;;  %v8505_v35 = vld [vmem:[#allocation41_spill] sm:$0xff] }
 0x351   : > { %v7305_v14 = vadd.f32 %v2786_v61, %v2666_v2  ;;  %v7307_v22 = vadd.f32 %v2785_v56, %v2665_v63  ;;  %v7309_v33 = vadd.f32 %v2788_v57, %v2668_v31  ;;  %v2793_v55 = vmul.f32 %v7079_v46, %v8503_v12  ;;  %v7313_v18 = vpop.permute.xlu1 %3150  ;;  %v7315_v23 = vpop.permute.xlu0 %3145  ;;  %v4821_v3 = vld [vmem:[%s5070_s9 + $0x3f9] sm:$0xff]  ;;  %v4822_v63 = vld [vmem:[%s5070_s9 + $0x3f1] sm:$0xff]  ;;  %v4824_v12 = vld [vmem:[%s5070_s9 + $0x409] sm:$0xff] }
 0x352   : > { %v7317_v47 = vadd.f32 %v2787_v40, %v2667_v36  ;;  %v2792_v5 = vmul.f32 %v7079_v46, %v8504_v7  ;;  %v2912_v2 = vmul.f32 %v7131_v42, %v8505_v35  ;;  %v7325_v31 = vadd.f32 %v2790_v16, %v2670_v10  ;;  %v8506_v61 = vld [vmem:[#allocation42_spill] sm:$0xff] }
 0x353   : > { %3670 = vperm.xlu1 %4800, %v4821_v3   ;;  %3665 = vperm.xlu0 %4799, %v4822_v63   ;;  %v2911_v58 = vmul.f32 %v7131_v42, %v8506_v61  ;;  %v2926_v36 = vmul.f32 %v7131_v42, %v6987_v26  ;;  %v2925_v56 = vmul.f32 %v7131_v42, %v6989_v29  ;;  %v8511_v63 = vld [vmem:[#allocation46_spill] sm:$0xff] }
 0x354   : > { %v7333_v20 = vadd.f32 %v2789_v11, %v2669_v37  ;;  %v2810_v57 = vadd.f32 %v2794_v21, %v2674_v43  ;;  %v2914_v40 = vmul.f32 %v7131_v42, %v8507_v1  ;;  %v2913_v10 = vmul.f32 %v7131_v42, %v8508_v51  ;;  %v8510_v11 = vld [vmem:[#allocation36_spill] sm:$0xff]  ;;  %v8517_v51 = vld [vmem:[#allocation58_spill] sm:$0xff] }
 0x355   : > { %v2809_v60 = vadd.f32 %v2793_v55, %v2673_v44  ;;  %v2916_v16 = vmul.f32 %v7131_v42, %v8509_v30  ;;  %v3058_v26 = vmul.f32 %v7185_v39, %v7169_v59  ;;  %v3057_v29 = vmul.f32 %v7185_v39, %v7171_v52  ;;  %v7345_v50 = vpop.permute.xlu1 %3160  ;;  %v7347_v37 = vpop.permute.xlu0 %3155  ;;  %v4823_v21 = vld [vmem:[%s5070_s9 + $0x411] sm:$0xff]  ;;  %v4600_v30 = vld [vmem:[%s5070_s9 + $0x439] sm:$0xff] }
 0x356   : > { %v7349_v43 = vadd.f32 %v2792_v5, %v2672_v41  ;;  %v7353_v0 = vmul.f32 %v7079_v46, %v8510_v11  ;;  %v2928_v44 = vadd.f32 %v2912_v2, %v2796_v8  ;;  %v2927_v55 = vadd.f32 %v2911_v58, %v2795_v24 }
 0x357   : > { %3680 = vperm.xlu1 %4800, %v4823_v21   ;;  %3675 = vperm.xlu0 %4799, %v4824_v12   ;;  %v2942_v59 = vadd.f32 %v2926_v36, %v2810_v57  ;;  %v2941_v7 = vadd.f32 %v2925_v56, %v2809_v60  ;;  %v3044_v52 = vmul.f32 %v7185_v39, %v7019_v15  ;;  %v8512_v36 = vld [vmem:[#allocation69_spill] sm:$0xff]  ;;  %v8513_v56 = vld [vmem:[#allocation39_spill] sm:$0xff]  ;;  %v8518_v21 = vld [vmem:[#allocation48_spill] sm:$0xff] }
 0x358   : > { %v2930_v35 = vadd.f32 %v2914_v40, %v2798_v27  ;;  %v2929_v3 = vadd.f32 %v2913_v10, %v2797_v49  ;;  %v2915_v41 = vmul.f32 %v7131_v42, %v8511_v63  ;;  %v3043_v46 = vmul.f32 %v7185_v39, %v7021_v34  ;;  %v8514_v34 = vld [vmem:[#allocation40_spill] sm:$0xff]  ;;  %v8516_v40 = vld [vmem:[#allocation57_spill] sm:$0xff]  ;;  %v4601_v60 = vld [vmem:[%s5070_s9 + $0x441] sm:$0xff] }
 0x359   : > { %v2932_v8 = vadd.f32 %v2916_v16, %v2800_v25  ;;  %v3074_v5 = vadd.f32 %v3058_v26, %v2942_v59  ;;  %v3073_v2 = vadd.f32 %v3057_v29, %v2941_v7  ;;  %v3178_v24 = vmul.f32 %v7235_v53, %v7201_v17  ;;  %v3171_v61 = vpop.permute.xlu1 %3170  ;;  %v3166_v58 = vpop.permute.xlu0 %3165  ;;  %v8515_v25 = vld [vmem:[#allocation47_spill] sm:$0xff] }
 0x35a   : > { %v3177_v15 = vmul.f32 %v7235_v53, %v8512_v36  ;;  %v3192_v27 = vmul.f32 %v7235_v53, %v3171_v61  ;;  %v3191_v49 = vmul.f32 %v7235_v53, %v3166_v58  ;;  %v2918_v57 = vmul.f32 %v7131_v42, %v8515_v25  ;;  %v8521_v58 = vld [vmem:[#allocation60_spill] sm:$0xff] }
 0x35b   : > { %3690 = vperm.xlu1 %4800, %v8513_v56   ;;  %3685 = vperm.xlu0 %4799, %v8514_v34   ;;  %v3060_v1 = vadd.f32 %v3044_v52, %v2928_v44  ;;  %v3046_v17 = vmul.f32 %v7185_v39, %v8516_v40  ;;  %v3045_v10 = vmul.f32 %v7185_v39, %v8517_v51  ;;  %v4825_v40 = vld [vmem:[%s5070_s9 + $0x39a] sm:$0xff] }
 0x35c   : > { %v2931_v16 = vadd.f32 %v2915_v41, %v2799_v9  ;;  %v3059_v26 = vadd.f32 %v3043_v46, %v2927_v55  ;;  %v7379_v29 = vadd.f32 %v3192_v27, %v3074_v5  ;;  %v7381_v11 = vadd.f32 %v3191_v49, %v3073_v2  ;;  %v8519_v2 = vld [vmem:[#allocation59_spill] sm:$0xff]  ;;  %v8522_v51 = vld [vmem:[#allocation50_spill] sm:$0xff] }
 0x35d   : > { %v2917_v12 = vmul.f32 %v7131_v42, %v8518_v21  ;;  %v3194_v59 = vadd.f32 %v3178_v24, %v3060_v1  ;;  %v3180_v44 = vmul.f32 %v7235_v53, %v7215_v38  ;;  %v3179_v7 = vmul.f32 %v7235_v53, %v7217_v54  ;;  %v3233_v52 = vpop.permute.xlu1 %3232  ;;  %v3228_v63 = vpop.permute.xlu0 %3227  ;;  %v8520_v24 = vld [vmem:[#allocation49_spill] sm:$0xff] }
 0x35e   : > { %v3193_v61 = vadd.f32 %v3177_v15, %v3059_v26  ;;  %v3310_v9 = vmul.f32 %v7297_v28, %v3233_v52  ;;  %v3309_v55 = vmul.f32 %v7297_v28, %v3228_v63  ;;  %v2934_v41 = vadd.f32 %v2918_v57, %v7305_v14 }
 0x35f   : > { %3700 = vperm.xlu1 %4800, %v4601_v60   ;;  %3695 = vperm.xlu0 %4799, %v4600_v30   ;;  %v3062_v46 = vadd.f32 %v3046_v17, %v2930_v35  ;;  %v3061_v5 = vadd.f32 %v3045_v10, %v2929_v3  ;;  %v3048_v38 = vmul.f32 %v7185_v39, %v8519_v2  ;;  %v4826_v17 = vld [vmem:[%s5070_s9 + $0x392] sm:$0xff]  ;;  %v8524_v30 = vld [vmem:[#allocation62_spill] sm:$0xff] }
 0x360   : > { %v2920_v54 = vmul.f32 %v7131_v42, %v8520_v24  ;;  %v3047_v36 = vmul.f32 %v7185_v39, %v8521_v58  ;;  %v7398_v15 = vadd.f32 %v3310_v9, %v3194_v59  ;;  %v7400_v27 = vadd.f32 %v3309_v55, %v3193_v61  ;;  %v8523_v60 = vld [vmem:[#allocation61_spill] sm:$0xff]  ;;  %v8526_v2 = vld [vmem:[#allocation52_spill] sm:$0xff] }
 0x361   : > { %v2933_v49 = vadd.f32 %v2917_v12, %v7307_v22  ;;  %v3196_v14 = vadd.f32 %v3180_v44, %v3062_v46  ;;  %v3195_v35 = vadd.f32 %v3179_v7, %v3061_v5  ;;  %v3182_v3 = vmul.f32 %v7235_v53, %v7243_v32  ;;  %v3243_v56 = vpop.permute.xlu1 %3242  ;;  %v3238_v34 = vpop.permute.xlu0 %3237  ;;  %v8525_v44 = vld [vmem:[#allocation51_spill] sm:$0xff]  ;;  %v4827_v46 = vld [vmem:[%s5070_s9 + $0x3b2] sm:$0xff] }
 0x362   : > { %v3181_v25 = vmul.f32 %v7235_v53, %v7245_v62  ;;  %v3312_v57 = vmul.f32 %v7297_v28, %v3243_v56  ;;  %v3311_v1 = vmul.f32 %v7297_v28, %v3238_v34  ;;  %v2919_v22 = vmul.f32 %v7131_v42, %v8522_v51  ;;  %v4828_v5 = vld [vmem:[%s5070_s9 + $0x3aa] sm:$0xff]  ;;  %v4830_v51 = vld [vmem:[%s5070_s9 + $0x3c2] sm:$0xff] }
 0x363   : > { %3762 = vperm.xlu1 %4800, %v4825_v40   ;;  %3757 = vperm.xlu0 %4799, %v4826_v17   ;;  %v3064_v10 = vadd.f32 %v3048_v38, %v2932_v8  ;;  %v3050_v32 = vmul.f32 %v7185_v39, %v8523_v60  ;;  %v3049_v26 = vmul.f32 %v7185_v39, %v8524_v30  ;;  %v4829_v17 = vld [vmem:[%s5070_s9 + $0x3ca] sm:$0xff]  ;;  %v8530_v60 = vld [vmem:[#allocation66_spill] sm:$0xff]  ;;  %v8531_v30 = vld [vmem:[#allocation53_spill] sm:$0xff] }
 0x364   : > { %v2936_v62 = vadd.f32 %v2920_v54, %v7309_v33  ;;  %v3063_v21 = vadd.f32 %v3047_v36, %v2931_v16  ;;  %v7418_v12 = vadd.f32 %v3312_v57, %v3196_v14  ;;  %v7420_v59 = vadd.f32 %v3311_v1, %v3195_v35  ;;  %v8527_v54 = vld [vmem:[#allocation63_spill] sm:$0xff]  ;;  %v8528_v36 = vld [vmem:[#allocation64_spill] sm:$0xff] }
 0x365   : > { %v2922_v7 = vmul.f32 %v7131_v42, %v8525_v44  ;;  %v3198_v52 = vadd.f32 %v3182_v3, %v3064_v10  ;;  %v3184_v8 = vmul.f32 %v7235_v53, %v7261_v45  ;;  %v3183_v63 = vmul.f32 %v7235_v53, %v7263_v6  ;;  %v3253_v61 = vpop.permute.xlu1 %3252  ;;  %v3248_v9 = vpop.permute.xlu0 %3247  ;;  %v8529_v10 = vld [vmem:[#allocation65_spill] sm:$0xff] }
 0x366   : > { %v3197_v55 = vadd.f32 %v3181_v25, %v3063_v21  ;;  %v3314_v33 = vmul.f32 %v7297_v28, %v3253_v61  ;;  %v3313_v16 = vmul.f32 %v7297_v28, %v3248_v9  ;;  %v2921_v38 = vmul.f32 %v7131_v42, %v8526_v2  ;;  %v8533_v2 = vld [vmem:[#allocation67_spill] sm:$0xff] }
 0x367   : > { %3772 = vperm.xlu1 %4800, %v4827_v46   ;;  %3767 = vperm.xlu0 %4799, %v4828_v5   ;;  %v3066_v24 = vadd.f32 %v3050_v32, %v2934_v41  ;;  %v3065_v45 = vadd.f32 %v3049_v26, %v2933_v49  ;;  %v3052_v6 = vmul.f32 %v7185_v39, %v8527_v54  ;;  %v4832_v46 = vld [vmem:[%s5070_s9 + $0x3da] sm:$0xff] }
 0x368   : > { %v2935_v58 = vadd.f32 %v2919_v22, %v7317_v47  ;;  %v3051_v14 = vmul.f32 %v7185_v39, %v8528_v36  ;;  %v7439_v35 = vadd.f32 %v3314_v33, %v3198_v52  ;;  %v7441_v3 = vadd.f32 %v3313_v16, %v3197_v55  ;;  %v4831_v16 = vld [vmem:[%s5070_s9 + $0x3e2] sm:$0xff] }
 0x369   : > { %v2938_v56 = vadd.f32 %v2922_v7, %v7325_v31  ;;  %v3200_v34 = vadd.f32 %v3184_v8, %v3066_v24  ;;  %v3199_v25 = vadd.f32 %v3183_v63, %v3065_v45  ;;  %v3186_v41 = vmul.f32 %v7235_v53, %v7287_v19  ;;  %v3263_v49 = vpop.permute.xlu1 %3262  ;;  %v3258_v57 = vpop.permute.xlu0 %3257  ;;  %v8532_v7 = vld [vmem:[#allocation54_spill] sm:$0xff]  ;;  %v8534_v24 = vld [vmem:[#allocation68_spill] sm:$0xff] }
 0x36a   : > { %v3185_v1 = vmul.f32 %v7235_v53, %v7289_v4  ;;  %v3316_v47 = vmul.f32 %v7297_v28, %v3263_v49  ;;  %v3315_v40 = vmul.f32 %v7297_v28, %v3258_v57  ;;  %v2937_v31 = vadd.f32 %v2921_v38, %v7333_v20 }
 0x36b   : > { %3782 = vperm.xlu1 %4800, %v4829_v17   ;;  %3777 = vperm.xlu0 %4799, %v4830_v51   ;;  %v3068_v22 = vadd.f32 %v3052_v6, %v2936_v62  ;;  %v3054_v19 = vmul.f32 %v7185_v39, %v8529_v10  ;;  %v3053_v32 = vmul.f32 %v7185_v39, %v8530_v60 }
 0x36c   : > { %v2924_v4 = vmul.f32 %v7131_v42, %v8531_v30  ;;  %v3067_v26 = vadd.f32 %v3051_v14, %v2935_v58  ;;  %v7459_v21 = vadd.f32 %v3316_v47, %v3200_v34  ;;  %v7461_v44 = vadd.f32 %v3315_v40, %v3199_v25  ;;  %v4833_v25 = vld [vmem:[%s5070_s9 + $0x3fa] sm:$0xff] }
 0x36d   : > { %v2923_v20 = vmul.f32 %v7131_v42, %v8532_v7  ;;  %v3202_v62 = vadd.f32 %v3186_v41, %v3068_v22  ;;  %v3188_v52 = vmul.f32 %v7235_v53, %v7313_v18  ;;  %v3187_v8 = vmul.f32 %v7235_v53, %v7315_v23  ;;  %v3273_v63 = vpop.permute.xlu1 %3272  ;;  %v3268_v61 = vpop.permute.xlu0 %3267  ;;  %v4834_v41 = vld [vmem:[%s5070_s9 + $0x3f2] sm:$0xff]  ;;  %v4836_v22 = vld [vmem:[%s5070_s9 + $0x40a] sm:$0xff] }
 0x36e   : > { %v3201_v9 = vadd.f32 %v3185_v1, %v3067_v26  ;;  %v3318_v55 = vmul.f32 %v7297_v28, %v3273_v63  ;;  %v3317_v33 = vmul.f32 %v7297_v28, %v3268_v61  ;;  %v2807_v42 = vadd.f32 %v7353_v0, %v7275_v13  ;;  %v8535_v26 = vld [vmem:[#allocation55_spill] sm:$0xff]  ;;  %v8536_v7 = vld [vmem:[#allocation56_spill] sm:$0xff] }
 0x36f   : > { %3792 = vperm.xlu1 %4800, %v4831_v16   ;;  %3787 = vperm.xlu0 %4799, %v4832_v46   ;;  %v3070_v5 = vadd.f32 %v3054_v19, %v2938_v56  ;;  %v3069_v18 = vadd.f32 %v3053_v32, %v2937_v31  ;;  %v3056_v23 = vmul.f32 %v7185_v39, %v8533_v2  ;;  %v4835_v31 = vld [vmem:[%s5070_s9 + $0x412] sm:$0xff] }
 0x370   : > { %v2940_v38 = vadd.f32 %v2924_v4, %v7349_v43  ;;  %v3055_v45 = vmul.f32 %v7185_v39, %v8534_v24  ;;  %v7480_v54 = vadd.f32 %v3318_v55, %v3202_v62  ;;  %v7482_v6 = vadd.f32 %v3317_v33, %v3201_v9 }
 0x371   : > { %v2939_v58 = vadd.f32 %v2923_v20, %v2807_v42  ;;  %v3204_v36 = vadd.f32 %v3188_v52, %v3070_v5  ;;  %v3203_v14 = vadd.f32 %v3187_v8, %v3069_v18  ;;  %v3190_v13 = vmul.f32 %v7235_v53, %v7345_v50  ;;  %v3283_v0 = vpop.permute.xlu1 %3282  ;;  %v3278_v56 = vpop.permute.xlu0 %3277  ;;  %v8537_v20 = vld [vmem:[#allocation16_spill] sm:$0xff]  ;;  %v4617_v52 = vld [vmem:[%s5070_s9 + $0x442] sm:$0xff]  ;;  %v4616_v8 = vld [vmem:[%s5070_s9 + $0x43a] sm:$0xff]  ;;  %s7736_s9 = scalar_lea.hbm %s7804_s4, %s4641_s20 }
 0x372   : > { %v3189_v34 = vmul.f32 %v7235_v53, %v7347_v37  ;;  %v3320_v43 = vmul.f32 %v7297_v28, %v3283_v0  ;;  %v3319_v39 = vmul.f32 %v7297_v28, %v3278_v56  ;;  %v3072_v49 = vadd.f32 %v3056_v23, %v2940_v38 }
 0x373   : > { %3802 = vperm.xlu1 %4800, %v4833_v25   ;;  %3797 = vperm.xlu0 %4799, %v4834_v41   ;;  %v3071_v57 = vadd.f32 %v3055_v45, %v2939_v58  ;;  %v3440_v62 = vrot.slane %v6965_v48, %v8537_v20 }
 0x374   : > { %v3336_v1 = vadd.f32 %v3320_v43, %v3204_v36  ;;  %v3335_v47 = vadd.f32 %v3319_v39, %v3203_v14  ;;  %v3206_v50 = vadd.f32 %v3190_v13, %v3072_v49 }
 0x375   : > { %v3293_v40 = vpop.permute.xlu1 %3292  ;;  %v3205_v51 = vadd.f32 %v3189_v34, %v3071_v57 }
 0x376   : > { %v3288_v17 = vpop.permute.xlu0 %3287  ;;  %v3322_v53 = vmul.f32 %v7297_v28, %v3293_v40 }
 0x377   : > { %v3321_v37 = vmul.f32 %v7297_v28, %v3288_v17  ;;  %3812 = vperm.xlu1 %4800, %v4835_v31   ;;  %3807 = vperm.xlu0 %4799, %v4836_v22  }
 0x378   : > { %v3338_v10 = vadd.f32 %v3322_v53, %v3206_v50 }
 0x379   : > { %v3337_v19 = vadd.f32 %v3321_v37, %v3205_v51  ;;  %v3303_v60 = vpop.permute.xlu1 %3302 }
 0x37a   : > { %v3298_v32 = vpop.permute.xlu0 %3297  ;;  %v3324_v30 = vmul.f32 %v7297_v28, %v3303_v60 }
 0x37b   : > { %v3323_v4 = vmul.f32 %v7297_v28, %v3298_v32  ;;  %3822 = vperm.xlu1 %4800, %v8535_v26   ;;  %3817 = vperm.xlu0 %4799, %v8536_v7  }
 0x37c   : > { %v3340_v63 = vadd.f32 %v3324_v30, %v7379_v29 }
 0x37d   : > { %v3339_v61 = vadd.f32 %v3323_v4, %v7381_v11  ;;  %v3365_v9 = vpop.permute.xlu1 %3364 }
 0x37e   : > { %v3360_v55 = vpop.permute.xlu0 %3359  ;;  %v3442_v33 = vmul.f32 %v3440_v62, %v3365_v9 }
 0x37f   : > { %v3441_v16 = vmul.f32 %v3440_v62, %v3360_v55  ;;  %3832 = vperm.xlu1 %4800, %v4617_v52   ;;  %3827 = vperm.xlu0 %4799, %v4616_v8  }
 0x380   : > { %v7507_v28 = vadd.f32 %v3442_v33, %v7398_v15 }
 0x381   : > { %v7510_v46 = vadd.f32 %v3441_v16, %v7400_v27  ;;  %v3375_v42 = vpop.permute.xlu1 %3374 }
 0x382   : > { %v3370_v48 = vpop.permute.xlu0 %3369  ;;  %v3444_v5 = vmul.f32 %v3440_v62, %v3375_v42 }
 0x383   : > { %v3443_v18 = vmul.f32 %v3440_v62, %v3370_v48 }
 0x384   : > { %v7513_v29 = vadd.f32 %v3444_v5, %v7418_v12 }
 0x385   : > { %v7516_v11 = vadd.f32 %v3443_v18, %v7420_v59  ;;  %v3385_v2 = vpop.permute.xlu1 %3384 }
 0x386   : > { %v3380_v23 = vpop.permute.xlu0 %3379  ;;  %v3446_v38 = vmul.f32 %v3440_v62, %v3385_v2 }
 0x387   : > { %v3445_v24 = vmul.f32 %v3440_v62, %v3380_v23 }
 0x388   : > { %v7519_v15 = vadd.f32 %v3446_v38, %v7439_v35  ;;  %v278_v38 = vld [vmem:[%s7801_s1 + $0x18] sm:$0x7] }
 0x389   : > { %v7522_v27 = vadd.f32 %v3445_v24, %v7441_v3  ;;  %v3395_v45 = vpop.permute.xlu1 %3394 }
 0x38a   : > { %v3390_v58 = vpop.permute.xlu0 %3389  ;;  %v3448_v36 = vmul.f32 %v3440_v62, %v3395_v45 }
 0x38b   : > { %v3447_v14 = vmul.f32 %v3440_v62, %v3390_v58  ;;  %v8538_v58 = vld [vmem:[#allocation269_spill] sm:$0xff] }
 0x38c   : > { %v7525_v12 = vadd.f32 %v3448_v36, %v7459_v21  ;;  %v7572_v36 = vrot.slane %v278_v38, %v8538_v58 }
 0x38d   : > { %v7528_v59 = vadd.f32 %v3447_v14, %v7461_v44  ;;  %v3405_v13 = vpop.permute.xlu1 %3404 }
 0x38e   : > { %v3400_v0 = vpop.permute.xlu0 %3399  ;;  %v3450_v56 = vmul.f32 %v3440_v62, %v3405_v13 }
 0x38f   : > { %v3449_v34 = vmul.f32 %v3440_v62, %v3400_v0  ;;  %v8539_v0 = vld [vmem:[#allocation272_spill] sm:$0xff] }
 0x390   : > { %v7531_v35 = vadd.f32 %v3450_v56, %v7480_v54  ;;  %v7579_v56 = vrot.slane %v278_v38, %v8539_v0 }
 0x391   : > { %v7534_v3 = vadd.f32 %v3449_v34, %v7482_v6  ;;  %v3415_v43 = vpop.permute.xlu1 %3414 }
 0x392   : > { %v3410_v39 = vpop.permute.xlu0 %3409  ;;  %v3452_v25 = vmul.f32 %v3440_v62, %v3415_v43 }
 0x393   : > { %v3451_v41 = vmul.f32 %v3440_v62, %v3410_v39 }
 0x394   : > { %v7536_v49 = vadd.f32 %v3452_v25, %v3336_v1 }
 0x395   : > { %v7538_v21 = vadd.f32 %v3451_v41, %v3335_v47  ;;  %v3425_v44 = vpop.permute.xlu1 %3424 }
 0x396   : > { %v3420_v57 = vpop.permute.xlu0 %3419  ;;  %v3454_v50 = vmul.f32 %v3440_v62, %v3425_v44 }
 0x397   : > { %v3453_v40 = vmul.f32 %v3440_v62, %v3420_v57 }
 0x398   : > { %v7540_v17 = vadd.f32 %v3454_v50, %v3338_v10 }
 0x399   : > { %v7542_v51 = vadd.f32 %v3453_v40, %v3337_v19  ;;  %v3435_v54 = vpop.permute.xlu1 %3434 }
 0x39a   : > { %v3430_v53 = vpop.permute.xlu0 %3429  ;;  %v3456_v6 = vmul.f32 %v3440_v62, %v3435_v54 }
 0x39b   : > { %v3455_v37 = vmul.f32 %v3440_v62, %v3430_v53  ;;  %v8540_v53 = vld [vmem:[#allocation275_spill] sm:$0xff] }
 0x39c   : > { %v7544_v31 = vadd.f32 %v3456_v6, %v3340_v63  ;;  %v7594_v6 = vrot.slane %v278_v38, %v8540_v53 }
 0x39d   : > { %v7546_v22 = vadd.f32 %v3455_v37, %v3339_v61  ;;  %v3499_v1 = vpop.permute.xlu1 %3498 }
 0x39e   : > { %v3494_v60 = vpop.permute.xlu0 %3493  ;;  %v3576_v34 = vmul.f32 %v7572_v36, %v3499_v1 }
 0x39f   : > { %v3575_v43 = vmul.f32 %v7572_v36, %v3494_v60 }
 0x3a0   : > { %v3592_v37 = vadd.f32 %v3576_v34, %v7507_v28 }
 0x3a1   : > { %v3509_v47 = vpop.permute.xlu1 %3508  ;;  %v3591_v1 = vadd.f32 %v3575_v43, %v7510_v46 }
 0x3a2   : > { %v3504_v32 = vpop.permute.xlu0 %3503  ;;  %v3578_v39 = vmul.f32 %v7572_v36, %v3509_v47 }
 0x3a3   : > { %v3577_v25 = vmul.f32 %v7572_v36, %v3504_v32 }
 0x3a4   : > { %v3594_v32 = vadd.f32 %v3578_v39, %v7513_v29 }
 0x3a5   : > { %v3519_v30 = vpop.permute.xlu1 %3518 }
 0x3a6   : > { %v3514_v4 = vpop.permute.xlu0 %3513  ;;  %v3580_v41 = vmul.f32 %v7572_v36, %v3519_v30  ;;  %v3593_v30 = vadd.f32 %v3577_v25, %v7516_v11 }
 0x3a7   : > { %v3579_v44 = vmul.f32 %v7572_v36, %v3514_v4 }
 0x3a9   : > { %v3529_v26 = vpop.permute.xlu1 %3528  ;;  %v3595_v38 = vadd.f32 %v3579_v44, %v7522_v27 }
 0x3aa   : > { %v3524_v7 = vpop.permute.xlu0 %3523  ;;  %v3582_v60 = vmul.f32 %v7572_v36, %v3529_v26 }
 0x3ab   : > { %v3581_v47 = vmul.f32 %v7572_v36, %v3524_v7 }
 0x3ad   : > { %v3539_v10 = vpop.permute.xlu1 %3538 }
 0x3ae   : > { %v3534_v20 = vpop.permute.xlu0 %3533  ;;  %v3584_v4 = vmul.f32 %v7572_v36, %v3539_v10  ;;  %v3598_v10 = vadd.f32 %v3582_v60, %v7525_v12 }
 0x3b2   : > { %v3549_v19 = vpop.permute.xlu1 %3548  ;;  %v3544_v52 = vpop.permute.xlu0 %3543 }
 0x3b3   : > { %v3585_v27 = vmul.f32 %v7572_v36, %v3544_v52  ;;  %v7626_v52 = vld [vmem:[%s7803_s3] ss:$0 sm:$0xff] }
 0x3b6   : > { %v3559_v8 = vpop.permute.xlu1 %3558  ;;  %v7548_v9 = vpop.permute.xlu0 %3553 }
 0x3b7   : > { %v3588_v25 = vmul.f32 %v7572_v36, %v3559_v8  ;;  %v3587_v53 = vmul.f32 %v7572_v36, %v7548_v9 }
 0x3ba   : > { %v7550_v62 = vpop.permute.xlu1 %3568  ;;  %v7552_v63 = vpop.permute.xlu0 %3563 }
 0x3be   : > { %v3631_v61 = vpop.permute.xlu1 %3630  ;;  %v3626_v55 = vpop.permute.xlu0 %3625 }
 0x3bf   : > { %v3708_v40 = vmul.f32 %v7579_v56, %v3631_v61  ;;  %v3707_v54 = vmul.f32 %v7579_v56, %v3626_v55  ;;  %v3583_v61 = vmul.f32 %v7572_v36, %v3534_v20  ;;  %v3596_v55 = vadd.f32 %v3580_v41, %v7519_v15 }
 0x3c0   : > { %v3597_v20 = vadd.f32 %v3581_v47, %v7528_v59  ;;  %v3586_v15 = vmul.f32 %v7572_v36, %v3549_v19 }
 0x3c1   : > { %v3724_v0 = vadd.f32 %v3708_v40, %v3592_v37  ;;  %v3723_v7 = vadd.f32 %v3707_v54, %v3591_v1  ;;  %v3599_v34 = vadd.f32 %v3583_v61, %v7534_v3 }
 0x3c2   : > { %v3641_v33 = vpop.permute.xlu1 %3640  ;;  %v3636_v16 = vpop.permute.xlu0 %3635  ;;  %v7634_v54 = vadd.f32 %v3586_v15, %v7536_v49  ;;  %v7648_v49 = vadd.f32 %v3588_v25, %v7540_v17 }
 0x3c3   : > { %v3710_v28 = vmul.f32 %v7579_v56, %v3641_v33  ;;  %v3709_v46 = vmul.f32 %v7579_v56, %v3636_v16  ;;  %v7617_v33 = vld [vmem:[%s7802_s2] ss:$0 sm:$0xff]  ;;  %v3600_v16 = vadd.f32 %v3584_v4, %v7531_v35 }
 0x3c5   : > { %v3726_v12 = vadd.f32 %v3710_v28, %v3594_v32  ;;  %v3725_v59 = vadd.f32 %v3709_v46, %v3593_v30 }
 0x3c6   : > { %v3651_v42 = vpop.permute.xlu1 %3650  ;;  %v7554_v48 = vpop.permute.xlu0 %3645 }
 0x3c7   : > { %v3712_v19 = vmul.f32 %v7579_v56, %v3651_v42  ;;  %v7637_v42 = vadd.f32 %v3585_v27, %v7538_v21  ;;  %v3711_v37 = vmul.f32 %v7579_v56, %v7554_v48 }
 0x3c9   : > { %v3728_v30 = vadd.f32 %v3712_v19, %v3596_v55 }
 0x3ca   : > { %v7556_v5 = vpop.permute.xlu1 %3660  ;;  %v7558_v18 = vpop.permute.xlu0 %3655 }
 0x3cb   : > { %v3714_v21 = vmul.f32 %v7579_v56, %v7556_v5  ;;  %v3713_v9 = vmul.f32 %v7579_v56, %v7558_v18 }
 0x3cd   : > { %v3729_v15 = vadd.f32 %v3713_v9, %v3597_v20 }
 0x3ce   : > { %v7560_v2 = vpop.permute.xlu1 %3670  ;;  %v7562_v23 = vpop.permute.xlu0 %3665 }
 0x3cf   : > { %v3716_v17 = vmul.f32 %v7579_v56, %v7560_v2  ;;  %v3715_v5 = vmul.f32 %v7579_v56, %v7562_v23 }
 0x3d1   : > { %v3732_v19 = vadd.f32 %v3716_v17, %v3600_v16 }
 0x3d2   : > { %v7567_v24 = vpop.permute.xlu1 %3680  ;;  %v7569_v45 = vpop.permute.xlu0 %3675 }
 0x3d6   : > { %v7574_v14 = vpop.permute.xlu1 %3690  ;;  %v7576_v13 = vpop.permute.xlu0 %3685 }
 0x3da   : > { %v7587_v57 = vpop.permute.xlu1 %3700  ;;  %v7589_v50 = vpop.permute.xlu0 %3695 }
 0x3de   : > { %v3763_v58 = vpop.permute.xlu1 %3762  ;;  %v3758_v26 = vpop.permute.xlu0 %3757 }
 0x3df   : > { %v3840_v29 = vmul.f32 %v7594_v6, %v3763_v58  ;;  %v3839_v11 = vmul.f32 %v7594_v6, %v3758_v26  ;;  %v3727_v26 = vadd.f32 %v3711_v37, %v3595_v38 }
 0x3e1   : > { %v3856_v43 = vadd.f32 %v3840_v29, %v3724_v0  ;;  %v3855_v39 = vadd.f32 %v3839_v11, %v3723_v7  ;;  %v3730_v11 = vadd.f32 %v3714_v21, %v3598_v10 }
 0x3e2   : > { %v3773_v41 = vpop.permute.xlu1 %3772  ;;  %v3768_v44 = vpop.permute.xlu0 %3767 }
 0x3e3   : > { %v3879_v35 = vmul.f32 %v7617_v33, %v3856_v43  ;;  %v3878_v3 = vmul.f32 %v7617_v33, %v3855_v39  ;;  %v3842_v40 = vmul.f32 %v7594_v6, %v3773_v41  ;;  %v3841_v8 = vmul.f32 %v7594_v6, %v3768_v44 }
 0x3e4   : > { %v3731_v41 = vadd.f32 %v3715_v5, %v3599_v34 }
 0x3e5   : > { %v3902_v1 = vadd.f32 %v7626_v52, %v3879_v35  ;;  %v3901_v60 = vadd.f32 %v7626_v52, %v3878_v3  ;;  %v3858_v47 = vadd.f32 %v3842_v40, %v3726_v12  ;;  %v3857_v32 = vadd.f32 %v3841_v8, %v3725_v59 }
 0x3e6   : > { %v3783_v4 = vpop.permute.xlu1 %3782  ;;  %v3778_v48 = vpop.permute.xlu0 %3777  ;;  %v3603_v59 = vadd.f32 %v3587_v53, %v7542_v51  ;;  %v3718_v40 = vmul.f32 %v7579_v56, %v7567_v24  ;;  %v3717_v8 = vmul.f32 %v7579_v56, %v7569_v45  ;;  %v3720_v24 = vmul.f32 %v7579_v56, %v7574_v14 }
 0x3e7   : > { %v3918_v61 = vmax.f32 %v3902_v1, 0.0  ;;  %v3917_v28 = vmax.f32 %v3901_v60, 0.0  ;;  %v3881_v46 = vmul.f32 %v7617_v33, %v3858_v47  ;;  %v3880_v58 = vmul.f32 %v7617_v33, %v3857_v32 }
 0x3e8   : > { %v3844_v55 = vmul.f32 %v7594_v6, %v3783_v4  ;;  %v3843_v0 = vmul.f32 %v7594_v6, %v3778_v48  ;;  %v3719_v45 = vmul.f32 %v7579_v56, %v7576_v13  ;;  %v3734_v14 = vadd.f32 %v3718_v40, %v7634_v54 }
 0x3e9   : > { %v4664_v18 = vpack.c.bf16 %v3918_v61, %v3917_v28  ;;  %v3904_v7 = vadd.f32 %v7626_v52, %v3881_v46  ;;  %v3903_v29 = vadd.f32 %v7626_v52, %v3880_v58  ;;  %v3590_v61 = vmul.f32 %v7572_v36, %v7550_v62 }
 0x3ea   : > { %v3860_v27 = vadd.f32 %v3844_v55, %v3728_v30  ;;  %v3859_v43 = vadd.f32 %v3843_v0, %v3727_v26  ;;  %v3793_v38 = vpop.permute.xlu1 %3792  ;;  %v3788_v39 = vpop.permute.xlu0 %3787  ;;  %v3589_v28 = vmul.f32 %v7572_v36, %v7552_v63  ;;  %v3733_v5 = vadd.f32 %v3717_v8, %v7637_v42 }
 0x3eb   : > { %4665 = vst [vmem:[%s7664_s13] sm:$0xff] %v4664_v18   ;;  %v3920_v2 = vmax.f32 %v3904_v7, 0.0  ;;  %v3919_v25 = vmax.f32 %v3903_v29, 0.0  ;;  %v3846_v12 = vmul.f32 %v7594_v6, %v3793_v38  ;;  %v3845_v23 = vmul.f32 %v7594_v6, %v3788_v39 }
 0x3ec   : > { %v3883_v10 = vmul.f32 %v7617_v33, %v3860_v27  ;;  %v3882_v20 = vmul.f32 %v7617_v33, %v3859_v43  ;;  %v3736_v18 = vadd.f32 %v3720_v24, %v7648_v49  ;;  %v3735_v36 = vadd.f32 %v3719_v45, %v3603_v59 }
 0x3ed   : > { %v4669_v44 = vpack.c.bf16 %v3920_v2, %v3919_v25  ;;  %v3862_v35 = vadd.f32 %v3846_v12, %v3730_v11  ;;  %v3861_v3 = vadd.f32 %v3845_v23, %v3729_v15  ;;  %v3722_v11 = vmul.f32 %v7579_v56, %v7587_v57 }
 0x3ee   : > { %v3906_v37 = vadd.f32 %v7626_v52, %v3883_v10  ;;  %v3905_v1 = vadd.f32 %v7626_v52, %v3882_v20  ;;  %v3803_v51 = vpop.permute.xlu1 %3802  ;;  %v3798_v16 = vpop.permute.xlu0 %3797  ;;  %v3721_v42 = vmul.f32 %v7579_v56, %v7589_v50  ;;  %v3606_v12 = vadd.f32 %v3590_v61, %v7544_v31 }
 0x3ef   : > { %4701 = vst [vmem:[%s7664_s13 + $0x8] sm:$0xff] %v4669_v44   ;;  %v3885_v53 = vmul.f32 %v7617_v33, %v3862_v35  ;;  %v3884_v34 = vmul.f32 %v7617_v33, %v3861_v3  ;;  %v3848_v60 = vmul.f32 %v7594_v6, %v3803_v51  ;;  %v3847_v47 = vmul.f32 %v7594_v6, %v3798_v16 }
 0x3f0   : > { %v3922_v32 = vmax.f32 %v3906_v37, 0.0  ;;  %v3921_v30 = vmax.f32 %v3905_v1, 0.0  ;;  %v3605_v57 = vadd.f32 %v3589_v28, %v7546_v22  ;;  %v3738_v10 = vadd.f32 %v3722_v11, %v3606_v12 }
 0x3f1   : > { %v3908_v21 = vadd.f32 %v7626_v52, %v3885_v53  ;;  %v3907_v9 = vadd.f32 %v7626_v52, %v3884_v34  ;;  %v3864_v4 = vadd.f32 %v3848_v60, %v3732_v19  ;;  %v3863_v48 = vadd.f32 %v3847_v47, %v3731_v41 }
 0x3f2   : > { %v4674_v46 = vpack.c.bf16 %v3922_v32, %v3921_v30  ;;  %v3813_v58 = vpop.permute.xlu1 %3812  ;;  %v3808_v13 = vpop.permute.xlu0 %3807  ;;  %v3737_v20 = vadd.f32 %v3721_v42, %v3605_v57 }
 0x3f3   : > { %v3924_v26 = vmax.f32 %v3908_v21, 0.0  ;;  %v3923_v17 = vmax.f32 %v3907_v9, 0.0  ;;  %v3887_v55 = vmul.f32 %v7617_v33, %v3864_v4  ;;  %v3886_v0 = vmul.f32 %v7617_v33, %v3863_v48 }
 0x3f4   : > { %4702 = vst [vmem:[%s7664_s13 + $0x10] sm:$0xff] %v4674_v46   ;;  %v3850_v62 = vmul.f32 %v7594_v6, %v3813_v58  ;;  %v3849_v63 = vmul.f32 %v7594_v6, %v3808_v13 }
 0x3f5   : > { %v4679_v54 = vpack.c.bf16 %v3924_v26, %v3923_v17  ;;  %v3910_v7 = vadd.f32 %v7626_v52, %v3887_v55  ;;  %v3909_v29 = vadd.f32 %v7626_v52, %v3886_v0 }
 0x3f6   : > { %v3866_v49 = vadd.f32 %v3850_v62, %v3734_v14  ;;  %v3865_v15 = vadd.f32 %v3849_v63, %v3733_v5  ;;  %v3823_v27 = vpop.permute.xlu1 %3822  ;;  %v3818_v43 = vpop.permute.xlu0 %3817 }
 0x3f7   : > { %4703 = vst [vmem:[%s7664_s13 + $0x18] sm:$0xff] %v4679_v54   ;;  %v3926_v38 = vmax.f32 %v3910_v7, 0.0  ;;  %v3925_v39 = vmax.f32 %v3909_v29, 0.0  ;;  %v3852_v2 = vmul.f32 %v7594_v6, %v3823_v27  ;;  %v3851_v25 = vmul.f32 %v7594_v6, %v3818_v43 }
 0x3f8   : > { %v3889_v23 = vmul.f32 %v7617_v33, %v3866_v49  ;;  %v3888_v56 = vmul.f32 %v7617_v33, %v3865_v15 }
 0x3f9   : > { %v4684_v50 = vpack.c.bf16 %v3926_v38, %v3925_v39  ;;  %v3868_v59 = vadd.f32 %v3852_v2, %v3736_v18  ;;  %v3867_v19 = vadd.f32 %v3851_v25, %v3735_v36 }
 0x3fa   : > { %v3912_v41 = vadd.f32 %v7626_v52, %v3889_v23  ;;  %v3911_v44 = vadd.f32 %v7626_v52, %v3888_v56  ;;  %v3833_v35 = vpop.permute.xlu1 %3832  ;;  %v3828_v31 = vpop.permute.xlu0 %3827 }
 0x3fb   : > { %4704 = vst [vmem:[%s7664_s13 + $0x20] sm:$0xff] %v4684_v50   ;;  %v3891_v22 = vmul.f32 %v7617_v33, %v3868_v59  ;;  %v3890_v3 = vmul.f32 %v7617_v33, %v3867_v19  ;;  %v3854_v40 = vmul.f32 %v7594_v6, %v3833_v35  ;;  %v3853_v8 = vmul.f32 %v7594_v6, %v3828_v31 }
 0x3fc   : > { %v3928_v37 = vmax.f32 %v3912_v41, 0.0  ;;  %v3927_v1 = vmax.f32 %v3911_v44, 0.0 }
 0x3fd   : > { %v3914_v51 = vadd.f32 %v7626_v52, %v3891_v22  ;;  %v3913_v16 = vadd.f32 %v7626_v52, %v3890_v3  ;;  %v3870_v53 = vadd.f32 %v3854_v40, %v3738_v10  ;;  %v3869_v34 = vadd.f32 %v3853_v8, %v3737_v20 }
 0x3fe   : > { %v4689_v60 = vpack.c.bf16 %v3928_v37, %v3927_v1 }
 0x3ff   : > { %v3930_v47 = vmax.f32 %v3914_v51, 0.0  ;;  %v3929_v24 = vmax.f32 %v3913_v16, 0.0  ;;  %v3893_v6 = vmul.f32 %v7617_v33, %v3870_v53  ;;  %v3892_v45 = vmul.f32 %v7617_v33, %v3869_v34 }
 0x400   : > { %4705 = vst [vmem:[%s7664_s13 + $0x28] sm:$0xff] %v4689_v60  }
 0x401   : > { %v4694_v32 = vpack.c.bf16 %v3930_v47, %v3929_v24  ;;  %v3916_v30 = vadd.f32 %v7626_v52, %v3893_v6  ;;  %v3915_v21 = vadd.f32 %v7626_v52, %v3892_v45 }
 0x403   : > { %4706 = vst [vmem:[%s7664_s13 + $0x30] sm:$0xff] %v4694_v32   ;;  %v3932_v9 = vmax.f32 %v3916_v30, 0.0  ;;  %v3931_v4 = vmax.f32 %v3915_v21, 0.0 }
 0x405   : > { %v4699_v33 = vpack.c.bf16 %v3932_v9, %v3931_v4 }
 0x407   : > { %4707 = vst [vmem:[%s7664_s13 + $0x38] sm:$0xff] %v4699_v33  }
 0x408   : > { %4850 = shalt.err (!%p4847_p8)
}
 0x409   : > { %s4851_s10 = scalar_lea.hbm %s7736_s9, 1024  ;;  %s4855_s28 = scalar_lea.hbm %s7804_s4, 32768 }
 0x40a   : > { %p4852_p9 = scmp.ne.s32.totalorder %s7736_s9, %s4851_s10  ;;  %p4856_p12 = scmp.lt.s32.totalorder %s7736_s9, %s7804_s4 }
 0x40b   : > { %p4857_p13 = scmp.lt.s32.totalorder %s4855_s28, %s4851_s10 }
 0x40c   : > { %p4853_p10 = pnand %p4852_p9, %p5038_p5 }
 0x40d   : > { %p4858_p0 = por %p4857_p13, %p4856_p12 }
 0x40e   : > { %p4854_p11 = pneg %p4853_p10 }
 0x410   : > { %p4859_p1 = pnand %p4858_p0, %p4854_p11 }
 0x412   : > { %4862 = shalt.err (!%p4859_p1)
}
 0x413   : > { %s4949_s8 = smov 64   ;;  %s4950_s11 = smov 4  }
 0x414   : > { %4709 = dma.vmem_to_hbm [thread:$0]  (%p5038_p5), %s7738_s6, 1024, %s7736_s9, %s7743_s29, %s4949_s8, %s4949_s8, %s4950_s11  }
 0x415 PF: > { %p4715_p2 = scmp.ge.s32.totalorder %s4945_s24, 2  ;;  %s4048_s14 = sand.u32 1, %s4909_s15  }
 0x416   : > { %s4049_s25 = scalar_lea.sflag [#allocation3], %s4048_s14 }
 0x417   : > { %p4712_p3 = pnand %p4715_p2, %p5045_p7 }
 0x419   : > { %p4713_p4 = pneg %p4712_p3 }
 0x41b   : > { %4904 = dma.done.wait (%p4713_p4), %s4049_s25, 1024  }
 0x41c   : > { %4906 = vsyncadd (%p4713_p4), %s4049_s25, 4294966272  ;;  %s17_s24 = sadd.s32 1, %s4945_s24   ;;  %s8541_s30 = sld [smem:[#allocation5_spill]] }
 0x41d   : > { %p14_p6 = scmp.ge.s32.totalorder %s17_s24, 34   ;;  %s8542_s15 = smov %s4913_s16 }
 0x41e   : > { %s8543_s16 = smov %s4917_s17  ;;  %s8544_s17 = smov %s5061_s12 }
 0x41f   : > { %s8545_s18 = smov %s4933_s21  ;;  %s8546_s19 = smov %s4937_s22 }
 0x420   : > { %s8547_s20 = smov %s4941_s23  ;;  %s8548_s21 = smov %s8552_s26 }
 0x421   : > { %s8549_s22 = smov %s8556_s27  ;;  %16 = sbr.rel (!%p14_p6) target bundleno = 6 (0x6), region = 89 }
 0x422   : > { %s8550_s23 = smov %s8541_s30 }
 0x426   :  { %4054 = vsyncpa [#allocation3], 1 }
 0x427   :  { %4056 = vsyncpa [#allocation3 + $0x1], 1 }

</bundles_post_ra>
